<compile_context>
chip_gen: v5e
topology: v5e:2x2
jax: 0.10.0
libtpu: 0.0.40
codegen_flags: <defaults>
</compile_context>

<pallas_src>
import functools

import jax
import jax.numpy as jnp
from jax import lax
from jax.experimental import pallas as pl
from jax.experimental.pallas import tpu as pltpu

LANE = 128  # score-tile width along the source axis (lane-dense)


def attn_kernel(src_len_ref,            # SMEM (B,) int32        (scalar prefetch)
                h_ref,                  # VMEM (Bb, S_pad, 2H)   encoder outputs (batch-major)
                s_ref,                  # VMEM (Bb, T, H)        decoder states (batch-major)
                w1_ref, b1_ref,         # VMEM (2H, H), (1, H)   fc1 (pre-transposed)
                w2_ref, b2_ref,         # VMEM (H, H),  (1, H)   fc2 (pre-transposed)
                v_ref,                  # VMEM (1, H)            v.weight
                o_ref,                  # VMEM (Bb, T, 2H)
                wh_ref,                 # VMEM scratch (Bb, S_pad, H)
                ws_ref,                 # VMEM scratch (Bb, T, H)
                sc_ref,                 # VMEM scratch (T, S_pad)
                *, tanh_dtype):
    Bb, S_pad, H2 = h_ref.shape
    _, T, H = s_ref.shape
    g = pl.program_id(0)
    n_tiles = S_pad // LANE

    # --- fused projections for the whole batch block, staged into VMEM scratch ---
    # (results are written back immediately; nothing block-sized stays live in vregs)
    wh_ref[...] = (jnp.dot(h_ref[...].reshape(Bb * S_pad, H2), w1_ref[...],
                           preferred_element_type=jnp.float32)
                   + b1_ref[...]).reshape(Bb, S_pad, H)
    ws_ref[...] = (jnp.dot(s_ref[...].reshape(Bb * T, H), w2_ref[...],
                           preferred_element_type=jnp.float32)
                   + b2_ref[...]).reshape(Bb, T, H)

    # Hoisted out of all loops (JAX does not CSE broadcasts).
    v_row = v_ref[...].reshape(1, 1, H)                               # (1, 1, H)
    col = lax.broadcasted_iota(jnp.int32, (T, S_pad), 1)              # source position ids
    neg_big = jnp.float32(-1e30)

    def batch_body(b, carry):
        ws_b = ws_ref[b]                                              # (T, H), leading-axis slice

        def tile_body(ti, c):
            s0 = pl.multiple_of(ti * LANE, LANE)
            wh_t = wh_ref[b, pl.ds(s0, LANE), :]                      # (LANE, H)
            x = ws_b[:, None, :] + wh_t[None, :, :]                   # (T, LANE, H)
            # tanh is the EUP-bound phase; tanh_dtype=bf16 halves it on v6e/v7x
            # (opt-in — costs a little accuracy, see wrapper).
            hs = jnp.tanh(x.astype(tanh_dtype)).astype(jnp.float32)
            # v-contraction on VPU + cross-lane reduce (XLU has slack; keeps the
            # MXU free and avoids T serialized M=1 matmul pushes).
            sc_ref[:, pl.ds(s0, LANE)] = jnp.sum(hs * v_row, axis=-1)  # (T, LANE)
            return c

        lax.fori_loop(0, n_tiles, tile_body, 0)

        # masked softmax over source positions (finite mask + zero-after-exp).
        length = src_len_ref[g * Bb + b]
        valid = col < length
        sm = jnp.where(valid, sc_ref[...], neg_big)                   # (T, S_pad)
        m = jnp.max(sm, axis=-1, keepdims=True)
        e = jnp.where(valid, jnp.exp(sm - m), 0.0)                    # guards all-masked rows
        denom = jnp.sum(e, axis=-1, keepdims=True)
        p = e * pl.reciprocal(denom, approx=True)                     # attention weights

        # context: (T, S_pad) @ (S_pad, 2H) on the MXU; padded columns have p == 0
        # and zero-filled h, so they contribute exactly 0.
        ctx = jnp.dot(p, h_ref[b], preferred_element_type=jnp.float32)
        o_ref[b] = ctx.astype(o_ref.dtype)                            # lane-dense (T, 2H) store
        return carry

    lax.fori_loop(0, Bb, batch_body, 0)


def _pick_block_b(batch, s_pad, h2, vmem_budget_bytes=8 * 1024 * 1024):
    """Largest divisor of `batch` whose per-block working set fits the budget and
    (when batch > 1) leaves >= 2 grid steps so both v7x TensorCores get work."""
    # double-buffered encoder block + wh scratch dominate the per-batch-element bytes
    per_b = s_pad * h2 * 4 * 2 + s_pad * (h2 // 2) * 4
    cap = max(1, vmem_budget_bytes // per_b)
    best = 1
    for bb in range(1, batch + 1):
        if batch % bb != 0 or bb > cap:
            continue
        if batch > 1 and bb > batch // 2:     # keep the grid >= 2 "parallel" steps
            continue
        best = bb
    return best


def attn_forward(outputs, src_len, ss, params, block_b=None, tanh_dtype=jnp.float32):
    """outputs: (S, B, 2H) f32, src_len: (B,) int, ss: (T, B, H) f32 -> (B, T, 2H).

    Set tanh_dtype=jnp.bfloat16 on v6e/v7x for ~2x on the EUP-bound tanh phase
    (costs ~1e-3-level accuracy); default f32 keeps tight numerics.
    """
    w1, b1, w2, b2, vw, vb = params   # vb unused: softmax is shift-invariant
    del vb
    S, B, H2 = outputs.shape
    T, _, H = ss.shape

    # Batch-major layout + lane-dense padding of the source axis (one-time XLA copies).
    S_pad = ((S + LANE - 1) // LANE) * LANE
    h_bm = jnp.transpose(outputs, (1, 0, 2))                 # (B, S, 2H)
    if S_pad != S:
        h_bm = jnp.pad(h_bm, ((0, 0), (0, S_pad - S), (0, 0)))  # zero-fill padded columns
    s_bm = jnp.transpose(ss, (1, 0, 2))                      # (B, T, H)

    if block_b is None:
        block_b = _pick_block_b(B, S_pad, H2)
    assert B % block_b == 0

    kernel = functools.partial(attn_kernel, tanh_dtype=tanh_dtype)

    grid_spec = pltpu.PrefetchScalarGridSpec(
        num_scalar_prefetch=1,                               # src_len lands in SMEM
        grid=(B // block_b,),
        in_specs=[
            pl.BlockSpec((block_b, S_pad, H2), lambda g, sl: (g, 0, 0)),  # encoder (batch-major)
            pl.BlockSpec((block_b, T, H),      lambda g, sl: (g, 0, 0)),  # decoder (batch-major)
            pl.BlockSpec((H2, H), lambda g, sl: (0, 0)),                  # W1^T
            pl.BlockSpec((1, H),  lambda g, sl: (0, 0)),                  # b1
            pl.BlockSpec((H, H),  lambda g, sl: (0, 0)),                  # W2^T
            pl.BlockSpec((1, H),  lambda g, sl: (0, 0)),                  # b2
            pl.BlockSpec((1, H),  lambda g, sl: (0, 0)),                  # v weight
        ],
        out_specs=pl.BlockSpec((block_b, T, H2), lambda g, sl: (g, 0, 0)),
        scratch_shapes=[
            pltpu.VMEM((block_b, S_pad, H), jnp.float32),    # wh projection staging
            pltpu.VMEM((block_b, T, H), jnp.float32),        # ws projection staging
            pltpu.VMEM((T, S_pad), jnp.float32),             # score tiles
        ],
    )
    return pl.pallas_call(
        kernel,
        out_shape=jax.ShapeDtypeStruct((B, T, H2), jnp.float32),
        grid_spec=grid_spec,
        compiler_params=pltpu.CompilerParams(
            dimension_semantics=("parallel",),               # batch blocks are independent
            vmem_limit_bytes=32 * 1024 * 1024,               # safe on v5e/v6e/v7x
        ),
    )(src_len.astype(jnp.int32), h_bm, s_bm, w1, b1, w2, b2, vw)


def attn_reference(outputs, src_len, ss, params):
    """Pure-JAX replica of the PyTorch forward for verification."""
    w1, b1, w2, b2, vw, vb = params
    S, B, H2 = outputs.shape
    T, _, H = ss.shape
    wh = (outputs.reshape(-1, H2) @ w1 + b1).reshape(S, B, H).transpose(1, 0, 2)   # (B,S,H)
    ws = (ss.reshape(-1, H) @ w2 + b2).reshape(T, B, H).transpose(1, 0, 2)         # (B,T,H)
    hs = jnp.tanh(wh[:, None, :, :] + ws[:, :, None, :])                           # (B,T,S,H)
    scores = jnp.einsum('btsh,h->bts', hs, vw[0]) + vb[0, 0]                       # (B,T,S)
    col = jnp.arange(S)[None, None, :]
    scores = jnp.where(col >= src_len[:, None, None], -jnp.inf, scores)
    p = jax.nn.softmax(scores, axis=-1)
    return jnp.einsum('bts,bsd->btd', p, outputs.transpose(1, 0, 2))


if __name__ == "__main__":
    hidden = 128
    B, S, T = 16, 16, 8
    H2 = hidden * 2

    key = jax.random.PRNGKey(0)
    k1, k2, k3, k4, k5, k6, k7, k8 = jax.random.split(key, 8)

    # nn.Linear parameters, stored pre-transposed where used as (in, out).
    w1 = jax.random.normal(k1, (H2, hidden), jnp.float32) * 0.1      # fc1.weight^T
    b1 = jax.random.normal(k2, (1, hidden), jnp.float32) * 0.1       # fc1.bias
    w2 = jax.random.normal(k3, (hidden, hidden), jnp.float32) * 0.1  # fc2.weight^T
    b2 = jax.random.normal(k4, (1, hidden), jnp.float32) * 0.1       # fc2.bias
    vw = jax.random.normal(k5, (1, hidden), jnp.float32) * 0.1       # v.weight (1, H)
    vb = jax.random.normal(k6, (1, 1), jnp.float32) * 0.1            # v.bias
    params = (w1, b1, w2, b2, vw, vb)

    outputs = jax.random.normal(k7, (S, B, H2), jnp.float32)
    ss = jax.random.normal(k8, (T, B, hidden), jnp.float32)
    src_len = jnp.array([16, 13, 5, 1, 16, 7, 12, 9, 3, 16, 10, 2, 8, 15, 6, 11],
                        dtype=jnp.int32)

    got = jax.block_until_ready(attn_forward(outputs, src_len, ss, params))
    want = jax.block_until_ready(attn_reference(outputs, src_len, ss, params))

    assert got.shape == (B, T, H2), got.shape
    max_err = float(jnp.max(jnp.abs(got - want)))
    assert jnp.allclose(got, want, rtol=5e-3, atol=5e-3), max_err
    print("KERNEL_OK")
</pallas_src>

<mosaic_0001>
module attributes {stable_mosaic.version = 11 : i64} {
  func.func @attn_kernel(%arg0: i32, %arg1: memref<16xi32, #tpu.memory_space<smem>>, %arg2: memref<8x128x256xf32, #tpu.memory_space<vmem>>, %arg3: memref<8x8x128xf32, #tpu.memory_space<vmem>>, %arg4: memref<256x128xf32, #tpu.memory_space<vmem>>, %arg5: memref<1x128xf32, #tpu.memory_space<vmem>>, %arg6: memref<128x128xf32, #tpu.memory_space<vmem>>, %arg7: memref<1x128xf32, #tpu.memory_space<vmem>>, %arg8: memref<1x128xf32, #tpu.memory_space<vmem>>, %arg9: memref<8x8x256xf32, #tpu.memory_space<vmem>>, %arg10: memref<8x128x128xf32, #tpu.memory_space<vmem>>, %arg11: memref<8x8x128xf32, #tpu.memory_space<vmem>>, %arg12: memref<8x128xf32, #tpu.memory_space<vmem>>) attributes {dimension_semantics = [#tpu.dimension_semantics<parallel>], iteration_bounds = array<i64: 2>, scalar_prefetch = 1 : i64, scratch_operands = 3 : i64, tpu.core_type = #tpu.core_type<tc>, window_params = [{transform_indices = @transform_0, window_bounds = array<i64: 8, 128, 256>}, {transform_indices = @transform_1, window_bounds = array<i64: 8, 8, 128>}, {pipeline_mode = #tpu.pipeline_mode<synchronous>, transform_indices = @transform_2, window_bounds = array<i64: 256, 128>}, {pipeline_mode = #tpu.pipeline_mode<synchronous>, transform_indices = @transform_3, window_bounds = array<i64: 1, 128>}, {pipeline_mode = #tpu.pipeline_mode<synchronous>, transform_indices = @transform_4, window_bounds = array<i64: 128, 128>}, {pipeline_mode = #tpu.pipeline_mode<synchronous>, transform_indices = @transform_5, window_bounds = array<i64: 1, 128>}, {pipeline_mode = #tpu.pipeline_mode<synchronous>, transform_indices = @transform_6, window_bounds = array<i64: 1, 128>}, {transform_indices = @transform_7, window_bounds = array<i64: 8, 8, 256>}]} {
    %c0 = arith.constant 0 : index
    %c0_0 = arith.constant 0 : index
    %c0_1 = arith.constant 0 : index
    %0 = vector.load %arg2[%c0, %c0_0, %c0_1] : memref<8x128x256xf32, #tpu.memory_space<vmem>>, vector<8x128x256xf32>
    %1 = vector.shape_cast %0 : vector<8x128x256xf32> to vector<1024x256xf32>
    %c0_2 = arith.constant 0 : index
    %c0_3 = arith.constant 0 : index
    %2 = vector.load %arg4[%c0_2, %c0_3] : memref<256x128xf32, #tpu.memory_space<vmem>>, vector<256x128xf32>
    %cst = arith.constant dense<0.000000e+00> : vector<1024x128xf32>
    %3 = tpu.matmul %1, %2, %cst {dimension_numbers = #tpu.dot_dimension_numbers<[1], [0], [0], [1], [0, 0, 1, 1], [], []>} : vector<1024x256xf32>, vector<256x128xf32>, vector<1024x128xf32> -> vector<1024x128xf32>
    %c0_4 = arith.constant 0 : index
    %c0_5 = arith.constant 0 : index
    %4 = vector.load %arg5[%c0_4, %c0_5] : memref<1x128xf32, #tpu.memory_space<vmem>>, vector<1x128xf32>
    %5 = vector.broadcast %4 : vector<1x128xf32> to vector<1024x128xf32>
    %6 = arith.addf %3, %5 : vector<1024x128xf32>
    %7 = vector.shape_cast %6 : vector<1024x128xf32> to vector<8x128x128xf32>
    %c0_6 = arith.constant 0 : index
    %c0_7 = arith.constant 0 : index
    %c0_8 = arith.constant 0 : index
    %8 = vector.load %arg10[%c0_6, %c0_7, %c0_8] : memref<8x128x128xf32, #tpu.memory_space<vmem>>, vector<8x128x128xf32>
    tpu.vector_store %arg10[%c0_6, %c0_7, %c0_8], %7 {strides = array<i32>} : memref<8x128x128xf32, #tpu.memory_space<vmem>>, vector<8x128x128xf32>,
    %c0_9 = arith.constant 0 : index
    %c0_10 = arith.constant 0 : index
    %c0_11 = arith.constant 0 : index
    %9 = vector.load %arg3[%c0_9, %c0_10, %c0_11] : memref<8x8x128xf32, #tpu.memory_space<vmem>>, vector<8x8x128xf32>
    %10 = vector.shape_cast %9 : vector<8x8x128xf32> to vector<64x128xf32>
    %c0_12 = arith.constant 0 : index
    %c0_13 = arith.constant 0 : index
    %11 = vector.load %arg6[%c0_12, %c0_13] : memref<128x128xf32, #tpu.memory_space<vmem>>, vector<128x128xf32>
    %cst_14 = arith.constant dense<0.000000e+00> : vector<64x128xf32>
    %12 = tpu.matmul %10, %11, %cst_14 {dimension_numbers = #tpu.dot_dimension_numbers<[1], [0], [0], [1], [0, 0, 1, 1], [], []>} : vector<64x128xf32>, vector<128x128xf32>, vector<64x128xf32> -> vector<64x128xf32>
    %c0_15 = arith.constant 0 : index
    %c0_16 = arith.constant 0 : index
    %13 = vector.load %arg7[%c0_15, %c0_16] : memref<1x128xf32, #tpu.memory_space<vmem>>, vector<1x128xf32>
    %14 = vector.broadcast %13 : vector<1x128xf32> to vector<64x128xf32>
    %15 = arith.addf %12, %14 : vector<64x128xf32>
    %16 = vector.shape_cast %15 : vector<64x128xf32> to vector<8x8x128xf32>
    %c0_17 = arith.constant 0 : index
    %c0_18 = arith.constant 0 : index
    %c0_19 = arith.constant 0 : index
    %17 = vector.load %arg11[%c0_17, %c0_18, %c0_19] : memref<8x8x128xf32, #tpu.memory_space<vmem>>, vector<8x8x128xf32>
    tpu.vector_store %arg11[%c0_17, %c0_18, %c0_19], %16 {strides = array<i32>} : memref<8x8x128xf32, #tpu.memory_space<vmem>>, vector<8x8x128xf32>,
    %c0_20 = arith.constant 0 : index
    %c0_21 = arith.constant 0 : index
    %18 = vector.load %arg8[%c0_20, %c0_21] : memref<1x128xf32, #tpu.memory_space<vmem>>, vector<1x128xf32>
    %19 = vector.shape_cast %18 : vector<1x128xf32> to vector<1x1x128xf32>
    %20 = tpu.iota {dimensions = array<i32: 1>} : vector<8x128xi32>
    %cst_22 = arith.constant -1.000000e+30 : f32
    %c0_i32 = arith.constant 0 : i32
    %c8_i32 = arith.constant 8 : i32
    %21 = arith.addi %c0_i32, %c8_i32 : i32
    %c1_i32 = arith.constant 1 : i32
    scf.for %arg13 = %c0_i32 to %21 step %c1_i32  : i32 {
      %22 = arith.index_cast %arg13 : i32 to index
      %c0_24 = arith.constant 0 : index
      %c0_25 = arith.constant 0 : index
      %23 = vector.load %arg11[%22, %c0_24, %c0_25] : memref<8x8x128xf32, #tpu.memory_space<vmem>>, vector<1x8x128xf32>
      %24 = vector.shape_cast %23 : vector<1x8x128xf32> to vector<8x128xf32>
      %c0_i32_26 = arith.constant 0 : i32
      %c128_i32 = arith.constant 128 : i32
      %25 = arith.muli %c0_i32_26, %c128_i32 : i32
      %26 = tpu.assume_multiple %25, 128 : i32
      %27 = arith.index_cast %arg13 : i32 to index
      %28 = arith.index_cast %26 : i32 to index
      %c0_27 = arith.constant 0 : index
      %29 = vector.load %arg10[%27, %28, %c0_27] : memref<8x128x128xf32, #tpu.memory_space<vmem>>, vector<1x128x128xf32>
      %30 = vector.shape_cast %29 : vector<1x128x128xf32> to vector<128x128xf32>
      %31 = vector.shape_cast %24 : vector<8x128xf32> to vector<8x1x128xf32>
      %32 = vector.shape_cast %30 : vector<128x128xf32> to vector<1x128x128xf32>
      %33 = vector.broadcast %31 : vector<8x1x128xf32> to vector<8x128x128xf32>
      %34 = vector.broadcast %32 : vector<1x128x128xf32> to vector<8x128x128xf32>
      %35 = arith.addf %33, %34 : vector<8x128x128xf32>
      %36 = math.tanh %35 : vector<8x128x128xf32>
      %37 = vector.broadcast %19 : vector<1x1x128xf32> to vector<8x128x128xf32>
      %38 = arith.mulf %36, %37 : vector<8x128x128xf32>
      %cst_28 = arith.constant dense<0.000000e+00> : vector<8x128xf32>
      %39 = vector.multi_reduction <add>, %38, %cst_28 [2] : vector<8x128x128xf32> to vector<8x128xf32>
      %c0_29 = arith.constant 0 : index
      %40 = arith.index_cast %26 : i32 to index
      %41 = vector.load %arg12[%c0_29, %40] : memref<8x128xf32, #tpu.memory_space<vmem>>, vector<8x128xf32>
      tpu.vector_store %arg12[%c0_29, %40], %39 {strides = array<i32>} : memref<8x128xf32, #tpu.memory_space<vmem>>, vector<8x128xf32>,
      %c1_i32_30 = arith.constant 1 : i32
      %c8_i32_31 = arith.constant 8 : i32
      %42 = arith.muli %arg0, %c8_i32_31 : i32
      %43 = arith.addi %42, %arg13 : i32
      %44 = arith.index_cast %43 : i32 to index
      %45 = memref.load %arg1[%44] : memref<16xi32, #tpu.memory_space<smem>>
      %46 = vector.broadcast %45 : i32 to vector<8x128xi32>
      %47 = arith.cmpi slt, %20, %46 : vector<8x128xi32>
      %c0_32 = arith.constant 0 : index
      %c0_33 = arith.constant 0 : index
      %48 = vector.load %arg12[%c0_32, %c0_33] : memref<8x128xf32, #tpu.memory_space<vmem>>, vector<8x128xf32>
      %49 = vector.broadcast %cst_22 : f32 to vector<8x128xf32>
      %50 = arith.select %47, %48, %49 : vector<8x128xi1>, vector<8x128xf32>
      %cst_34 = arith.constant dense<0xFF800000> : vector<8xf32>
      %51 = vector.multi_reduction <maximumf>, %50, %cst_34 [1] : vector<8x128xf32> to vector<8xf32>
      %52 = vector.shape_cast %51 : vector<8xf32> to vector<8x1xf32>
      %53 = vector.broadcast %52 : vector<8x1xf32> to vector<8x128xf32>
      %54 = arith.subf %50, %53 : vector<8x128xf32>
      %55 = math.exp %54 : vector<8x128xf32>
      %cst_35 = arith.constant 0.000000e+00 : f32
      %56 = vector.broadcast %cst_35 : f32 to vector<8x128xf32>
      %57 = arith.select %47, %55, %56 : vector<8x128xi1>, vector<8x128xf32>
      %cst_36 = arith.constant dense<0.000000e+00> : vector<8xf32>
      %58 = vector.multi_reduction <add>, %57, %cst_36 [1] : vector<8x128xf32> to vector<8xf32>
      %59 = vector.shape_cast %58 : vector<8xf32> to vector<8x1xf32>
      %60 = tpu.reciprocal %59 {approx = true} : vector<8x1xf32> -> vector<8x1xf32>
      %61 = vector.broadcast %60 : vector<8x1xf32> to vector<8x128xf32>
      %62 = arith.mulf %57, %61 : vector<8x128xf32>
      %63 = arith.index_cast %arg13 : i32 to index
      %c0_37 = arith.constant 0 : index
      %c0_38 = arith.constant 0 : index
      %64 = vector.load %arg2[%63, %c0_37, %c0_38] : memref<8x128x256xf32, #tpu.memory_space<vmem>>, vector<1x128x256xf32>
      %65 = vector.shape_cast %64 : vector<1x128x256xf32> to vector<128x256xf32>
      %cst_39 = arith.constant dense<0.000000e+00> : vector<8x256xf32>
      %66 = tpu.matmul %62, %65, %cst_39 {dimension_numbers = #tpu.dot_dimension_numbers<[1], [0], [0], [1], [0, 0, 1, 1], [], []>} : vector<8x128xf32>, vector<128x256xf32>, vector<8x256xf32> -> vector<8x256xf32>
      %67 = arith.index_cast %arg13 : i32 to index
      %c0_40 = arith.constant 0 : index
      %c0_41 = arith.constant 0 : index
      %68 = vector.load %arg9[%67, %c0_40, %c0_41] : memref<8x8x256xf32, #tpu.memory_space<vmem>>, vector<1x8x256xf32>
      %69 = vector.shape_cast %68 : vector<1x8x256xf32> to vector<8x256xf32>
      %70 = vector.shape_cast %66 : vector<8x256xf32> to vector<1x8x256xf32>
      tpu.vector_store %arg9[%67, %c0_40, %c0_41], %70 {strides = array<i32>} : memref<8x8x256xf32, #tpu.memory_space<vmem>>, vector<1x8x256xf32>,
    }
    %c8_i32_23 = arith.constant 8 : i32
    return
  }
  func.func @transform_0(%arg0: i32, %arg1: memref<16xi32, #tpu.memory_space<smem>>) -> (i32, i32, i32) {
    %c0_i32 = arith.constant 0 : i32
    %c0_i32_0 = arith.constant 0 : i32
    %c0_i32_1 = arith.constant 0 : i32
    return %arg0, %c0_i32, %c0_i32_0 : i32, i32, i32
  }
  func.func @transform_1(%arg0: i32, %arg1: memref<16xi32, #tpu.memory_space<smem>>) -> (i32, i32, i32) {
    %c0_i32 = arith.constant 0 : i32
    %c0_i32_0 = arith.constant 0 : i32
    %c0_i32_1 = arith.constant 0 : i32
    return %arg0, %c0_i32, %c0_i32_0 : i32, i32, i32
  }
  func.func @transform_2(%arg0: i32, %arg1: memref<16xi32, #tpu.memory_space<smem>>) -> (i32, i32) {
    %c0_i32 = arith.constant 0 : i32
    %c0_i32_0 = arith.constant 0 : i32
    %c0_i32_1 = arith.constant 0 : i32
    return %c0_i32, %c0_i32_0 : i32, i32
  }
  func.func @transform_3(%arg0: i32, %arg1: memref<16xi32, #tpu.memory_space<smem>>) -> (i32, i32) {
    %c0_i32 = arith.constant 0 : i32
    %c0_i32_0 = arith.constant 0 : i32
    %c0_i32_1 = arith.constant 0 : i32
    return %c0_i32, %c0_i32_0 : i32, i32
  }
  func.func @transform_4(%arg0: i32, %arg1: memref<16xi32, #tpu.memory_space<smem>>) -> (i32, i32) {
    %c0_i32 = arith.constant 0 : i32
    %c0_i32_0 = arith.constant 0 : i32
    %c0_i32_1 = arith.constant 0 : i32
    return %c0_i32, %c0_i32_0 : i32, i32
  }
  func.func @transform_5(%arg0: i32, %arg1: memref<16xi32, #tpu.memory_space<smem>>) -> (i32, i32) {
    %c0_i32 = arith.constant 0 : i32
    %c0_i32_0 = arith.constant 0 : i32
    %c0_i32_1 = arith.constant 0 : i32
    return %c0_i32, %c0_i32_0 : i32, i32
  }
  func.func @transform_6(%arg0: i32, %arg1: memref<16xi32, #tpu.memory_space<smem>>) -> (i32, i32) {
    %c0_i32 = arith.constant 0 : i32
    %c0_i32_0 = arith.constant 0 : i32
    %c0_i32_1 = arith.constant 0 : i32
    return %c0_i32, %c0_i32_0 : i32, i32
  }
  func.func @transform_7(%arg0: i32, %arg1: memref<16xi32, #tpu.memory_space<smem>>) -> (i32, i32, i32) {
    %c0_i32 = arith.constant 0 : i32
    %c0_i32_0 = arith.constant 0 : i32
    %c0_i32_1 = arith.constant 0 : i32
    return %arg0, %c0_i32, %c0_i32_0 : i32, i32, i32
  }
}

</mosaic_0001>

<bundles_post_ra>
// kernel: tpu_custom_call.1
= control target key start
LH: loop header
LB: loop body
LE: loop exit
PB: predicated region body
PF: predicated region fallthrough
CT: control target
= control target key end

     0   :  { %s3919_s30 = smov [#allocation6]   ;;  %s5549_s0 = inlined_call_operand.hbm [shape: s32[16], index: 0, kind: input, shape index: {}]   ;;  %s5550_s1 = inlined_call_operand.hbm [shape: f32[16,128,256], index: 1, kind: input, shape index: {}]   ;;  %s5551_s2 = inlined_call_operand.hbm [shape: f32[16,8,128], index: 2, kind: input, shape index: {}]   ;;  %s5552_s3 = inlined_call_operand.hbm [shape: f32[256,128], index: 3, kind: input, shape index: {}]   ;;  %s5553_s4 = inlined_call_operand.hbm [shape: f32[1,128], index: 4, kind: input, shape index: {}]   ;;  %s5554_s5 = inlined_call_operand.hbm [shape: f32[128,128], index: 5, kind: input, shape index: {}]   ;;  %s5555_s6 = inlined_call_operand.hbm [shape: f32[1,128], index: 6, kind: input, shape index: {}]   ;;  %s5556_s7 = inlined_call_operand.hbm [shape: f32[1,128], index: 7, kind: input, shape index: {}]   ;;  %s5557_s8 = inlined_call_operand.hbm [shape: f32[16,8,256], index: 8, kind: output, shape index: {}]  }
   0x1   :  { %5560 = sst [smem:[#allocation28_spill]] %s5550_s1  ;;  %s14_s29 = sshll.u32 %s5549_s0, 4  ;;  %s15_s29 = int_to_ptr.hbm [resolvable:$true] %s14_s29 }
   0x2   :  { %5561 = sst [smem:[#allocation29_spill]] %s5552_s3 }
   0x3   :  { %5562 = sst [smem:[#allocation30_spill]] %s5553_s4 }
   0x4   :  { %5563 = sst [smem:[#allocation31_spill]] %s5554_s5 }
   0x5   :  { %5564 = sst [smem:[#allocation32_spill]] %s5555_s6 }
   0x6   :  { %5565 = sst [smem:[#allocation33_spill]] %s5556_s7 }
   0x7   :  { %17 = dma.hbm_to_smem %s15_s29, 16, %s3919_s30, [#allocation5] }
   0x8   :  { %3873 = dma.done.wait [#allocation5], 16 }
   0x9   :  { %3874 = vsyncadd [#allocation5], 4294967280 }
   0xa   :  { %20 = sfence }
   0xb   :  { %21 = vsyncpa [#allocation8], 0 }
   0xc   :  { %23 = vsyncpa [#allocation8 + $0x1], 0 }
   0xd   :  { %24 = vsyncpa [#allocation11], 0 }
   0xe   :  { %26 = vsyncpa [#allocation11 + $0x1], 0 }
   0xf   :  { %27 = vsyncpa [#allocation14], 0 }
  0x10   :  { %28 = vsyncpa [#allocation17], 0 }
  0x11   :  { %29 = vsyncpa [#allocation9], 0 }
  0x12   :  { %31 = vsyncpa [#allocation9 + $0x1], 0  ;;  %s3979_s9 = smov 0   ;;  %s3981_s10 = smov 0  }
  0x13   :  { %s3983_s11 = smov 0   ;;  %s3985_s0 = smov 0  }
  0x14 LB: > { %s5566_s3 = sld [smem:[#allocation29_spill]]  ;;  %s4003_s15 = sadd.s32 4294967295, %s3913_s0   ;;  %s3913_s0 = sphi %s3985_s0, %s5589_s0   ;;  %s3909_s11 = sphi %s3983_s11, %s5588_s11   ;;  %s3905_s10 = sphi %s3981_s10, %s5587_s10   ;;  %s3901_s9 = sphi %s3979_s9, %s5586_s9  }
  0x15   : > { %p3120_p0 = scmp.ge.s32.totalorder %s3913_s0, 1  ;;  %p58_p1 = scmp.eq.s32.totalorder %s4003_s15, 0 }
  0x16   : > { %p225_p2 = scmp.lt.s32.totalorder %s3913_s0, 3  ;;  %s3920_s17 = smov [#allocation12]  }
  0x17   : > { %s238_s18 = sshll.u32 %s3920_s17, 4  ;;  %s5568_s4 = sld [smem:[#allocation30_spill]]  ;;  %s239_s18 = int_to_ptr.vmem [resolvable:$true] %s238_s18 }
  0x18   : > { %p4008_p3 = pnand %p3120_p0, %p225_p2  ;;  %s5570_s6 = sld [smem:[#allocation32_spill]] }
  0x19   : > { %s3921_s26 = smov [#allocation13]   ;;  %s5558_s28 = smov 128  }
  0x1a   : > { %s236_s14 = sshll.u32 %s5566_s3, 4  ;;  %p3237_p4 = pneg %p4008_p3  ;;  %s237_s14 = int_to_ptr.hbm [resolvable:$true] %s236_s14 }
  0x1b   : > { %s253_s27 = sshll.u32 %s3921_s26, 4  ;;  %s5559_s29 = smov 8   ;;  %s254_s27 = int_to_ptr.vmem [resolvable:$true] %s253_s27 }
  0x1c   : > { %p4020_p6 = pnand %p3237_p4, %p58_p1  ;;  %s5571_s5 = sld [smem:[#allocation31_spill]] }
  0x1d   : > { %s251_s21 = sshll.u32 %s5568_s4, 4  ;;  %s3924_s17 = smov [#allocation16]   ;;  %s252_s21 = int_to_ptr.hbm [resolvable:$true] %s251_s21 }
  0x1e   : > { %s277_s25 = sshll.u32 %s5570_s6, 4  ;;  %s279_s19 = sshll.u32 %s3924_s17, 4  ;;  %s278_s25 = int_to_ptr.hbm [resolvable:$true] %s277_s25  ;;  %s280_s19 = int_to_ptr.vmem [resolvable:$true] %s279_s19 }
  0x1f   : > { %3240 = dma.hbm_to_vmem [thread:$0]  (!%p4020_p6), %s237_s14, 4096, %s239_s18, [#allocation11], %s5558_s28, %s5558_s28, %s5559_s29  }
  0x20   : > { %3243 = dma.hbm_to_vmem [thread:$0]  (!%p4020_p6), %s252_s21, 16, %s254_s27, [#allocation14]  }
  0x21   : > { %3249 = dma.hbm_to_vmem [thread:$0]  (!%p4020_p6), %s278_s25, 16, %s280_s19, [#allocation17]  }
  0x22   : > { %s262_s13 = sshll.u32 %s5571_s5, 4  ;;  %s3925_s14 = smov [#allocation15]   ;;  %s263_s13 = int_to_ptr.hbm [resolvable:$true] %s262_s13 }
  0x23   : > { %s264_s18 = sshll.u32 %s3925_s14, 4  ;;  %s5572_s7 = sld [smem:[#allocation33_spill]]  ;;  %s265_s18 = int_to_ptr.vmem [resolvable:$true] %s264_s18 }
  0x24   : > { %3246 = dma.hbm_to_vmem [thread:$0]  (!%p4020_p6), %s263_s13, 2048, %s265_s18, [#allocation14], %s5558_s28, %s5558_s28, %s5559_s29  }
  0x25   : > { %s3926_s24 = smov [#allocation18]   ;;  %s3119_s26 = sadd.s32 4294967294, %s3913_s0  }
  0x26   : > { %s291_s25 = sshll.u32 %s3926_s24, 4  ;;  %s4051_s27 = sadd.s32 1, %s3913_s0   ;;  %s292_s25 = int_to_ptr.vmem [resolvable:$true] %s291_s25 }
  0x27   : > { %s44_s30 = sadd.s32 1, %s3909_s11  ;;  %s41_s12 = ssub.s32 %s3913_s0, %s4051_s27 }
  0x28   : > { %p51_p7 = scmp.ne.s32.totalorder %s3909_s11, %s3905_s10  ;;  %p42_p8 = scmp.eq.s32.totalorder %s41_s12, 0 }
  0x29   : > { %s289_s23 = sshll.u32 %s5572_s7, 4  ;;  %p52_p9 = scmp.eq.s32.totalorder %s3913_s0, 0  ;;  %s290_s23 = int_to_ptr.hbm [resolvable:$true] %s289_s23 }
  0x2a   : > { %3252 = dma.hbm_to_vmem [thread:$0]  (!%p4020_p6), %s290_s23, 16, %s292_s25, [#allocation17]  }
  0x2b   : > { %p57_p10 = scmp.ne.s32.totalorder %s3905_s10, %s3901_s9  ;;  %p212_p11 = scmp.eq.s32.totalorder %s4003_s15, 1 }
  0x2c   : > { %s4063_s13 = scalar_select %p42_p8, %s3909_s11, %s44_s30  }
  0x2d   : > { %p4065_p12 = por %p52_p9, %p51_p7  ;;  %p4071_p13 = por %p58_p1, %p57_p10 }
  0x2e   : > { %5573 = sst [smem:[#allocation27_spill]] %s4063_s13  ;;  %p4075_p0 = por %p212_p11, %p51_p7 }
  0x2f   : > { %p218_p2 = scmp.eq.s32.totalorder %s3119_s26, 1  ;;  %p3269_p4 = scmp.lt.s32.totalorder %s3913_s0, 2 }
  0x30   : > { %s4081_s14 = sand.u32 1, %s3909_s11   ;;  %s3157_s21 = sshll.u32 %s3913_s0, 11 }
  0x31   : > { %p4083_p6 = por %p218_p2, %p57_p10  ;;  %s3127_s20 = sshll.u32 %s4081_s14, 11 }
  0x32   : > { %s5578_s1 = sld [smem:[#allocation28_spill]]  ;;  %s306_s12 = scalar_lea.vmem [#allocation7], %s3127_s20 }
  0x33   : > { %s315_s28 = sshll.u32 %s306_s12, 4  ;;  %p4094_p7 = pnand %p3269_p4, %p4065_p12  ;;  %s316_s28 = int_to_ptr.vmem [resolvable:$true] %s315_s28 }
  0x34   : > { %s325_s29 = sand.u32 1, %s3913_s0   ;;  %s303_s3 = scalar_lea.sflag [#allocation8], %s4081_s14 }
  0x35   : > { %p3769_p9 = pneg %p4094_p7 }
  0x38   : > { %s312_s25 = scalar_lea.hbm %s5578_s1, %s3157_s21  ;;  %s3772_s21 = scalar_lea.hbm %s5578_s1, 4096 }
  0x39   : > { %s313_s30 = sshll.u32 %s312_s25, 4  ;;  %s314_s30 = int_to_ptr.hbm [resolvable:$true] %s313_s30 }
  0x3a   : > { %s3765_s4 = sshra.s32 %s314_s30, 4  ;;  %s3766_s4 = int_to_ptr.hbm [resolvable:$true] %s3765_s4 }
  0x3b   : > { %s3767_s5 = scalar_lea.hbm %s3766_s4, 2048  ;;  %p3773_p12 = scmp.lt.s32.totalorder %s3766_s4, %s5578_s1 }
  0x3c   : > { %p3768_p8 = scmp.ne.s32.totalorder %s3766_s4, %s3767_s5  ;;  %p3774_p2 = scmp.lt.s32.totalorder %s3772_s21, %s3767_s5 }
  0x3e   : > { %p3770_p10 = pnand %p3769_p9, %p3768_p8  ;;  %p3775_p4 = por %p3774_p2, %p3773_p12 }
  0x40   : > { %p3771_p11 = pneg %p3770_p10 }
  0x42   : > { %p3776_p5 = pnand %p3775_p4, %p3771_p11 }
  0x44   : > { %3779 = shalt.err (!%p3776_p5)
}
  0x45   : > { %s3927_s25 = smov 256   ;;  %s3928_s12 = smov 16  }
  0x46   : > { %3256 = dma.hbm_to_vmem [thread:$0]  (!%p4094_p7), %s314_s30, 32768, %s316_s28, %s303_s3, %s3927_s25, %s3927_s25, %s3928_s12  }
  0x47   : > { %s3131_s6 = sshll.u32 %s4081_s14, 6  ;;  %s3158_s7 = sshll.u32 %s3913_s0, 6 }
  0x48   : > { %s334_s13 = scalar_lea.hbm %s5551_s2, %s3158_s7  ;;  %s329_s4 = scalar_lea.vmem [#allocation10], %s3131_s6 }
  0x49   : > { %s335_s23 = sshll.u32 %s334_s13, 4  ;;  %s337_s5 = sshll.u32 %s329_s4, 4  ;;  %s336_s23 = int_to_ptr.hbm [resolvable:$true] %s335_s23  ;;  %s338_s5 = int_to_ptr.vmem [resolvable:$true] %s337_s5 }
  0x4a   : > { %s326_s21 = scalar_lea.sflag [#allocation11], %s325_s29  ;;  %s3795_s24 = sshra.s32 %s336_s23, 4  ;;  %s3796_s24 = int_to_ptr.hbm [resolvable:$true] %s3795_s24 }
  0x4b   : > { %s3797_s1 = scalar_lea.hbm %s3796_s24, 64  ;;  %s3802_s14 = scalar_lea.hbm %s5551_s2, 128 }
  0x4c   : > { %p3798_p5 = scmp.ne.s32.totalorder %s3796_s24, %s3797_s1  ;;  %p3803_p11 = scmp.lt.s32.totalorder %s3796_s24, %s5551_s2 }
  0x4d   : > { %p3804_p12 = scmp.lt.s32.totalorder %s3802_s14, %s3797_s1 }
  0x4e   : > { %p3800_p8 = pnand %p3798_p5, %p3769_p9 }
  0x4f   : > { %p3805_p2 = por %p3804_p12, %p3803_p11 }
  0x50   : > { %p3801_p10 = pneg %p3800_p8 }
  0x52   : > { %p3806_p4 = pnand %p3805_p2, %p3801_p10 }
  0x54   : > { %3809 = shalt.err (!%p3806_p4)
}
  0x55   : > { %s5580_s6 = smov 8   ;;  %s5581_s29 = smov 128  }
  0x56   : > { %3259 = dma.hbm_to_vmem [thread:$0]  (!%p4094_p7), %s336_s23, 1024, %s338_s5, %s326_s21, %s5581_s29, %s5581_s29, %s5580_s6  }
  0x57   : > { %349 = sbr.rel (%p4008_p3) target bundleno = 1654 (0x676), region = 48  ;;  %s4135_s13 = sand.u32 (!%p4008_p3), 1, %s3905_s10  }
  0x58   : > { %s3135_s25 = sshll.u32 (!%p4008_p3), %s4135_s13, 11  ;;  %s352_s1 = scalar_lea.sflag (!%p4008_p3), [#allocation8], %s4135_s13 }
  0x59   : > { %s4139_s12 = scalar_lea.vmem (!%p4008_p3), [#allocation7], %s3135_s25 }
  0x5c   : > { %3876 = dma.done.wait (%p4071_p13), %s352_s1, 32768  }
  0x5d   : > { %3878 = vsyncadd (%p4071_p13), %s352_s1, 4294934528  ;;  %s361_s16 = sand.u32 1, %s4003_s15   ;;  %s3136_s26 = sshll.u32 %s4135_s13, 6 }
  0x5e   : > { %s362_s20 = scalar_lea.sflag [#allocation11], %s361_s16  ;;  %s4147_s17 = scalar_lea.vmem [#allocation10], %s3136_s26 }
  0x5f   : > { %3880 = dma.done.wait (%p4071_p13), %s362_s20, 1024  }
  0x60   : > { %3882 = vsyncadd (%p4071_p13), %s362_s20, 4294966272 }
  0x61   : > { %3884 = dma.done.wait (%p58_p1), [#allocation11], 4096  }
  0x62   : > { %3886 = vsyncadd (%p58_p1), [#allocation11], 4294963200 }
  0x63   : > { %3888 = dma.done.wait (%p58_p1), [#allocation14], 2064  }
  0x64   : > { %3890 = vsyncadd (%p58_p1), [#allocation14], 4294965232 }
  0x65   : > { %3892 = dma.done.wait (%p58_p1), [#allocation17], 32  }
  0x66   : > { %3894 = vsyncadd (%p58_p1), [#allocation17], 4294967264  ;;  %s3142_s22 = sshll.u32 %s4135_s13, 7  ;;  %v4166_v0 = vld [vmem:[#allocation18] sm:$0x1]  ;;  %v701_v1 = vld [vmem:[#allocation12 + $0x78] sm:$0xff] }
  0x67   : > { %v4168_v2 = vld [vmem:[#allocation12 + $0xf8] sm:$0xff]  ;;  %3163 = vmatpush.msra.mxu3 %v701_v1  ;;  %v700_v3 = vld [vmem:[#allocation12 + $0x70] sm:$0xff]  ;;  %722 = vmatpush.msra.mxu0 %v701_v1  ;;  %v699_v5 = vld [vmem:[#allocation12 + $0x68] sm:$0xff]  ;;  %s4649_s23 = scalar_lea.vmem [#allocation19], %s3142_s22  ;;  %s4651_s4 = smov 0  }
  0x68   : > { %3179 = vmatpush.msra.mxu2 %v4168_v2  ;;  %v4171_v4 = vld [vmem:[#allocation12 + $0xf0] sm:$0xff]  ;;  %v4173_v6 = vld [vmem:[#allocation12 + $0xe8] sm:$0xff]  ;;  %1123 = vmatpush.msra.mxu1 %v4168_v2  ;;  %v698_v7 = vld [vmem:[#allocation12 + $0x60] sm:$0xff] }
  0x69   : > { %3164 = vmatpush.msra.mxu3 %v700_v3  ;;  %723 = vmatpush.msra.mxu0 %v700_v3  ;;  %v4177_v8 = vld [vmem:[#allocation12 + $0xe0] sm:$0xff]  ;;  %v697_v9 = vld [vmem:[#allocation12 + $0x58] sm:$0xff]  ;;  %v696_v11 = vld [vmem:[#allocation12 + $0x50] sm:$0xff] }
  0x6a   : > { %3181 = vmatpush.msra.mxu2 %v4171_v4  ;;  %1124 = vmatpush.msra.mxu1 %v4171_v4  ;;  %v4181_v10 = vld [vmem:[#allocation12 + $0xd8] sm:$0xff]  ;;  %v4185_v12 = vld [vmem:[#allocation12 + $0xd0] sm:$0xff]  ;;  %v695_v13 = vld [vmem:[#allocation12 + $0x48] sm:$0xff] }
  0x6b   : > { %3165 = vmatpush.msra.mxu3 %v699_v5  ;;  %724 = vmatpush.msra.mxu0 %v699_v5  ;;  %v4189_v14 = vld [vmem:[#allocation12 + $0xc8] sm:$0xff]  ;;  %v694_v15 = vld [vmem:[#allocation12 + $0x40] sm:$0xff]  ;;  %v693_v17 = vld [vmem:[#allocation12 + $0x38] sm:$0xff] }
  0x6c   : > { %3183 = vmatpush.msra.mxu2 %v4173_v6  ;;  %1125 = vmatpush.msra.mxu1 %v4173_v6  ;;  %v4193_v16 = vld [vmem:[#allocation12 + $0xc0] sm:$0xff]  ;;  %v4197_v18 = vld [vmem:[#allocation12 + $0xb8] sm:$0xff]  ;;  %v692_v19 = vld [vmem:[#allocation12 + $0x30] sm:$0xff] }
  0x6d   : > { %3166 = vmatpush.msra.mxu3 %v698_v7  ;;  %725 = vmatpush.msra.mxu0 %v698_v7  ;;  %v4201_v20 = vld [vmem:[#allocation12 + $0xb0] sm:$0xff]  ;;  %v691_v21 = vld [vmem:[#allocation12 + $0x28] sm:$0xff]  ;;  %v690_v23 = vld [vmem:[#allocation12 + $0x20] sm:$0xff] }
  0x6e   : > { %3185 = vmatpush.msra.mxu2 %v4177_v8  ;;  %1126 = vmatpush.msra.mxu1 %v4177_v8  ;;  %v4205_v22 = vld [vmem:[#allocation12 + $0xa8] sm:$0xff]  ;;  %v4209_v24 = vld [vmem:[#allocation12 + $0xa0] sm:$0xff]  ;;  %v689_v25 = vld [vmem:[#allocation12 + $0x18] sm:$0xff] }
  0x6f   : > { %3167 = vmatpush.msra.mxu3 %v697_v9  ;;  %726 = vmatpush.msra.mxu0 %v697_v9  ;;  %v4213_v26 = vld [vmem:[#allocation12 + $0x98] sm:$0xff]  ;;  %v688_v27 = vld [vmem:[#allocation12 + $0x10] sm:$0xff]  ;;  %v687_v29 = vld [vmem:[#allocation12 + $0x8] sm:$0xff] }
  0x70   : > { %3187 = vmatpush.msra.mxu2 %v4181_v10  ;;  %1127 = vmatpush.msra.mxu1 %v4181_v10  ;;  %v4217_v28 = vld [vmem:[#allocation12 + $0x90] sm:$0xff]  ;;  %v4221_v30 = vld [vmem:[#allocation12 + $0x88] sm:$0xff]  ;;  %v686_v31 = vld [vmem:[#allocation12] sm:$0xff] }
  0x71   : > { %3168 = vmatpush.msra.mxu3 %v696_v11  ;;  %727 = vmatpush.msra.mxu0 %v696_v11  ;;  %v4225_v32 = vld [vmem:[#allocation12 + $0x80] sm:$0xff]  ;;  %v563_v34 = vld [vmem:[%s4139_s12 + $0x428] sm:$0xff]  ;;  %v1674_v38 = vld [vmem:[#allocation15 + $0x70] sm:$0xff] }
  0x72   : > { %3189 = vmatpush.msra.mxu2 %v4185_v12  ;;  %1128 = vmatpush.msra.mxu1 %v4185_v12  ;;  %v562_v33 = vld [vmem:[%s4139_s12 + $0x420] sm:$0xff]  ;;  %v431_v37 = vld [vmem:[%s4139_s12 + $0x8] sm:$0xff]  ;;  %v564_v39 = vld [vmem:[%s4139_s12 + $0x430] sm:$0xff] }
  0x73   : > { %3169 = vmatpush.msra.mxu3 %v695_v13  ;;  %728 = vmatpush.msra.mxu0 %v695_v13  ;;  %v1675_v35 = vld [vmem:[#allocation15 + $0x78] sm:$0xff]  ;;  %v432_v41 = vld [vmem:[%s4139_s12 + $0x10] sm:$0xff]  ;;  %v567_v44 = vld [vmem:[%s4139_s12 + $0x448] sm:$0xff] }
  0x74   : > { %3191 = vmatpush.msra.mxu2 %v4189_v14  ;;  %1129 = vmatpush.msra.mxu1 %v4189_v14  ;;  %v430_v36 = vld [vmem:[%s4139_s12] sm:$0xff]  ;;  %v565_v40 = vld [vmem:[%s4139_s12 + $0x438] sm:$0xff]  ;;  %v435_v46 = vld [vmem:[%s4139_s12 + $0x28] sm:$0xff] }
  0x75   : > { %3170 = vmatpush.msra.mxu3 %v694_v15  ;;  %729 = vmatpush.msra.mxu0 %v694_v15  ;;  %v433_v42 = vld [vmem:[%s4139_s12 + $0x18] sm:$0xff]  ;;  %v566_v43 = vld [vmem:[%s4139_s12 + $0x440] sm:$0xff]  ;;  %v568_v47 = vld [vmem:[%s4139_s12 + $0x450] sm:$0xff] }
  0x76   : > { %3193 = vmatpush.msra.mxu2 %v4193_v16  ;;  %1130 = vmatpush.msra.mxu1 %v4193_v16  ;;  %v434_v45 = vld [vmem:[%s4139_s12 + $0x20] sm:$0xff]  ;;  %v569_v48 = vld [vmem:[%s4139_s12 + $0x458] sm:$0xff]  ;;  %v436_v49 = vld [vmem:[%s4139_s12 + $0x30] sm:$0xff] }
  0x77   : > { %3171 = vmatpush.msra.mxu3 %v693_v17  ;;  %730 = vmatpush.msra.mxu0 %v693_v17  ;;  %v437_v50 = vld [vmem:[%s4139_s12 + $0x38] sm:$0xff]  ;;  %v1673_v51 = vld [vmem:[#allocation15 + $0x68] sm:$0xff]  ;;  %v570_v52 = vld [vmem:[%s4139_s12 + $0x460] sm:$0xff] }
  0x78   : > { %3195 = vmatpush.msra.mxu2 %v4197_v18  ;;  %1131 = vmatpush.msra.mxu1 %v4197_v18  ;;  %v571_v53 = vld [vmem:[%s4139_s12 + $0x468] sm:$0xff]  ;;  %v438_v54 = vld [vmem:[%s4139_s12 + $0x40] sm:$0xff]  ;;  %v572_v56 = vld [vmem:[%s4139_s12 + $0x470] sm:$0xff] }
  0x79   : > { %3172 = vmatpush.msra.mxu3 %v692_v19  ;;  %731 = vmatpush.msra.mxu0 %v692_v19  ;;  %v439_v55 = vld [vmem:[%s4139_s12 + $0x48] sm:$0xff]  ;;  %v573_v57 = vld [vmem:[%s4139_s12 + $0x478] sm:$0xff]  ;;  %v440_v58 = vld [vmem:[%s4139_s12 + $0x50] sm:$0xff] }
  0x7a   : > { %3197 = vmatpush.msra.mxu2 %v4201_v20  ;;  %1132 = vmatpush.msra.mxu1 %v4201_v20  ;;  %v441_v59 = vld [vmem:[%s4139_s12 + $0x58] sm:$0xff]  ;;  %v574_v60 = vld [vmem:[%s4139_s12 + $0x480] sm:$0xff]  ;;  %v575_v61 = vld [vmem:[%s4139_s12 + $0x488] sm:$0xff] }
  0x7b   : > { %3173 = vmatpush.msra.mxu3 %v691_v21  ;;  %732 = vmatpush.msra.mxu0 %v691_v21  ;;  %v442_v62 = vld [vmem:[%s4139_s12 + $0x60] sm:$0xff]  ;;  %v443_v63 = vld [vmem:[%s4139_s12 + $0x68] sm:$0xff]  ;;  %v577_v3 = vld [vmem:[%s4139_s12 + $0x498] sm:$0xff] }
  0x7c   : > { %3199 = vmatpush.msra.mxu2 %v4205_v22  ;;  %1133 = vmatpush.msra.mxu1 %v4205_v22  ;;  %v1672_v1 = vld [vmem:[#allocation15 + $0x60] sm:$0xff]  ;;  %v445_v5 = vld [vmem:[%s4139_s12 + $0x78] sm:$0xff]  ;;  %v584_v19 = vld [vmem:[%s4139_s12 + $0x4d0] sm:$0xff] }
  0x7d   : > { %3174 = vmatpush.msra.mxu3 %v690_v23  ;;  %733 = vmatpush.msra.mxu0 %v690_v23  ;;  %v579_v7 = vld [vmem:[%s4139_s12 + $0x4a8] sm:$0xff]  ;;  %v581_v11 = vld [vmem:[%s4139_s12 + $0x4b8] sm:$0xff]  ;;  %v452_v21 = vld [vmem:[%s4139_s12 + $0xb0] sm:$0xff] }
  0x7e   : > { %3201 = vmatpush.msra.mxu2 %v4209_v24  ;;  %1134 = vmatpush.msra.mxu1 %v4209_v24  ;;  %v447_v9 = vld [vmem:[%s4139_s12 + $0x88] sm:$0xff]  ;;  %v449_v13 = vld [vmem:[%s4139_s12 + $0x98] sm:$0xff]  ;;  %v586_v23 = vld [vmem:[%s4139_s12 + $0x4e0] sm:$0xff] }
  0x7f   : > { %3175 = vmatpush.msra.mxu3 %v689_v25  ;;  %734 = vmatpush.msra.mxu0 %v689_v25  ;;  %v583_v15 = vld [vmem:[%s4139_s12 + $0x4c8] sm:$0xff]  ;;  %v454_v25 = vld [vmem:[%s4139_s12 + $0xc0] sm:$0xff] }
  0x80   : > { %3203 = vmatpush.msra.mxu2 %v4213_v26  ;;  %1135 = vmatpush.msra.mxu1 %v4213_v26  ;;  %v451_v17 = vld [vmem:[%s4139_s12 + $0xa8] sm:$0xff] }
  0x81   : > { %3176 = vmatpush.msra.mxu3 %v688_v27  ;;  %735 = vmatpush.msra.mxu0 %v688_v27  ;;  %v588_v27 = vld [vmem:[%s4139_s12 + $0x4f0] sm:$0xff] }
  0x82   : > { %3205 = vmatpush.msra.mxu2 %v4217_v28  ;;  %1136 = vmatpush.msra.mxu1 %v4217_v28 }
  0x83   : > { %3177 = vmatpush.msra.mxu3 %v687_v29  ;;  %736 = vmatpush.msra.mxu0 %v687_v29  ;;  %v456_v29 = vld [vmem:[%s4139_s12 + $0xd0] sm:$0xff] }
  0x84   : > { %3207 = vmatpush.msra.mxu2 %v4221_v30  ;;  %1137 = vmatpush.msra.mxu1 %v4221_v30 }
  0x85   : > { %3178 = vmatpush.msra.mxu3 %v686_v31  ;;  %737 = vmatpush.msra.mxu0 %v686_v31  ;;  %v590_v31 = vld [vmem:[%s4139_s12 + $0x500] sm:$0xff] }
  0x86   : > { %3209 = vmatpush.msra.mxu2 %v4225_v32  ;;  %936 = vmatmul.f32.vlgmr.msra.gmra.mxu3 %v562_v33  ;;  %v458_v33 = vld [vmem:[%s4139_s12 + $0xe0] sm:$0xff] }
  0x87   : > { %1337 = vmatmul.f32.vlgmr.msra.gmra.mxu2 %v563_v34  ;;  %3180 = vmatpush.msrb.mxu3 %v4168_v2  ;;  %v576_v2 = vld [vmem:[%s4139_s12 + $0x490] sm:$0xff]  ;;  %v459_v34 = vld [vmem:[%s4139_s12 + $0xe8] sm:$0xff] }
  0x88   : > { %1680 = vmatpush.msrb.mxu2 %v1675_v35  ;;  %1138 = vmatpush.msra.mxu1 %v4225_v32  ;;  %v1670_v35 = vld [vmem:[#allocation15 + $0x50] sm:$0xff] }
  0x89   : > { %738 = vmatmul.f32.vlgmr.msra.gmra.mxu0 %v430_v36  ;;  %1139 = vmatmul.f32.vlgmr.msra.gmra.mxu1 %v431_v37  ;;  %v592_v36 = vld [vmem:[%s4139_s12 + $0x510] sm:$0xff]  ;;  %v593_v37 = vld [vmem:[%s4139_s12 + $0x518] sm:$0xff] }
  0x8a   : > { %1681 = vmatpush.msrb.mxu2 %v1674_v38  ;;  %3182 = vmatpush.msrb.mxu3 %v4171_v4  ;;  %v444_v4 = vld [vmem:[%s4139_s12 + $0x70] sm:$0xff] }
  0x8b   : > { %v460_v38 = vld [vmem:[%s4139_s12 + $0xf0] sm:$0xff] }
  0x8c   : > { %3184 = vmatpush.msrb.mxu3 %v4173_v6  ;;  %1682 = vmatpush.msrb.mxu2 %v1673_v51  ;;  %v578_v6 = vld [vmem:[%s4139_s12 + $0x4a0] sm:$0xff] }
  0x8e   : > { %939 = vmatmul.f32.gmra.mxu3 %v564_v39  ;;  %1683 = vmatpush.msrb.mxu2 %v1672_v1  ;;  %v461_v39 = vld [vmem:[%s4139_s12 + $0xf8] sm:$0xff]  ;;  %v598_v1 = vld [vmem:[%s4139_s12 + $0x540] sm:$0xff] }
  0x8f   : > { %1340 = vmatmul.f32.gmra.mxu2 %v565_v40  ;;  %3186 = vmatpush.msrb.mxu3 %v4177_v8  ;;  %v446_v8 = vld [vmem:[%s4139_s12 + $0x80] sm:$0xff] }
  0x90   : > { %v594_v40 = vld [vmem:[%s4139_s12 + $0x520] sm:$0xff] }
  0x91   : > { %741 = vmatmul.f32.gmra.mxu0 %v432_v41  ;;  %1142 = vmatmul.f32.gmra.mxu1 %v433_v42  ;;  %v595_v41 = vld [vmem:[%s4139_s12 + $0x528] sm:$0xff]  ;;  %v4314_v42 = vld [vmem:[#allocation13] ss:$0 sm:$0xff] }
  0x92   : > { %3188 = vmatpush.msrb.mxu3 %v4181_v10  ;;  %v580_v10 = vld [vmem:[%s4139_s12 + $0x4b0] sm:$0xff] }
  0x94   : > { %3190 = vmatpush.msrb.mxu3 %v4185_v12  ;;  %v448_v12 = vld [vmem:[%s4139_s12 + $0x90] sm:$0xff] }
  0x96   : > { %942 = vmatmul.f32.gmra.mxu3 %v566_v43 }
  0x97   : > { %1343 = vmatmul.f32.gmra.mxu2 %v567_v44  ;;  %3192 = vmatpush.msrb.mxu3 %v4189_v14  ;;  %v582_v14 = vld [vmem:[%s4139_s12 + $0x4c0] sm:$0xff] }
  0x99   : > { %744 = vmatmul.f32.gmra.mxu0 %v434_v45  ;;  %1145 = vmatmul.f32.gmra.mxu1 %v435_v46  ;;  %v462_v45 = vld [vmem:[%s4139_s12 + $0x100] sm:$0xff]  ;;  %v463_v46 = vld [vmem:[%s4139_s12 + $0x108] sm:$0xff] }
  0x9a   : > { %3194 = vmatpush.msrb.mxu3 %v4193_v16  ;;  %v450_v16 = vld [vmem:[%s4139_s12 + $0xa0] sm:$0xff] }
  0x9c   : > { %3196 = vmatpush.msrb.mxu3 %v4197_v18  ;;  %v1671_v18 = vld [vmem:[#allocation15 + $0x58] sm:$0xff] }
  0x9d   : > { %1684 = vmatpush.msrb.mxu2 %v1671_v18 }
  0x9e   : > { %945 = vmatmul.f32.gmra.mxu3 %v568_v47 }
  0x9f   : > { %1346 = vmatmul.f32.gmra.mxu2 %v569_v48  ;;  %3198 = vmatpush.msrb.mxu3 %v4201_v20  ;;  %v585_v20 = vld [vmem:[%s4139_s12 + $0x4d8] sm:$0xff] }
  0xa0   : > { %1685 = vmatpush.msrb.mxu2 %v1670_v35 }
  0xa1   : > { %747 = vmatmul.f32.gmra.mxu0 %v436_v49  ;;  %1148 = vmatmul.f32.gmra.mxu1 %v437_v50 }
  0xa2   : > { %3200 = vmatpush.msrb.mxu3 %v4205_v22  ;;  %v453_v22 = vld [vmem:[%s4139_s12 + $0xb8] sm:$0xff] }
  0xa4   : > { %3202 = vmatpush.msrb.mxu3 %v4209_v24  ;;  %v587_v24 = vld [vmem:[%s4139_s12 + $0x4e8] sm:$0xff] }
  0xa6   : > { %948 = vmatmul.f32.gmra.mxu3 %v570_v52  ;;  %v596_v52 = vld [vmem:[%s4139_s12 + $0x530] sm:$0xff] }
  0xa7   : > { %1349 = vmatmul.f32.gmra.mxu2 %v571_v53  ;;  %3204 = vmatpush.msrb.mxu3 %v4213_v26  ;;  %v455_v26 = vld [vmem:[%s4139_s12 + $0xc8] sm:$0xff]  ;;  %v597_v53 = vld [vmem:[%s4139_s12 + $0x538] sm:$0xff] }
  0xa9   : > { %750 = vmatmul.f32.gmra.mxu0 %v438_v54  ;;  %1151 = vmatmul.f32.gmra.mxu1 %v439_v55 }
  0xaa   : > { %3206 = vmatpush.msrb.mxu3 %v4217_v28  ;;  %v589_v28 = vld [vmem:[%s4139_s12 + $0x4f8] sm:$0xff] }
  0xac   : > { %3208 = vmatpush.msrb.mxu3 %v4221_v30  ;;  %v457_v30 = vld [vmem:[%s4139_s12 + $0xd8] sm:$0xff] }
  0xae   : > { %951 = vmatmul.f32.gmra.mxu3 %v572_v56 }
  0xaf   : > { %1352 = vmatmul.f32.gmra.mxu2 %v573_v57  ;;  %3210 = vmatpush.msrb.mxu3 %v4225_v32  ;;  %v591_v32 = vld [vmem:[%s4139_s12 + $0x508] sm:$0xff]  ;;  %v464_v57 = vld [vmem:[%s4139_s12 + $0x110] sm:$0xff] }
  0xb1   : > { %753 = vmatmul.f32.gmra.mxu0 %v440_v58  ;;  %1154 = vmatmul.f32.gmra.mxu1 %v441_v59  ;;  %v465_v58 = vld [vmem:[%s4139_s12 + $0x118] sm:$0xff] }
  0xb6   : > { %954 = vmatmul.f32.gmra.mxu3 %v574_v60 }
  0xb7   : > { %1355 = vmatmul.f32.gmra.mxu2 %v575_v61 }
  0xb9   : > { %756 = vmatmul.f32.gmra.mxu0 %v442_v62  ;;  %1157 = vmatmul.f32.gmra.mxu1 %v443_v63 }
  0xbe   : > { %957 = vmatmul.f32.gmra.mxu3 %v576_v2  ;;  %v599_v2 = vld [vmem:[%s4139_s12 + $0x548] sm:$0xff] }
  0xbf   : > { %1358 = vmatmul.f32.gmra.mxu2 %v577_v3 }
  0xc1   : > { %759 = vmatmul.f32.gmra.mxu0 %v444_v4  ;;  %1160 = vmatmul.f32.gmra.mxu1 %v445_v5 }
  0xc6   : > { %960 = vmatmul.f32.gmra.mxu3 %v578_v6  ;;  %v466_v6 = vld [vmem:[%s4139_s12 + $0x120] sm:$0xff] }
  0xc7   : > { %1361 = vmatmul.f32.gmra.mxu2 %v579_v7  ;;  %v467_v7 = vld [vmem:[%s4139_s12 + $0x128] sm:$0xff] }
  0xc9   : > { %762 = vmatmul.f32.gmra.mxu0 %v446_v8  ;;  %1163 = vmatmul.f32.gmra.mxu1 %v447_v9  ;;  %v1669_v8 = vld [vmem:[#allocation15 + $0x48] sm:$0xff] }
  0xca   : > { %1686 = vmatpush.msrb.mxu2 %v1669_v8 }
  0xce   : > { %963 = vmatmul.f32.gmra.mxu3 %v580_v10 }
  0xcf   : > { %1364 = vmatmul.f32.gmra.mxu2 %v581_v11 }
  0xd1   : > { %765 = vmatmul.f32.gmra.mxu0 %v448_v12  ;;  %1166 = vmatmul.f32.gmra.mxu1 %v449_v13 }
  0xd6   : > { %966 = vmatmul.f32.gmra.mxu3 %v582_v14  ;;  %v600_v14 = vld [vmem:[%s4139_s12 + $0x550] sm:$0xff] }
  0xd7   : > { %1367 = vmatmul.f32.gmra.mxu2 %v583_v15  ;;  %v601_v15 = vld [vmem:[%s4139_s12 + $0x558] sm:$0xff] }
  0xd9   : > { %768 = vmatmul.f32.gmra.mxu0 %v450_v16  ;;  %1169 = vmatmul.f32.gmra.mxu1 %v451_v17 }
  0xde   : > { %969 = vmatmul.f32.gmra.mxu3 %v584_v19  ;;  %v468_v19 = vld [vmem:[%s4139_s12 + $0x130] sm:$0xff] }
  0xdf   : > { %1370 = vmatmul.f32.gmra.mxu2 %v585_v20  ;;  %v469_v20 = vld [vmem:[%s4139_s12 + $0x138] sm:$0xff] }
  0xe1   : > { %771 = vmatmul.f32.gmra.mxu0 %v452_v21  ;;  %1172 = vmatmul.f32.gmra.mxu1 %v453_v22 }
  0xe6   : > { %972 = vmatmul.f32.gmra.mxu3 %v586_v23 }
  0xe7   : > { %1373 = vmatmul.f32.gmra.mxu2 %v587_v24 }
  0xe9   : > { %774 = vmatmul.f32.gmra.mxu0 %v454_v25  ;;  %1175 = vmatmul.f32.gmra.mxu1 %v455_v26  ;;  %v602_v26 = vld [vmem:[%s4139_s12 + $0x560] sm:$0xff] }
  0xee   : > { %975 = vmatmul.f32.gmra.mxu3 %v588_v27  ;;  %v603_v27 = vld [vmem:[%s4139_s12 + $0x568] sm:$0xff] }
  0xef   : > { %1376 = vmatmul.f32.gmra.mxu2 %v589_v28 }
  0xf1   : > { %777 = vmatmul.f32.gmra.mxu0 %v456_v29  ;;  %1178 = vmatmul.f32.gmra.mxu1 %v457_v30 }
  0xf6   : > { %978 = vmatmul.f32.gmra.mxu3 %v590_v31  ;;  %v470_v31 = vld [vmem:[%s4139_s12 + $0x140] sm:$0xff] }
  0xf7   : > { %1379 = vmatmul.f32.gmra.mxu2 %v591_v32  ;;  %v471_v32 = vld [vmem:[%s4139_s12 + $0x148] sm:$0xff] }
  0xf9   : > { %780 = vmatmul.f32.gmra.mxu0 %v458_v33  ;;  %1181 = vmatmul.f32.gmra.mxu1 %v459_v34 }
  0xfe   : > { %981 = vmatmul.f32.gmra.mxu3 %v592_v36 }
  0xff   : > { %1382 = vmatmul.f32.gmra.mxu2 %v593_v37 }
 0x101   : > { %783 = vmatmul.f32.gmra.mxu0 %v460_v38  ;;  %1184 = vmatmul.f32.gmra.mxu1 %v461_v39  ;;  %v604_v38 = vld [vmem:[%s4139_s12 + $0x570] sm:$0xff]  ;;  %v605_v39 = vld [vmem:[%s4139_s12 + $0x578] sm:$0xff] }
 0x106   : > { %984 = vmatmul.f32.gmra.mxu3 %v594_v40  ;;  %v739_v43 = vpop.f32.mrf.mxu0  ;;  %v1140_v44 = vpop.f32.mrf.mxu1 }
 0x107   : > { %1385 = vmatmul.f32.gmra.mxu2 %v595_v41  ;;  %v740_v47 = vadd.f32 %v4314_v42, %v739_v43 }
 0x109   : > { %v937_v48 = vpop.f32.mrf.mxu3  ;;  %v1141_v49 = vadd.f32 %v1140_v44, %v740_v47  ;;  %786 = vmatmul.f32.gmra.mxu0 %v462_v45  ;;  %1187 = vmatmul.f32.gmra.mxu1 %v463_v46  ;;  %v472_v44 = vld [vmem:[%s4139_s12 + $0x150] sm:$0xff]  ;;  %v473_v45 = vld [vmem:[%s4139_s12 + $0x158] sm:$0xff] }
 0x10a   : > { %v1338_v50 = vpop.f32.mrf.mxu2  ;;  %v938_v51 = vadd.f32 %v4314_v42, %v937_v48 }
 0x10b   : > { %1524 = vst [vmem:[#allocation2] sm:$0xff] %v1141_v49 }
 0x10c   : > { %v1339_v54 = vadd.f32 %v1338_v50, %v938_v51  ;;  %v606_v51 = vld [vmem:[%s4139_s12 + $0x580] sm:$0xff] }
 0x10e   : > { %1590 = vst [vmem:[#allocation2 + $0x210] sm:$0xff] %v1339_v54  ;;  %987 = vmatmul.f32.gmra.mxu3 %v596_v52  ;;  %v742_v55 = vpop.f32.mrf.mxu0  ;;  %v1143_v56 = vpop.f32.mrf.mxu1  ;;  %v607_v52 = vld [vmem:[%s4139_s12 + $0x588] sm:$0xff] }
 0x10f   : > { %1388 = vmatmul.f32.gmra.mxu2 %v597_v53  ;;  %v743_v59 = vadd.f32 %v4314_v42, %v742_v55 }
 0x111   : > { %v940_v60 = vpop.f32.mrf.mxu3  ;;  %v1144_v61 = vadd.f32 %v1143_v56, %v743_v59  ;;  %789 = vmatmul.f32.gmra.mxu0 %v464_v57  ;;  %1190 = vmatmul.f32.gmra.mxu1 %v465_v58  ;;  %v474_v56 = vld [vmem:[%s4139_s12 + $0x160] sm:$0xff]  ;;  %v475_v57 = vld [vmem:[%s4139_s12 + $0x168] sm:$0xff] }
 0x112   : > { %v1341_v62 = vpop.f32.mrf.mxu2  ;;  %v941_v63 = vadd.f32 %v4314_v42, %v940_v60  ;;  %v1668_v58 = vld [vmem:[#allocation15 + $0x40] sm:$0xff] }
 0x113   : > { %1525 = vst [vmem:[#allocation2 + $0x8] sm:$0xff] %v1144_v61  ;;  %1687 = vmatpush.msrb.mxu2 %v1668_v58 }
 0x114   : > { %v1342_v3 = vadd.f32 %v1341_v62, %v941_v63 }
 0x116   : > { %1591 = vst [vmem:[#allocation2 + $0x218] sm:$0xff] %v1342_v3  ;;  %990 = vmatmul.f32.gmra.mxu3 %v598_v1  ;;  %v745_v4 = vpop.f32.mrf.mxu0  ;;  %v1146_v5 = vpop.f32.mrf.mxu1  ;;  %v608_v1 = vld [vmem:[%s4139_s12 + $0x590] sm:$0xff] }
 0x117   : > { %1391 = vmatmul.f32.gmra.mxu2 %v599_v2  ;;  %v746_v9 = vadd.f32 %v4314_v42, %v745_v4  ;;  %v609_v2 = vld [vmem:[%s4139_s12 + $0x598] sm:$0xff] }
 0x119   : > { %v943_v10 = vpop.f32.mrf.mxu3  ;;  %v1147_v11 = vadd.f32 %v1146_v5, %v746_v9  ;;  %792 = vmatmul.f32.gmra.mxu0 %v466_v6  ;;  %1193 = vmatmul.f32.gmra.mxu1 %v467_v7  ;;  %v476_v6 = vld [vmem:[%s4139_s12 + $0x170] sm:$0xff]  ;;  %v477_v7 = vld [vmem:[%s4139_s12 + $0x178] sm:$0xff] }
 0x11a   : > { %v1344_v12 = vpop.f32.mrf.mxu2  ;;  %v944_v13 = vadd.f32 %v4314_v42, %v943_v10 }
 0x11b   : > { %1526 = vst [vmem:[#allocation2 + $0x10] sm:$0xff] %v1147_v11 }
 0x11c   : > { %v1345_v16 = vadd.f32 %v1344_v12, %v944_v13  ;;  %v610_v13 = vld [vmem:[%s4139_s12 + $0x5a0] sm:$0xff] }
 0x11e   : > { %1592 = vst [vmem:[#allocation2 + $0x220] sm:$0xff] %v1345_v16  ;;  %993 = vmatmul.f32.gmra.mxu3 %v600_v14  ;;  %v748_v17 = vpop.f32.mrf.mxu0  ;;  %v1149_v18 = vpop.f32.mrf.mxu1  ;;  %v611_v14 = vld [vmem:[%s4139_s12 + $0x5a8] sm:$0xff] }
 0x11f   : > { %1394 = vmatmul.f32.gmra.mxu2 %v601_v15  ;;  %v749_v21 = vadd.f32 %v4314_v42, %v748_v17 }
 0x121   : > { %v946_v22 = vpop.f32.mrf.mxu3  ;;  %v1150_v23 = vadd.f32 %v1149_v18, %v749_v21  ;;  %795 = vmatmul.f32.gmra.mxu0 %v468_v19  ;;  %1196 = vmatmul.f32.gmra.mxu1 %v469_v20  ;;  %v478_v18 = vld [vmem:[%s4139_s12 + $0x180] sm:$0xff]  ;;  %v479_v19 = vld [vmem:[%s4139_s12 + $0x188] sm:$0xff] }
 0x122   : > { %v1347_v24 = vpop.f32.mrf.mxu2  ;;  %v947_v25 = vadd.f32 %v4314_v42, %v946_v22 }
 0x123   : > { %1527 = vst [vmem:[#allocation2 + $0x18] sm:$0xff] %v1150_v23 }
 0x124   : > { %v1348_v28 = vadd.f32 %v1347_v24, %v947_v25  ;;  %v612_v25 = vld [vmem:[%s4139_s12 + $0x5b0] sm:$0xff] }
 0x126   : > { %1593 = vst [vmem:[#allocation2 + $0x228] sm:$0xff] %v1348_v28  ;;  %996 = vmatmul.f32.gmra.mxu3 %v602_v26  ;;  %v751_v29 = vpop.f32.mrf.mxu0  ;;  %v1152_v30 = vpop.f32.mrf.mxu1  ;;  %v613_v26 = vld [vmem:[%s4139_s12 + $0x5b8] sm:$0xff] }
 0x127   : > { %1397 = vmatmul.f32.gmra.mxu2 %v603_v27  ;;  %v752_v33 = vadd.f32 %v4314_v42, %v751_v29 }
 0x129   : > { %v949_v34 = vpop.f32.mrf.mxu3  ;;  %v1153_v35 = vadd.f32 %v1152_v30, %v752_v33  ;;  %798 = vmatmul.f32.gmra.mxu0 %v470_v31  ;;  %1199 = vmatmul.f32.gmra.mxu1 %v471_v32  ;;  %v480_v30 = vld [vmem:[%s4139_s12 + $0x190] sm:$0xff]  ;;  %v481_v31 = vld [vmem:[%s4139_s12 + $0x198] sm:$0xff] }
 0x12a   : > { %v1350_v36 = vpop.f32.mrf.mxu2  ;;  %v950_v37 = vadd.f32 %v4314_v42, %v949_v34  ;;  %v1667_v32 = vld [vmem:[#allocation15 + $0x38] sm:$0xff] }
 0x12b   : > { %1528 = vst [vmem:[#allocation2 + $0x20] sm:$0xff] %v1153_v35  ;;  %1688 = vmatpush.msrb.mxu2 %v1667_v32 }
 0x12c   : > { %v1351_v40 = vadd.f32 %v1350_v36, %v950_v37 }
 0x12e   : > { %1594 = vst [vmem:[#allocation2 + $0x230] sm:$0xff] %v1351_v40  ;;  %999 = vmatmul.f32.gmra.mxu3 %v604_v38  ;;  %v754_v41 = vpop.f32.mrf.mxu0  ;;  %v1155_v43 = vpop.f32.mrf.mxu1  ;;  %v614_v38 = vld [vmem:[%s4139_s12 + $0x5c0] sm:$0xff] }
 0x12f   : > { %1400 = vmatmul.f32.gmra.mxu2 %v605_v39  ;;  %v755_v46 = vadd.f32 %v4314_v42, %v754_v41  ;;  %v615_v39 = vld [vmem:[%s4139_s12 + $0x5c8] sm:$0xff] }
 0x131   : > { %v952_v47 = vpop.f32.mrf.mxu3  ;;  %v1156_v48 = vadd.f32 %v1155_v43, %v755_v46  ;;  %801 = vmatmul.f32.gmra.mxu0 %v472_v44  ;;  %1202 = vmatmul.f32.gmra.mxu1 %v473_v45  ;;  %v482_v44 = vld [vmem:[%s4139_s12 + $0x1a0] sm:$0xff]  ;;  %v483_v45 = vld [vmem:[%s4139_s12 + $0x1a8] sm:$0xff] }
 0x132   : > { %v1353_v49 = vpop.f32.mrf.mxu2  ;;  %v953_v50 = vadd.f32 %v4314_v42, %v952_v47 }
 0x133   : > { %1529 = vst [vmem:[#allocation2 + $0x28] sm:$0xff] %v1156_v48 }
 0x134   : > { %v1354_v53 = vadd.f32 %v1353_v49, %v953_v50 }
 0x136   : > { %1595 = vst [vmem:[#allocation2 + $0x238] sm:$0xff] %v1354_v53  ;;  %1002 = vmatmul.f32.gmra.mxu3 %v606_v51  ;;  %v757_v54 = vpop.f32.mrf.mxu0  ;;  %v1158_v55 = vpop.f32.mrf.mxu1  ;;  %v616_v51 = vld [vmem:[%s4139_s12 + $0x5d0] sm:$0xff] }
 0x137   : > { %1403 = vmatmul.f32.gmra.mxu2 %v607_v52  ;;  %v758_v59 = vadd.f32 %v4314_v42, %v757_v54  ;;  %v617_v52 = vld [vmem:[%s4139_s12 + $0x5d8] sm:$0xff] }
 0x139   : > { %v955_v60 = vpop.f32.mrf.mxu3  ;;  %v1159_v61 = vadd.f32 %v1158_v55, %v758_v59  ;;  %804 = vmatmul.f32.gmra.mxu0 %v474_v56  ;;  %1205 = vmatmul.f32.gmra.mxu1 %v475_v57  ;;  %v484_v56 = vld [vmem:[%s4139_s12 + $0x1b0] sm:$0xff]  ;;  %v485_v57 = vld [vmem:[%s4139_s12 + $0x1b8] sm:$0xff] }
 0x13a   : > { %v1356_v62 = vpop.f32.mrf.mxu2  ;;  %v956_v63 = vadd.f32 %v4314_v42, %v955_v60 }
 0x13b   : > { %1530 = vst [vmem:[#allocation2 + $0x30] sm:$0xff] %v1159_v61 }
 0x13c   : > { %v1357_v3 = vadd.f32 %v1356_v62, %v956_v63  ;;  %v618_v63 = vld [vmem:[%s4139_s12 + $0x5e0] sm:$0xff] }
 0x13e   : > { %1596 = vst [vmem:[#allocation2 + $0x240] sm:$0xff] %v1357_v3  ;;  %1005 = vmatmul.f32.gmra.mxu3 %v608_v1  ;;  %v760_v4 = vpop.f32.mrf.mxu0  ;;  %v1161_v5 = vpop.f32.mrf.mxu1  ;;  %v619_v1 = vld [vmem:[%s4139_s12 + $0x5e8] sm:$0xff] }
 0x13f   : > { %1406 = vmatmul.f32.gmra.mxu2 %v609_v2  ;;  %v761_v8 = vadd.f32 %v4314_v42, %v760_v4 }
 0x141   : > { %v958_v9 = vpop.f32.mrf.mxu3  ;;  %v1162_v10 = vadd.f32 %v1161_v5, %v761_v8  ;;  %807 = vmatmul.f32.gmra.mxu0 %v476_v6  ;;  %1208 = vmatmul.f32.gmra.mxu1 %v477_v7  ;;  %v486_v5 = vld [vmem:[%s4139_s12 + $0x1c0] sm:$0xff]  ;;  %v487_v6 = vld [vmem:[%s4139_s12 + $0x1c8] sm:$0xff] }
 0x142   : > { %v1359_v11 = vpop.f32.mrf.mxu2  ;;  %v959_v12 = vadd.f32 %v4314_v42, %v958_v9 }
 0x143   : > { %1531 = vst [vmem:[#allocation2 + $0x38] sm:$0xff] %v1162_v10 }
 0x144   : > { %v1360_v15 = vadd.f32 %v1359_v11, %v959_v12  ;;  %v620_v12 = vld [vmem:[%s4139_s12 + $0x5f0] sm:$0xff] }
 0x146   : > { %1597 = vst [vmem:[#allocation2 + $0x248] sm:$0xff] %v1360_v15  ;;  %1008 = vmatmul.f32.gmra.mxu3 %v610_v13  ;;  %v763_v16 = vpop.f32.mrf.mxu0  ;;  %v1164_v17 = vpop.f32.mrf.mxu1  ;;  %v621_v13 = vld [vmem:[%s4139_s12 + $0x5f8] sm:$0xff] }
 0x147   : > { %1409 = vmatmul.f32.gmra.mxu2 %v611_v14  ;;  %v764_v20 = vadd.f32 %v4314_v42, %v763_v16 }
 0x149   : > { %v961_v21 = vpop.f32.mrf.mxu3  ;;  %v1165_v22 = vadd.f32 %v1164_v17, %v764_v20  ;;  %810 = vmatmul.f32.gmra.mxu0 %v478_v18  ;;  %1211 = vmatmul.f32.gmra.mxu1 %v479_v19  ;;  %v488_v17 = vld [vmem:[%s4139_s12 + $0x1d0] sm:$0xff]  ;;  %v489_v18 = vld [vmem:[%s4139_s12 + $0x1d8] sm:$0xff] }
 0x14a   : > { %v1362_v23 = vpop.f32.mrf.mxu2  ;;  %v962_v24 = vadd.f32 %v4314_v42, %v961_v21  ;;  %v1666_v19 = vld [vmem:[#allocation15 + $0x30] sm:$0xff] }
 0x14b   : > { %1532 = vst [vmem:[#allocation2 + $0x40] sm:$0xff] %v1165_v22  ;;  %1689 = vmatpush.msrb.mxu2 %v1666_v19 }
 0x14c   : > { %v1363_v27 = vadd.f32 %v1362_v23, %v962_v24 }
 0x14e   : > { %1598 = vst [vmem:[#allocation2 + $0x250] sm:$0xff] %v1363_v27  ;;  %1011 = vmatmul.f32.gmra.mxu3 %v612_v25  ;;  %v766_v28 = vpop.f32.mrf.mxu0  ;;  %v1167_v29 = vpop.f32.mrf.mxu1  ;;  %v622_v25 = vld [vmem:[%s4139_s12 + $0x600] sm:$0xff] }
 0x14f   : > { %1412 = vmatmul.f32.gmra.mxu2 %v613_v26  ;;  %v767_v33 = vadd.f32 %v4314_v42, %v766_v28  ;;  %v623_v26 = vld [vmem:[%s4139_s12 + $0x608] sm:$0xff] }
 0x151   : > { %v964_v34 = vpop.f32.mrf.mxu3  ;;  %v1168_v35 = vadd.f32 %v1167_v29, %v767_v33  ;;  %813 = vmatmul.f32.gmra.mxu0 %v480_v30  ;;  %1214 = vmatmul.f32.gmra.mxu1 %v481_v31  ;;  %v490_v30 = vld [vmem:[%s4139_s12 + $0x1e0] sm:$0xff]  ;;  %v491_v31 = vld [vmem:[%s4139_s12 + $0x1e8] sm:$0xff] }
 0x152   : > { %v1365_v36 = vpop.f32.mrf.mxu2  ;;  %v965_v37 = vadd.f32 %v4314_v42, %v964_v34 }
 0x153   : > { %1533 = vst [vmem:[#allocation2 + $0x48] sm:$0xff] %v1168_v35 }
 0x154   : > { %v1366_v40 = vadd.f32 %v1365_v36, %v965_v37  ;;  %v624_v37 = vld [vmem:[%s4139_s12 + $0x610] sm:$0xff] }
 0x156   : > { %1599 = vst [vmem:[#allocation2 + $0x258] sm:$0xff] %v1366_v40  ;;  %1014 = vmatmul.f32.gmra.mxu3 %v614_v38  ;;  %v769_v41 = vpop.f32.mrf.mxu0  ;;  %v1170_v43 = vpop.f32.mrf.mxu1  ;;  %v625_v38 = vld [vmem:[%s4139_s12 + $0x618] sm:$0xff] }
 0x157   : > { %1415 = vmatmul.f32.gmra.mxu2 %v615_v39  ;;  %v770_v46 = vadd.f32 %v4314_v42, %v769_v41 }
 0x159   : > { %v967_v47 = vpop.f32.mrf.mxu3  ;;  %v1171_v48 = vadd.f32 %v1170_v43, %v770_v46  ;;  %816 = vmatmul.f32.gmra.mxu0 %v482_v44  ;;  %1217 = vmatmul.f32.gmra.mxu1 %v483_v45  ;;  %v492_v43 = vld [vmem:[%s4139_s12 + $0x1f0] sm:$0xff]  ;;  %v493_v44 = vld [vmem:[%s4139_s12 + $0x1f8] sm:$0xff] }
 0x15a   : > { %v1368_v49 = vpop.f32.mrf.mxu2  ;;  %v968_v50 = vadd.f32 %v4314_v42, %v967_v47 }
 0x15b   : > { %1534 = vst [vmem:[#allocation2 + $0x50] sm:$0xff] %v1171_v48 }
 0x15c   : > { %v1369_v53 = vadd.f32 %v1368_v49, %v968_v50  ;;  %v626_v50 = vld [vmem:[%s4139_s12 + $0x620] sm:$0xff] }
 0x15e   : > { %1600 = vst [vmem:[#allocation2 + $0x260] sm:$0xff] %v1369_v53  ;;  %1017 = vmatmul.f32.gmra.mxu3 %v616_v51  ;;  %v772_v54 = vpop.f32.mrf.mxu0  ;;  %v1173_v55 = vpop.f32.mrf.mxu1  ;;  %v627_v51 = vld [vmem:[%s4139_s12 + $0x628] sm:$0xff] }
 0x15f   : > { %1418 = vmatmul.f32.gmra.mxu2 %v617_v52  ;;  %v773_v58 = vadd.f32 %v4314_v42, %v772_v54 }
 0x161   : > { %v970_v59 = vpop.f32.mrf.mxu3  ;;  %v1174_v60 = vadd.f32 %v1173_v55, %v773_v58  ;;  %819 = vmatmul.f32.gmra.mxu0 %v484_v56  ;;  %1220 = vmatmul.f32.gmra.mxu1 %v485_v57  ;;  %v494_v55 = vld [vmem:[%s4139_s12 + $0x200] sm:$0xff]  ;;  %v495_v56 = vld [vmem:[%s4139_s12 + $0x208] sm:$0xff] }
 0x162   : > { %v1371_v61 = vpop.f32.mrf.mxu2  ;;  %v971_v62 = vadd.f32 %v4314_v42, %v970_v59  ;;  %v1665_v58 = vld [vmem:[#allocation15 + $0x28] sm:$0xff] }
 0x163   : > { %1535 = vst [vmem:[#allocation2 + $0x58] sm:$0xff] %v1174_v60  ;;  %1690 = vmatpush.msrb.mxu2 %v1665_v58 }
 0x164   : > { %v1372_v2 = vadd.f32 %v1371_v61, %v971_v62 }
 0x166   : > { %1601 = vst [vmem:[#allocation2 + $0x268] sm:$0xff] %v1372_v2  ;;  %1020 = vmatmul.f32.gmra.mxu3 %v618_v63  ;;  %v775_v3 = vpop.f32.mrf.mxu0  ;;  %v1176_v4 = vpop.f32.mrf.mxu1  ;;  %v628_v63 = vld [vmem:[%s4139_s12 + $0x630] sm:$0xff] }
 0x167   : > { %1421 = vmatmul.f32.gmra.mxu2 %v619_v1  ;;  %v776_v7 = vadd.f32 %v4314_v42, %v775_v3  ;;  %v629_v1 = vld [vmem:[%s4139_s12 + $0x638] sm:$0xff] }
 0x169   : > { %v973_v8 = vpop.f32.mrf.mxu3  ;;  %v1177_v9 = vadd.f32 %v1176_v4, %v776_v7  ;;  %822 = vmatmul.f32.gmra.mxu0 %v486_v5  ;;  %1223 = vmatmul.f32.gmra.mxu1 %v487_v6  ;;  %v496_v5 = vld [vmem:[%s4139_s12 + $0x210] sm:$0xff]  ;;  %v497_v6 = vld [vmem:[%s4139_s12 + $0x218] sm:$0xff] }
 0x16a   : > { %v1374_v10 = vpop.f32.mrf.mxu2  ;;  %v974_v11 = vadd.f32 %v4314_v42, %v973_v8 }
 0x16b   : > { %1536 = vst [vmem:[#allocation2 + $0x60] sm:$0xff] %v1177_v9 }
 0x16c   : > { %v1375_v14 = vadd.f32 %v1374_v10, %v974_v11 }
 0x16e   : > { %1602 = vst [vmem:[#allocation2 + $0x270] sm:$0xff] %v1375_v14  ;;  %1023 = vmatmul.f32.gmra.mxu3 %v620_v12  ;;  %v778_v15 = vpop.f32.mrf.mxu0  ;;  %v1179_v16 = vpop.f32.mrf.mxu1  ;;  %v630_v12 = vld [vmem:[%s4139_s12 + $0x640] sm:$0xff] }
 0x16f   : > { %1424 = vmatmul.f32.gmra.mxu2 %v621_v13  ;;  %v779_v20 = vadd.f32 %v4314_v42, %v778_v15  ;;  %v631_v13 = vld [vmem:[%s4139_s12 + $0x648] sm:$0xff] }
 0x171   : > { %v976_v21 = vpop.f32.mrf.mxu3  ;;  %v1180_v22 = vadd.f32 %v1179_v16, %v779_v20  ;;  %825 = vmatmul.f32.gmra.mxu0 %v488_v17  ;;  %1226 = vmatmul.f32.gmra.mxu1 %v489_v18  ;;  %v498_v17 = vld [vmem:[%s4139_s12 + $0x220] sm:$0xff]  ;;  %v499_v18 = vld [vmem:[%s4139_s12 + $0x228] sm:$0xff] }
 0x172   : > { %v1377_v23 = vpop.f32.mrf.mxu2  ;;  %v977_v24 = vadd.f32 %v4314_v42, %v976_v21 }
 0x173   : > { %1537 = vst [vmem:[#allocation2 + $0x68] sm:$0xff] %v1180_v22 }
 0x174   : > { %v1378_v27 = vadd.f32 %v1377_v23, %v977_v24  ;;  %v632_v24 = vld [vmem:[%s4139_s12 + $0x650] sm:$0xff] }
 0x176   : > { %1603 = vst [vmem:[#allocation2 + $0x278] sm:$0xff] %v1378_v27  ;;  %1026 = vmatmul.f32.gmra.mxu3 %v622_v25  ;;  %v781_v28 = vpop.f32.mrf.mxu0  ;;  %v1182_v29 = vpop.f32.mrf.mxu1  ;;  %v633_v25 = vld [vmem:[%s4139_s12 + $0x658] sm:$0xff] }
 0x177   : > { %1427 = vmatmul.f32.gmra.mxu2 %v623_v26  ;;  %v782_v32 = vadd.f32 %v4314_v42, %v781_v28 }
 0x179   : > { %v979_v33 = vpop.f32.mrf.mxu3  ;;  %v1183_v34 = vadd.f32 %v1182_v29, %v782_v32  ;;  %828 = vmatmul.f32.gmra.mxu0 %v490_v30  ;;  %1229 = vmatmul.f32.gmra.mxu1 %v491_v31  ;;  %v500_v29 = vld [vmem:[%s4139_s12 + $0x230] sm:$0xff]  ;;  %v501_v30 = vld [vmem:[%s4139_s12 + $0x238] sm:$0xff] }
 0x17a   : > { %v1380_v35 = vpop.f32.mrf.mxu2  ;;  %v980_v36 = vadd.f32 %v4314_v42, %v979_v33 }
 0x17b   : > { %1538 = vst [vmem:[#allocation2 + $0x70] sm:$0xff] %v1183_v34 }
 0x17c   : > { %v1381_v39 = vadd.f32 %v1380_v35, %v980_v36  ;;  %v634_v36 = vld [vmem:[%s4139_s12 + $0x660] sm:$0xff] }
 0x17e   : > { %1604 = vst [vmem:[#allocation2 + $0x280] sm:$0xff] %v1381_v39  ;;  %1029 = vmatmul.f32.gmra.mxu3 %v624_v37  ;;  %v784_v40 = vpop.f32.mrf.mxu0  ;;  %v1185_v41 = vpop.f32.mrf.mxu1  ;;  %v635_v37 = vld [vmem:[%s4139_s12 + $0x668] sm:$0xff] }
 0x17f   : > { %1430 = vmatmul.f32.gmra.mxu2 %v625_v38  ;;  %v785_v45 = vadd.f32 %v4314_v42, %v784_v40 }
 0x181   : > { %v982_v46 = vpop.f32.mrf.mxu3  ;;  %v1186_v47 = vadd.f32 %v1185_v41, %v785_v45  ;;  %831 = vmatmul.f32.gmra.mxu0 %v492_v43  ;;  %1232 = vmatmul.f32.gmra.mxu1 %v493_v44  ;;  %v502_v41 = vld [vmem:[%s4139_s12 + $0x240] sm:$0xff]  ;;  %v503_v43 = vld [vmem:[%s4139_s12 + $0x248] sm:$0xff] }
 0x182   : > { %v1383_v48 = vpop.f32.mrf.mxu2  ;;  %v983_v49 = vadd.f32 %v4314_v42, %v982_v46  ;;  %v1664_v44 = vld [vmem:[#allocation15 + $0x20] sm:$0xff] }
 0x183   : > { %1539 = vst [vmem:[#allocation2 + $0x78] sm:$0xff] %v1186_v47  ;;  %1691 = vmatpush.msrb.mxu2 %v1664_v44 }
 0x184   : > { %v1384_v52 = vadd.f32 %v1383_v48, %v983_v49 }
 0x186   : > { %1605 = vst [vmem:[#allocation2 + $0x288] sm:$0xff] %v1384_v52  ;;  %1032 = vmatmul.f32.gmra.mxu3 %v626_v50  ;;  %v787_v53 = vpop.f32.mrf.mxu0  ;;  %v1188_v54 = vpop.f32.mrf.mxu1  ;;  %v636_v50 = vld [vmem:[%s4139_s12 + $0x670] sm:$0xff] }
 0x187   : > { %1433 = vmatmul.f32.gmra.mxu2 %v627_v51  ;;  %v788_v57 = vadd.f32 %v4314_v42, %v787_v53  ;;  %v637_v51 = vld [vmem:[%s4139_s12 + $0x678] sm:$0xff] }
 0x189   : > { %v985_v59 = vpop.f32.mrf.mxu3  ;;  %v1189_v60 = vadd.f32 %v1188_v54, %v788_v57  ;;  %834 = vmatmul.f32.gmra.mxu0 %v494_v55  ;;  %1235 = vmatmul.f32.gmra.mxu1 %v495_v56  ;;  %v504_v55 = vld [vmem:[%s4139_s12 + $0x250] sm:$0xff]  ;;  %v505_v56 = vld [vmem:[%s4139_s12 + $0x258] sm:$0xff] }
 0x18a   : > { %v1386_v61 = vpop.f32.mrf.mxu2  ;;  %v986_v62 = vadd.f32 %v4314_v42, %v985_v59 }
 0x18b   : > { %1540 = vst [vmem:[#allocation2 + $0x80] sm:$0xff] %v1189_v60 }
 0x18c   : > { %v1387_v2 = vadd.f32 %v1386_v61, %v986_v62  ;;  %v638_v62 = vld [vmem:[%s4139_s12 + $0x680] sm:$0xff] }
 0x18e   : > { %1606 = vst [vmem:[#allocation2 + $0x290] sm:$0xff] %v1387_v2  ;;  %1035 = vmatmul.f32.gmra.mxu3 %v628_v63  ;;  %v790_v3 = vpop.f32.mrf.mxu0  ;;  %v1191_v4 = vpop.f32.mrf.mxu1  ;;  %v639_v63 = vld [vmem:[%s4139_s12 + $0x688] sm:$0xff] }
 0x18f   : > { %1436 = vmatmul.f32.gmra.mxu2 %v629_v1  ;;  %v791_v7 = vadd.f32 %v4314_v42, %v790_v3 }
 0x191   : > { %v988_v8 = vpop.f32.mrf.mxu3  ;;  %v1192_v9 = vadd.f32 %v1191_v4, %v791_v7  ;;  %837 = vmatmul.f32.gmra.mxu0 %v496_v5  ;;  %1238 = vmatmul.f32.gmra.mxu1 %v497_v6  ;;  %v506_v4 = vld [vmem:[%s4139_s12 + $0x260] sm:$0xff]  ;;  %v507_v5 = vld [vmem:[%s4139_s12 + $0x268] sm:$0xff] }
 0x192   : > { %v1389_v10 = vpop.f32.mrf.mxu2  ;;  %v989_v11 = vadd.f32 %v4314_v42, %v988_v8 }
 0x193   : > { %1541 = vst [vmem:[#allocation2 + $0x88] sm:$0xff] %v1192_v9 }
 0x194   : > { %v1390_v14 = vadd.f32 %v1389_v10, %v989_v11  ;;  %v640_v11 = vld [vmem:[%s4139_s12 + $0x690] sm:$0xff] }
 0x196   : > { %1607 = vst [vmem:[#allocation2 + $0x298] sm:$0xff] %v1390_v14  ;;  %1038 = vmatmul.f32.gmra.mxu3 %v630_v12  ;;  %v793_v15 = vpop.f32.mrf.mxu0  ;;  %v1194_v16 = vpop.f32.mrf.mxu1  ;;  %v641_v12 = vld [vmem:[%s4139_s12 + $0x698] sm:$0xff] }
 0x197   : > { %1439 = vmatmul.f32.gmra.mxu2 %v631_v13  ;;  %v794_v19 = vadd.f32 %v4314_v42, %v793_v15 }
 0x199   : > { %v991_v20 = vpop.f32.mrf.mxu3  ;;  %v1195_v21 = vadd.f32 %v1194_v16, %v794_v19  ;;  %840 = vmatmul.f32.gmra.mxu0 %v498_v17  ;;  %1241 = vmatmul.f32.gmra.mxu1 %v499_v18  ;;  %v508_v16 = vld [vmem:[%s4139_s12 + $0x270] sm:$0xff]  ;;  %v509_v17 = vld [vmem:[%s4139_s12 + $0x278] sm:$0xff] }
 0x19a   : > { %v1392_v22 = vpop.f32.mrf.mxu2  ;;  %v992_v23 = vadd.f32 %v4314_v42, %v991_v20 }
 0x19b   : > { %1542 = vst [vmem:[#allocation2 + $0x90] sm:$0xff] %v1195_v21 }
 0x19c   : > { %v1393_v26 = vadd.f32 %v1392_v22, %v992_v23  ;;  %v642_v23 = vld [vmem:[%s4139_s12 + $0x6a0] sm:$0xff] }
 0x19e   : > { %1608 = vst [vmem:[#allocation2 + $0x2a0] sm:$0xff] %v1393_v26  ;;  %1041 = vmatmul.f32.gmra.mxu3 %v632_v24  ;;  %v796_v27 = vpop.f32.mrf.mxu0  ;;  %v1197_v28 = vpop.f32.mrf.mxu1  ;;  %v643_v24 = vld [vmem:[%s4139_s12 + $0x6a8] sm:$0xff] }
 0x19f   : > { %1442 = vmatmul.f32.gmra.mxu2 %v633_v25  ;;  %v797_v31 = vadd.f32 %v4314_v42, %v796_v27 }
 0x1a1   : > { %v994_v32 = vpop.f32.mrf.mxu3  ;;  %v1198_v33 = vadd.f32 %v1197_v28, %v797_v31  ;;  %843 = vmatmul.f32.gmra.mxu0 %v500_v29  ;;  %1244 = vmatmul.f32.gmra.mxu1 %v501_v30  ;;  %v510_v28 = vld [vmem:[%s4139_s12 + $0x280] sm:$0xff]  ;;  %v511_v29 = vld [vmem:[%s4139_s12 + $0x288] sm:$0xff] }
 0x1a2   : > { %v1395_v34 = vpop.f32.mrf.mxu2  ;;  %v995_v35 = vadd.f32 %v4314_v42, %v994_v32  ;;  %v1663_v30 = vld [vmem:[#allocation15 + $0x18] sm:$0xff] }
 0x1a3   : > { %1543 = vst [vmem:[#allocation2 + $0x98] sm:$0xff] %v1198_v33  ;;  %1692 = vmatpush.msrb.mxu2 %v1663_v30 }
 0x1a4   : > { %v1396_v38 = vadd.f32 %v1395_v34, %v995_v35 }
 0x1a6   : > { %1609 = vst [vmem:[#allocation2 + $0x2a8] sm:$0xff] %v1396_v38  ;;  %1044 = vmatmul.f32.gmra.mxu3 %v634_v36  ;;  %v799_v39 = vpop.f32.mrf.mxu0  ;;  %v1200_v40 = vpop.f32.mrf.mxu1  ;;  %v644_v36 = vld [vmem:[%s4139_s12 + $0x6b0] sm:$0xff] }
 0x1a7   : > { %1445 = vmatmul.f32.gmra.mxu2 %v635_v37  ;;  %v800_v45 = vadd.f32 %v4314_v42, %v799_v39  ;;  %v645_v37 = vld [vmem:[%s4139_s12 + $0x6b8] sm:$0xff] }
 0x1a9   : > { %v997_v46 = vpop.f32.mrf.mxu3  ;;  %v1201_v47 = vadd.f32 %v1200_v40, %v800_v45  ;;  %846 = vmatmul.f32.gmra.mxu0 %v502_v41  ;;  %1247 = vmatmul.f32.gmra.mxu1 %v503_v43  ;;  %v512_v41 = vld [vmem:[%s4139_s12 + $0x290] sm:$0xff]  ;;  %v513_v43 = vld [vmem:[%s4139_s12 + $0x298] sm:$0xff] }
 0x1aa   : > { %v1398_v48 = vpop.f32.mrf.mxu2  ;;  %v998_v49 = vadd.f32 %v4314_v42, %v997_v46 }
 0x1ab   : > { %1544 = vst [vmem:[#allocation2 + $0xa0] sm:$0xff] %v1201_v47 }
 0x1ac   : > { %v1399_v52 = vadd.f32 %v1398_v48, %v998_v49  ;;  %v646_v49 = vld [vmem:[%s4139_s12 + $0x6c0] sm:$0xff] }
 0x1ae   : > { %1610 = vst [vmem:[#allocation2 + $0x2b0] sm:$0xff] %v1399_v52  ;;  %1047 = vmatmul.f32.gmra.mxu3 %v636_v50  ;;  %v802_v53 = vpop.f32.mrf.mxu0  ;;  %v1203_v54 = vpop.f32.mrf.mxu1  ;;  %v647_v50 = vld [vmem:[%s4139_s12 + $0x6c8] sm:$0xff] }
 0x1af   : > { %1448 = vmatmul.f32.gmra.mxu2 %v637_v51  ;;  %v803_v57 = vadd.f32 %v4314_v42, %v802_v53 }
 0x1b1   : > { %v1000_v58 = vpop.f32.mrf.mxu3  ;;  %v1204_v59 = vadd.f32 %v1203_v54, %v803_v57  ;;  %849 = vmatmul.f32.gmra.mxu0 %v504_v55  ;;  %1250 = vmatmul.f32.gmra.mxu1 %v505_v56  ;;  %v514_v54 = vld [vmem:[%s4139_s12 + $0x2a0] sm:$0xff]  ;;  %v515_v55 = vld [vmem:[%s4139_s12 + $0x2a8] sm:$0xff] }
 0x1b2   : > { %v1401_v60 = vpop.f32.mrf.mxu2  ;;  %v1001_v61 = vadd.f32 %v4314_v42, %v1000_v58 }
 0x1b3   : > { %1545 = vst [vmem:[#allocation2 + $0xa8] sm:$0xff] %v1204_v59 }
 0x1b4   : > { %v1402_v1 = vadd.f32 %v1401_v60, %v1001_v61  ;;  %v648_v61 = vld [vmem:[%s4139_s12 + $0x6d0] sm:$0xff] }
 0x1b6   : > { %1611 = vst [vmem:[#allocation2 + $0x2b8] sm:$0xff] %v1402_v1  ;;  %1050 = vmatmul.f32.gmra.mxu3 %v638_v62  ;;  %v805_v2 = vpop.f32.mrf.mxu0  ;;  %v1206_v3 = vpop.f32.mrf.mxu1  ;;  %v649_v62 = vld [vmem:[%s4139_s12 + $0x6d8] sm:$0xff] }
 0x1b7   : > { %1451 = vmatmul.f32.gmra.mxu2 %v639_v63  ;;  %v806_v6 = vadd.f32 %v4314_v42, %v805_v2 }
 0x1b9   : > { %v1003_v7 = vpop.f32.mrf.mxu3  ;;  %v1207_v8 = vadd.f32 %v1206_v3, %v806_v6  ;;  %852 = vmatmul.f32.gmra.mxu0 %v506_v4  ;;  %1253 = vmatmul.f32.gmra.mxu1 %v507_v5  ;;  %v516_v3 = vld [vmem:[%s4139_s12 + $0x2b0] sm:$0xff]  ;;  %v517_v4 = vld [vmem:[%s4139_s12 + $0x2b8] sm:$0xff] }
 0x1ba   : > { %v1404_v9 = vpop.f32.mrf.mxu2  ;;  %v1004_v10 = vadd.f32 %v4314_v42, %v1003_v7  ;;  %v1662_v6 = vld [vmem:[#allocation15 + $0x10] sm:$0xff] }
 0x1bb   : > { %1546 = vst [vmem:[#allocation2 + $0xb0] sm:$0xff] %v1207_v8  ;;  %1693 = vmatpush.msrb.mxu2 %v1662_v6 }
 0x1bc   : > { %v1405_v13 = vadd.f32 %v1404_v9, %v1004_v10  ;;  %v4481_v10 = vld [vmem:[#allocation13] ss:$0 sm:$0xff] }
 0x1be   : > { %1612 = vst [vmem:[#allocation2 + $0x2c0] sm:$0xff] %v1405_v13  ;;  %1053 = vmatmul.f32.gmra.mxu3 %v640_v11  ;;  %v808_v14 = vpop.f32.mrf.mxu0  ;;  %v1209_v15 = vpop.f32.mrf.mxu1  ;;  %v651_v13 = vld [vmem:[%s4139_s12 + $0x6e8] sm:$0xff] }
 0x1bf   : > { %1454 = vmatmul.f32.gmra.mxu2 %v641_v12  ;;  %v809_v18 = vadd.f32 %v4314_v42, %v808_v14  ;;  %v650_v12 = vld [vmem:[%s4139_s12 + $0x6e0] sm:$0xff] }
 0x1c1   : > { %v1006_v19 = vpop.f32.mrf.mxu3  ;;  %v1210_v20 = vadd.f32 %v1209_v15, %v809_v18  ;;  %855 = vmatmul.f32.gmra.mxu0 %v508_v16  ;;  %1256 = vmatmul.f32.gmra.mxu1 %v509_v17  ;;  %v518_v16 = vld [vmem:[%s4139_s12 + $0x2c0] sm:$0xff]  ;;  %v519_v17 = vld [vmem:[%s4139_s12 + $0x2c8] sm:$0xff] }
 0x1c2   : > { %v1407_v21 = vpop.f32.mrf.mxu2  ;;  %v1007_v22 = vadd.f32 %v4314_v42, %v1006_v19 }
 0x1c3   : > { %1547 = vst [vmem:[#allocation2 + $0xb8] sm:$0xff] %v1210_v20 }
 0x1c4   : > { %v1408_v25 = vadd.f32 %v1407_v21, %v1007_v22 }
 0x1c6   : > { %1613 = vst [vmem:[#allocation2 + $0x2c8] sm:$0xff] %v1408_v25  ;;  %1056 = vmatmul.f32.gmra.mxu3 %v642_v23  ;;  %v811_v26 = vpop.f32.mrf.mxu0  ;;  %v1212_v27 = vpop.f32.mrf.mxu1  ;;  %v652_v23 = vld [vmem:[%s4139_s12 + $0x6f0] sm:$0xff] }
 0x1c7   : > { %1457 = vmatmul.f32.gmra.mxu2 %v643_v24  ;;  %v812_v31 = vadd.f32 %v4314_v42, %v811_v26  ;;  %v653_v24 = vld [vmem:[%s4139_s12 + $0x6f8] sm:$0xff] }
 0x1c9   : > { %v1009_v32 = vpop.f32.mrf.mxu3  ;;  %v1213_v33 = vadd.f32 %v1212_v27, %v812_v31  ;;  %858 = vmatmul.f32.gmra.mxu0 %v510_v28  ;;  %1259 = vmatmul.f32.gmra.mxu1 %v511_v29  ;;  %v520_v28 = vld [vmem:[%s4139_s12 + $0x2d0] sm:$0xff]  ;;  %v521_v29 = vld [vmem:[%s4139_s12 + $0x2d8] sm:$0xff] }
 0x1ca   : > { %v1410_v34 = vpop.f32.mrf.mxu2  ;;  %v1010_v35 = vadd.f32 %v4314_v42, %v1009_v32 }
 0x1cb   : > { %1548 = vst [vmem:[#allocation2 + $0xc0] sm:$0xff] %v1213_v33 }
 0x1cc   : > { %v1411_v38 = vadd.f32 %v1410_v34, %v1010_v35  ;;  %v654_v35 = vld [vmem:[%s4139_s12 + $0x700] sm:$0xff] }
 0x1ce   : > { %1614 = vst [vmem:[#allocation2 + $0x2d0] sm:$0xff] %v1411_v38  ;;  %1059 = vmatmul.f32.gmra.mxu3 %v644_v36  ;;  %v814_v39 = vpop.f32.mrf.mxu0  ;;  %v1215_v40 = vpop.f32.mrf.mxu1  ;;  %v655_v36 = vld [vmem:[%s4139_s12 + $0x708] sm:$0xff] }
 0x1cf   : > { %1460 = vmatmul.f32.gmra.mxu2 %v645_v37  ;;  %v815_v44 = vadd.f32 %v4314_v42, %v814_v39 }
 0x1d1   : > { %v1012_v45 = vpop.f32.mrf.mxu3  ;;  %v1216_v46 = vadd.f32 %v1215_v40, %v815_v44  ;;  %861 = vmatmul.f32.gmra.mxu0 %v512_v41  ;;  %1262 = vmatmul.f32.gmra.mxu1 %v513_v43  ;;  %v522_v40 = vld [vmem:[%s4139_s12 + $0x2e0] sm:$0xff]  ;;  %v523_v41 = vld [vmem:[%s4139_s12 + $0x2e8] sm:$0xff] }
 0x1d2   : > { %v1413_v47 = vpop.f32.mrf.mxu2  ;;  %v1013_v48 = vadd.f32 %v4314_v42, %v1012_v45 }
 0x1d3   : > { %1549 = vst [vmem:[#allocation2 + $0xc8] sm:$0xff] %v1216_v46 }
 0x1d4   : > { %v1414_v51 = vadd.f32 %v1413_v47, %v1013_v48  ;;  %v656_v48 = vld [vmem:[%s4139_s12 + $0x710] sm:$0xff] }
 0x1d6   : > { %1615 = vst [vmem:[#allocation2 + $0x2d8] sm:$0xff] %v1414_v51  ;;  %1062 = vmatmul.f32.gmra.mxu3 %v646_v49  ;;  %v817_v52 = vpop.f32.mrf.mxu0  ;;  %v1218_v53 = vpop.f32.mrf.mxu1  ;;  %v657_v49 = vld [vmem:[%s4139_s12 + $0x718] sm:$0xff] }
 0x1d7   : > { %1463 = vmatmul.f32.gmra.mxu2 %v647_v50  ;;  %v818_v56 = vadd.f32 %v4314_v42, %v817_v52 }
 0x1d9   : > { %v1015_v57 = vpop.f32.mrf.mxu3  ;;  %v1219_v58 = vadd.f32 %v1218_v53, %v818_v56  ;;  %864 = vmatmul.f32.gmra.mxu0 %v514_v54  ;;  %1265 = vmatmul.f32.gmra.mxu1 %v515_v55  ;;  %v524_v53 = vld [vmem:[%s4139_s12 + $0x2f0] sm:$0xff]  ;;  %v525_v54 = vld [vmem:[%s4139_s12 + $0x2f8] sm:$0xff] }
 0x1da   : > { %v1416_v59 = vpop.f32.mrf.mxu2  ;;  %v1016_v60 = vadd.f32 %v4314_v42, %v1015_v57  ;;  %v1661_v55 = vld [vmem:[#allocation15 + $0x8] sm:$0xff] }
 0x1db   : > { %1550 = vst [vmem:[#allocation2 + $0xd0] sm:$0xff] %v1219_v58  ;;  %1694 = vmatpush.msrb.mxu2 %v1661_v55 }
 0x1dc   : > { %v1417_v63 = vadd.f32 %v1416_v59, %v1016_v60 }
 0x1de   : > { %1616 = vst [vmem:[#allocation2 + $0x2e0] sm:$0xff] %v1417_v63  ;;  %1065 = vmatmul.f32.gmra.mxu3 %v648_v61  ;;  %v820_v1 = vpop.f32.mrf.mxu0  ;;  %v1221_v2 = vpop.f32.mrf.mxu1  ;;  %v658_v61 = vld [vmem:[%s4139_s12 + $0x720] sm:$0xff] }
 0x1df   : > { %1466 = vmatmul.f32.gmra.mxu2 %v649_v62  ;;  %v821_v5 = vadd.f32 %v4314_v42, %v820_v1  ;;  %v659_v62 = vld [vmem:[%s4139_s12 + $0x728] sm:$0xff] }
 0x1e1   : > { %v1018_v7 = vpop.f32.mrf.mxu3  ;;  %v1222_v8 = vadd.f32 %v1221_v2, %v821_v5  ;;  %867 = vmatmul.f32.gmra.mxu0 %v516_v3  ;;  %1268 = vmatmul.f32.gmra.mxu1 %v517_v4  ;;  %v526_v3 = vld [vmem:[%s4139_s12 + $0x300] sm:$0xff]  ;;  %v527_v4 = vld [vmem:[%s4139_s12 + $0x308] sm:$0xff] }
 0x1e2   : > { %v1419_v9 = vpop.f32.mrf.mxu2  ;;  %v1019_v11 = vadd.f32 %v4481_v10, %v1018_v7 }
 0x1e3   : > { %1551 = vst [vmem:[#allocation2 + $0xd8] sm:$0xff] %v1222_v8 }
 0x1e4   : > { %v1420_v14 = vadd.f32 %v1419_v9, %v1019_v11  ;;  %v660_v11 = vld [vmem:[%s4139_s12 + $0x730] sm:$0xff] }
 0x1e6   : > { %1617 = vst [vmem:[#allocation2 + $0x2e8] sm:$0xff] %v1420_v14  ;;  %1068 = vmatmul.f32.gmra.mxu3 %v650_v12  ;;  %v823_v42 = vpop.f32.mrf.mxu0  ;;  %v1224_v15 = vpop.f32.mrf.mxu1  ;;  %v661_v12 = vld [vmem:[%s4139_s12 + $0x738] sm:$0xff] }
 0x1e7   : > { %1469 = vmatmul.f32.gmra.mxu2 %v651_v13  ;;  %v824_v18 = vadd.f32 %v4481_v10, %v823_v42 }
 0x1e9   : > { %v1021_v19 = vpop.f32.mrf.mxu3  ;;  %v1225_v20 = vadd.f32 %v1224_v15, %v824_v18  ;;  %870 = vmatmul.f32.gmra.mxu0 %v518_v16  ;;  %1271 = vmatmul.f32.gmra.mxu1 %v519_v17  ;;  %v528_v15 = vld [vmem:[%s4139_s12 + $0x310] sm:$0xff]  ;;  %v529_v16 = vld [vmem:[%s4139_s12 + $0x318] sm:$0xff] }
 0x1ea   : > { %v1422_v21 = vpop.f32.mrf.mxu2  ;;  %v1022_v22 = vadd.f32 %v4481_v10, %v1021_v19 }
 0x1eb   : > { %1552 = vst [vmem:[#allocation2 + $0xe0] sm:$0xff] %v1225_v20 }
 0x1ec   : > { %v1423_v25 = vadd.f32 %v1422_v21, %v1022_v22  ;;  %v662_v22 = vld [vmem:[%s4139_s12 + $0x740] sm:$0xff] }
 0x1ee   : > { %1618 = vst [vmem:[#allocation2 + $0x2f0] sm:$0xff] %v1423_v25  ;;  %1071 = vmatmul.f32.gmra.mxu3 %v652_v23  ;;  %v826_v26 = vpop.f32.mrf.mxu0  ;;  %v1227_v27 = vpop.f32.mrf.mxu1  ;;  %v663_v23 = vld [vmem:[%s4139_s12 + $0x748] sm:$0xff] }
 0x1ef   : > { %1472 = vmatmul.f32.gmra.mxu2 %v653_v24  ;;  %v827_v30 = vadd.f32 %v4481_v10, %v826_v26 }
 0x1f1   : > { %v1024_v31 = vpop.f32.mrf.mxu3  ;;  %v1228_v32 = vadd.f32 %v1227_v27, %v827_v30  ;;  %873 = vmatmul.f32.gmra.mxu0 %v520_v28  ;;  %1274 = vmatmul.f32.gmra.mxu1 %v521_v29  ;;  %v530_v27 = vld [vmem:[%s4139_s12 + $0x320] sm:$0xff]  ;;  %v531_v28 = vld [vmem:[%s4139_s12 + $0x328] sm:$0xff] }
 0x1f2   : > { %v1425_v33 = vpop.f32.mrf.mxu2  ;;  %v1025_v34 = vadd.f32 %v4481_v10, %v1024_v31 }
 0x1f3   : > { %1553 = vst [vmem:[#allocation2 + $0xe8] sm:$0xff] %v1228_v32 }
 0x1f4   : > { %v1426_v37 = vadd.f32 %v1425_v33, %v1025_v34  ;;  %v664_v34 = vld [vmem:[%s4139_s12 + $0x750] sm:$0xff] }
 0x1f6   : > { %1619 = vst [vmem:[#allocation2 + $0x2f8] sm:$0xff] %v1426_v37  ;;  %1074 = vmatmul.f32.gmra.mxu3 %v654_v35  ;;  %v829_v38 = vpop.f32.mrf.mxu0  ;;  %v1230_v39 = vpop.f32.mrf.mxu1  ;;  %v665_v35 = vld [vmem:[%s4139_s12 + $0x758] sm:$0xff] }
 0x1f7   : > { %1475 = vmatmul.f32.gmra.mxu2 %v655_v36  ;;  %v830_v43 = vadd.f32 %v4481_v10, %v829_v38 }
 0x1f9   : > { %v1027_v44 = vpop.f32.mrf.mxu3  ;;  %v1231_v45 = vadd.f32 %v1230_v39, %v830_v43  ;;  %876 = vmatmul.f32.gmra.mxu0 %v522_v40  ;;  %1277 = vmatmul.f32.gmra.mxu1 %v523_v41  ;;  %v532_v39 = vld [vmem:[%s4139_s12 + $0x330] sm:$0xff]  ;;  %v533_v40 = vld [vmem:[%s4139_s12 + $0x338] sm:$0xff]  ;;  %v1660_v41 = vld [vmem:[#allocation15] sm:$0xff] }
 0x1fa   : > { %v1428_v46 = vpop.f32.mrf.mxu2  ;;  %v1028_v47 = vadd.f32 %v4481_v10, %v1027_v44  ;;  %1695 = vmatpush.msrb.mxu2 %v1660_v41 }
 0x1fb   : > { %1554 = vst [vmem:[#allocation2 + $0xf0] sm:$0xff] %v1231_v45 }
 0x1fc   : > { %v1429_v50 = vadd.f32 %v1428_v46, %v1028_v47 }
 0x1fe   : > { %1620 = vst [vmem:[#allocation2 + $0x300] sm:$0xff] %v1429_v50  ;;  %1077 = vmatmul.f32.gmra.mxu3 %v656_v48  ;;  %v832_v51 = vpop.f32.mrf.mxu0  ;;  %v1233_v52 = vpop.f32.mrf.mxu1  ;;  %v666_v48 = vld [vmem:[%s4139_s12 + $0x760] sm:$0xff] }
 0x1ff   : > { %1478 = vmatmul.f32.gmra.mxu2 %v657_v49  ;;  %v833_v56 = vadd.f32 %v4481_v10, %v832_v51  ;;  %v667_v49 = vld [vmem:[%s4139_s12 + $0x768] sm:$0xff] }
 0x201   : > { %v1030_v57 = vpop.f32.mrf.mxu3  ;;  %v1234_v58 = vadd.f32 %v1233_v52, %v833_v56  ;;  %879 = vmatmul.f32.gmra.mxu0 %v524_v53  ;;  %1280 = vmatmul.f32.gmra.mxu1 %v525_v54  ;;  %v534_v53 = vld [vmem:[%s4139_s12 + $0x340] sm:$0xff]  ;;  %v535_v54 = vld [vmem:[%s4139_s12 + $0x348] sm:$0xff] }
 0x202   : > { %v1431_v59 = vpop.f32.mrf.mxu2  ;;  %v1031_v60 = vadd.f32 %v4481_v10, %v1030_v57 }
 0x203   : > { %1555 = vst [vmem:[#allocation2 + $0xf8] sm:$0xff] %v1234_v58 }
 0x204   : > { %v1432_v63 = vadd.f32 %v1431_v59, %v1031_v60  ;;  %v668_v60 = vld [vmem:[%s4139_s12 + $0x770] sm:$0xff] }
 0x206   : > { %1621 = vst [vmem:[#allocation2 + $0x308] sm:$0xff] %v1432_v63  ;;  %1080 = vmatmul.f32.gmra.mxu3 %v658_v61  ;;  %v835_v1 = vpop.f32.mrf.mxu0  ;;  %v1236_v2 = vpop.f32.mrf.mxu1  ;;  %v669_v61 = vld [vmem:[%s4139_s12 + $0x778] sm:$0xff] }
 0x207   : > { %1481 = vmatmul.f32.gmra.mxu2 %v659_v62  ;;  %v836_v5 = vadd.f32 %v4481_v10, %v835_v1 }
 0x209   : > { %v1033_v6 = vpop.f32.mrf.mxu3  ;;  %v1237_v7 = vadd.f32 %v1236_v2, %v836_v5  ;;  %882 = vmatmul.f32.gmra.mxu0 %v526_v3  ;;  %1283 = vmatmul.f32.gmra.mxu1 %v527_v4  ;;  %v536_v2 = vld [vmem:[%s4139_s12 + $0x350] sm:$0xff]  ;;  %v537_v3 = vld [vmem:[%s4139_s12 + $0x358] sm:$0xff] }
 0x20a   : > { %v1434_v8 = vpop.f32.mrf.mxu2  ;;  %v1034_v9 = vadd.f32 %v4481_v10, %v1033_v6 }
 0x20b   : > { %1556 = vst [vmem:[#allocation2 + $0x100] sm:$0xff] %v1237_v7 }
 0x20c   : > { %v1435_v13 = vadd.f32 %v1434_v8, %v1034_v9  ;;  %v670_v9 = vld [vmem:[%s4139_s12 + $0x780] sm:$0xff] }
 0x20e   : > { %1622 = vst [vmem:[#allocation2 + $0x310] sm:$0xff] %v1435_v13  ;;  %1083 = vmatmul.f32.gmra.mxu3 %v660_v11  ;;  %v838_v14 = vpop.f32.mrf.mxu0  ;;  %v1239_v42 = vpop.f32.mrf.mxu1  ;;  %v671_v11 = vld [vmem:[%s4139_s12 + $0x788] sm:$0xff] }
 0x20f   : > { %1484 = vmatmul.f32.gmra.mxu2 %v661_v12  ;;  %v839_v17 = vadd.f32 %v4481_v10, %v838_v14 }
 0x211   : > { %v1036_v18 = vpop.f32.mrf.mxu3  ;;  %v1240_v19 = vadd.f32 %v1239_v42, %v839_v17  ;;  %885 = vmatmul.f32.gmra.mxu0 %v528_v15  ;;  %1286 = vmatmul.f32.gmra.mxu1 %v529_v16  ;;  %v538_v42 = vld [vmem:[%s4139_s12 + $0x360] sm:$0xff]  ;;  %v539_v15 = vld [vmem:[%s4139_s12 + $0x368] sm:$0xff] }
 0x212   : > { %v1437_v20 = vpop.f32.mrf.mxu2  ;;  %v1037_v21 = vadd.f32 %v4481_v10, %v1036_v18 }
 0x213   : > { %1557 = vst [vmem:[#allocation2 + $0x108] sm:$0xff] %v1240_v19 }
 0x214   : > { %v1438_v24 = vadd.f32 %v1437_v20, %v1037_v21  ;;  %v672_v21 = vld [vmem:[%s4139_s12 + $0x790] sm:$0xff] }
 0x216   : > { %1623 = vst [vmem:[#allocation2 + $0x318] sm:$0xff] %v1438_v24  ;;  %1086 = vmatmul.f32.gmra.mxu3 %v662_v22  ;;  %v841_v25 = vpop.f32.mrf.mxu0  ;;  %v1242_v26 = vpop.f32.mrf.mxu1  ;;  %v673_v22 = vld [vmem:[%s4139_s12 + $0x798] sm:$0xff] }
 0x217   : > { %1487 = vmatmul.f32.gmra.mxu2 %v663_v23  ;;  %v842_v29 = vadd.f32 %v4481_v10, %v841_v25 }
 0x219   : > { %v1039_v30 = vpop.f32.mrf.mxu3  ;;  %v1243_v31 = vadd.f32 %v1242_v26, %v842_v29  ;;  %888 = vmatmul.f32.gmra.mxu0 %v530_v27  ;;  %1289 = vmatmul.f32.gmra.mxu1 %v531_v28  ;;  %v540_v26 = vld [vmem:[%s4139_s12 + $0x370] sm:$0xff]  ;;  %v541_v27 = vld [vmem:[%s4139_s12 + $0x378] sm:$0xff] }
 0x21a   : > { %v1440_v32 = vpop.f32.mrf.mxu2  ;;  %v1040_v33 = vadd.f32 %v4481_v10, %v1039_v30 }
 0x21b   : > { %1558 = vst [vmem:[#allocation2 + $0x110] sm:$0xff] %v1243_v31 }
 0x21c   : > { %v1441_v36 = vadd.f32 %v1440_v32, %v1040_v33  ;;  %v674_v33 = vld [vmem:[%s4139_s12 + $0x7a0] sm:$0xff] }
 0x21e   : > { %1624 = vst [vmem:[#allocation2 + $0x320] sm:$0xff] %v1441_v36  ;;  %1089 = vmatmul.f32.gmra.mxu3 %v664_v34  ;;  %v844_v37 = vpop.f32.mrf.mxu0  ;;  %v1245_v38 = vpop.f32.mrf.mxu1  ;;  %v675_v34 = vld [vmem:[%s4139_s12 + $0x7a8] sm:$0xff] }
 0x21f   : > { %1490 = vmatmul.f32.gmra.mxu2 %v665_v35  ;;  %v845_v43 = vadd.f32 %v4481_v10, %v844_v37 }
 0x221   : > { %v1042_v44 = vpop.f32.mrf.mxu3  ;;  %v1246_v45 = vadd.f32 %v1245_v38, %v845_v43  ;;  %891 = vmatmul.f32.gmra.mxu0 %v532_v39  ;;  %1292 = vmatmul.f32.gmra.mxu1 %v533_v40  ;;  %v542_v38 = vld [vmem:[%s4139_s12 + $0x380] sm:$0xff]  ;;  %v543_v39 = vld [vmem:[%s4139_s12 + $0x388] sm:$0xff] }
 0x222   : > { %v1443_v46 = vpop.f32.mrf.mxu2  ;;  %v1043_v47 = vadd.f32 %v4481_v10, %v1042_v44 }
 0x223   : > { %1559 = vst [vmem:[#allocation2 + $0x118] sm:$0xff] %v1246_v45 }
 0x224   : > { %v1444_v50 = vadd.f32 %v1443_v46, %v1043_v47  ;;  %v676_v46 = vld [vmem:[%s4139_s12 + $0x7b0] sm:$0xff]  ;;  %v677_v47 = vld [vmem:[%s4139_s12 + $0x7b8] sm:$0xff] }
 0x226   : > { %1625 = vst [vmem:[#allocation2 + $0x328] sm:$0xff] %v1444_v50  ;;  %1092 = vmatmul.f32.gmra.mxu3 %v666_v48  ;;  %v847_v51 = vpop.f32.mrf.mxu0  ;;  %v1248_v52 = vpop.f32.mrf.mxu1 }
 0x227   : > { %1493 = vmatmul.f32.gmra.mxu2 %v667_v49  ;;  %v848_v55 = vadd.f32 %v4481_v10, %v847_v51  ;;  %v544_v51 = vld [vmem:[%s4139_s12 + $0x390] sm:$0xff] }
 0x229   : > { %v1045_v56 = vpop.f32.mrf.mxu3  ;;  %v1249_v57 = vadd.f32 %v1248_v52, %v848_v55  ;;  %894 = vmatmul.f32.gmra.mxu0 %v534_v53  ;;  %1295 = vmatmul.f32.gmra.mxu1 %v535_v54  ;;  %v545_v52 = vld [vmem:[%s4139_s12 + $0x398] sm:$0xff] }
 0x22a   : > { %v1446_v58 = vpop.f32.mrf.mxu2  ;;  %v1046_v59 = vadd.f32 %v4481_v10, %v1045_v56 }
 0x22b   : > { %1560 = vst [vmem:[#allocation2 + $0x120] sm:$0xff] %v1249_v57 }
 0x22c   : > { %v1447_v62 = vadd.f32 %v1446_v58, %v1046_v59  ;;  %v678_v58 = vld [vmem:[%s4139_s12 + $0x7c0] sm:$0xff] }
 0x22d   : > { %v1652_v59 = vld [vmem:[%s4147_s17] sm:$0xff] }
 0x22e   : > { %1626 = vst [vmem:[#allocation2 + $0x330] sm:$0xff] %v1447_v62  ;;  %1095 = vmatmul.f32.gmra.mxu3 %v668_v60  ;;  %v850_v63 = vpop.f32.mrf.mxu0  ;;  %v1251_v1 = vpop.f32.mrf.mxu1 }
 0x22f   : > { %1496 = vmatmul.f32.gmra.mxu2 %v669_v61  ;;  %v851_v4 = vadd.f32 %v4481_v10, %v850_v63  ;;  %v546_v63 = vld [vmem:[%s4139_s12 + $0x3a0] sm:$0xff] }
 0x231   : > { %v1048_v5 = vpop.f32.mrf.mxu3  ;;  %v1252_v6 = vadd.f32 %v1251_v1, %v851_v4  ;;  %897 = vmatmul.f32.gmra.mxu0 %v536_v2  ;;  %1298 = vmatmul.f32.gmra.mxu1 %v537_v3  ;;  %v547_v1 = vld [vmem:[%s4139_s12 + $0x3a8] sm:$0xff] }
 0x232   : > { %v1449_v7 = vpop.f32.mrf.mxu2  ;;  %v1049_v8 = vadd.f32 %v4481_v10, %v1048_v5 }
 0x233   : > { %1561 = vst [vmem:[#allocation2 + $0x128] sm:$0xff] %v1252_v6 }
 0x234   : > { %v1450_v12 = vadd.f32 %v1449_v7, %v1049_v8  ;;  %v680_v7 = vld [vmem:[%s4139_s12 + $0x7d0] sm:$0xff]  ;;  %v1653_v8 = vld [vmem:[%s4147_s17 + $0x8] sm:$0xff] }
 0x236   : > { %1627 = vst [vmem:[#allocation2 + $0x338] sm:$0xff] %v1450_v12  ;;  %1098 = vmatmul.f32.gmra.mxu3 %v670_v9  ;;  %v853_v13 = vpop.f32.mrf.mxu0  ;;  %v1254_v14 = vpop.f32.mrf.mxu1 }
 0x237   : > { %1499 = vmatmul.f32.gmra.mxu2 %v671_v11  ;;  %v854_v16 = vadd.f32 %v4481_v10, %v853_v13  ;;  %v548_v13 = vld [vmem:[%s4139_s12 + $0x3b0] sm:$0xff] }
 0x239   : > { %v1051_v17 = vpop.f32.mrf.mxu3  ;;  %v1255_v18 = vadd.f32 %v1254_v14, %v854_v16  ;;  %900 = vmatmul.f32.gmra.mxu0 %v538_v42  ;;  %1301 = vmatmul.f32.gmra.mxu1 %v539_v15  ;;  %v549_v14 = vld [vmem:[%s4139_s12 + $0x3b8] sm:$0xff] }
 0x23a   : > { %v1452_v19 = vpop.f32.mrf.mxu2  ;;  %v1052_v20 = vadd.f32 %v4481_v10, %v1051_v17 }
 0x23b   : > { %1562 = vst [vmem:[#allocation2 + $0x130] sm:$0xff] %v1255_v18 }
 0x23c   : > { %v1453_v23 = vadd.f32 %v1452_v19, %v1052_v20  ;;  %v682_v19 = vld [vmem:[%s4139_s12 + $0x7e0] sm:$0xff]  ;;  %v1654_v20 = vld [vmem:[%s4147_s17 + $0x10] sm:$0xff] }
 0x23e   : > { %1628 = vst [vmem:[#allocation2 + $0x340] sm:$0xff] %v1453_v23  ;;  %1101 = vmatmul.f32.gmra.mxu3 %v672_v21  ;;  %v856_v24 = vpop.f32.mrf.mxu0  ;;  %v1257_v25 = vpop.f32.mrf.mxu1 }
 0x23f   : > { %1502 = vmatmul.f32.gmra.mxu2 %v673_v22  ;;  %v857_v28 = vadd.f32 %v4481_v10, %v856_v24  ;;  %v550_v24 = vld [vmem:[%s4139_s12 + $0x3c0] sm:$0xff] }
 0x241   : > { %v1054_v29 = vpop.f32.mrf.mxu3  ;;  %v1258_v30 = vadd.f32 %v1257_v25, %v857_v28  ;;  %903 = vmatmul.f32.gmra.mxu0 %v540_v26  ;;  %1304 = vmatmul.f32.gmra.mxu1 %v541_v27  ;;  %v551_v25 = vld [vmem:[%s4139_s12 + $0x3c8] sm:$0xff] }
 0x242   : > { %v1455_v31 = vpop.f32.mrf.mxu2  ;;  %v1055_v32 = vadd.f32 %v4481_v10, %v1054_v29 }
 0x243   : > { %1563 = vst [vmem:[#allocation2 + $0x138] sm:$0xff] %v1258_v30 }
 0x244   : > { %v1456_v35 = vadd.f32 %v1455_v31, %v1055_v32  ;;  %v684_v31 = vld [vmem:[%s4139_s12 + $0x7f0] sm:$0xff]  ;;  %v1655_v32 = vld [vmem:[%s4147_s17 + $0x18] sm:$0xff] }
 0x246   : > { %1629 = vst [vmem:[#allocation2 + $0x348] sm:$0xff] %v1456_v35  ;;  %1104 = vmatmul.f32.gmra.mxu3 %v674_v33  ;;  %v859_v36 = vpop.f32.mrf.mxu0  ;;  %v1260_v37 = vpop.f32.mrf.mxu1 }
 0x247   : > { %1505 = vmatmul.f32.gmra.mxu2 %v675_v34  ;;  %v860_v40 = vadd.f32 %v4481_v10, %v859_v36  ;;  %v552_v36 = vld [vmem:[%s4139_s12 + $0x3d0] sm:$0xff] }
 0x249   : > { %v1057_v41 = vpop.f32.mrf.mxu3  ;;  %v1261_v43 = vadd.f32 %v1260_v37, %v860_v40  ;;  %906 = vmatmul.f32.gmra.mxu0 %v542_v38  ;;  %1307 = vmatmul.f32.gmra.mxu1 %v543_v39  ;;  %v553_v37 = vld [vmem:[%s4139_s12 + $0x3d8] sm:$0xff] }
 0x24a   : > { %v1458_v44 = vpop.f32.mrf.mxu2  ;;  %v1058_v45 = vadd.f32 %v4481_v10, %v1057_v41 }
 0x24b   : > { %1564 = vst [vmem:[#allocation2 + $0x140] sm:$0xff] %v1261_v43 }
 0x24c   : > { %v1459_v48 = vadd.f32 %v1458_v44, %v1058_v45  ;;  %v679_v44 = vld [vmem:[%s4139_s12 + $0x7c8] sm:$0xff]  ;;  %v1656_v45 = vld [vmem:[%s4147_s17 + $0x20] sm:$0xff] }
 0x24e   : > { %1630 = vst [vmem:[#allocation2 + $0x350] sm:$0xff] %v1459_v48  ;;  %1107 = vmatmul.f32.gmra.mxu3 %v676_v46  ;;  %v862_v49 = vpop.f32.mrf.mxu0  ;;  %v1263_v50 = vpop.f32.mrf.mxu1 }
 0x24f   : > { %1508 = vmatmul.f32.gmra.mxu2 %v677_v47  ;;  %v863_v53 = vadd.f32 %v4481_v10, %v862_v49  ;;  %v554_v49 = vld [vmem:[%s4139_s12 + $0x3e0] sm:$0xff] }
 0x251   : > { %v1060_v54 = vpop.f32.mrf.mxu3  ;;  %v1264_v55 = vadd.f32 %v1263_v50, %v863_v53  ;;  %909 = vmatmul.f32.gmra.mxu0 %v544_v51  ;;  %1310 = vmatmul.f32.gmra.mxu1 %v545_v52  ;;  %v555_v50 = vld [vmem:[%s4139_s12 + $0x3e8] sm:$0xff] }
 0x252   : > { %v1461_v56 = vpop.f32.mrf.mxu2  ;;  %v1061_v57 = vadd.f32 %v4481_v10, %v1060_v54 }
 0x253   : > { %1565 = vst [vmem:[#allocation2 + $0x148] sm:$0xff] %v1264_v55 }
 0x254   : > { %v1462_v60 = vadd.f32 %v1461_v56, %v1061_v57  ;;  %v681_v56 = vld [vmem:[%s4139_s12 + $0x7d8] sm:$0xff]  ;;  %v1657_v57 = vld [vmem:[%s4147_s17 + $0x28] sm:$0xff] }
 0x256   : > { %1631 = vst [vmem:[#allocation2 + $0x358] sm:$0xff] %v1462_v60  ;;  %1110 = vmatmul.f32.gmra.mxu3 %v678_v58  ;;  %v865_v61 = vpop.f32.mrf.mxu0  ;;  %v1266_v62 = vpop.f32.mrf.mxu1 }
 0x257   : > { %1696 = vmatmul.f32.vlgmr.msrb.gmra.mxu2 %v1652_v59  ;;  %v866_v2 = vadd.f32 %v4481_v10, %v865_v61  ;;  %v556_v61 = vld [vmem:[%s4139_s12 + $0x3f0] sm:$0xff] }
 0x259   : > { %v1063_v3 = vpop.f32.mrf.mxu3  ;;  %v1267_v4 = vadd.f32 %v1266_v62, %v866_v2  ;;  %912 = vmatmul.f32.gmra.mxu0 %v546_v63  ;;  %1313 = vmatmul.f32.gmra.mxu1 %v547_v1  ;;  %v557_v62 = vld [vmem:[%s4139_s12 + $0x3f8] sm:$0xff] }
 0x25a   : > { %v1464_v5 = vpop.f32.mrf.mxu2  ;;  %v1064_v6 = vadd.f32 %v4481_v10, %v1063_v3 }
 0x25b   : > { %1566 = vst [vmem:[#allocation2 + $0x150] sm:$0xff] %v1267_v4 }
 0x25c   : > { %v1465_v9 = vadd.f32 %v1464_v5, %v1064_v6  ;;  %v683_v5 = vld [vmem:[%s4139_s12 + $0x7e8] sm:$0xff]  ;;  %v1658_v6 = vld [vmem:[%s4147_s17 + $0x30] sm:$0xff] }
 0x25e   : > { %1632 = vst [vmem:[#allocation2 + $0x360] sm:$0xff] %v1465_v9  ;;  %1113 = vmatmul.f32.gmra.mxu3 %v680_v7  ;;  %v868_v11 = vpop.f32.mrf.mxu0  ;;  %v1269_v12 = vpop.f32.mrf.mxu1 }
 0x25f   : > { %1699 = vmatmul.f32.gmra.mxu2 %v1653_v8  ;;  %v869_v42 = vadd.f32 %v4481_v10, %v868_v11  ;;  %v558_v11 = vld [vmem:[%s4139_s12 + $0x400] sm:$0xff] }
 0x261   : > { %v1066_v15 = vpop.f32.mrf.mxu3  ;;  %v1270_v16 = vadd.f32 %v1269_v12, %v869_v42  ;;  %915 = vmatmul.f32.gmra.mxu0 %v548_v13  ;;  %1316 = vmatmul.f32.gmra.mxu1 %v549_v14  ;;  %v559_v12 = vld [vmem:[%s4139_s12 + $0x408] sm:$0xff] }
 0x262   : > { %v1467_v17 = vpop.f32.mrf.mxu2  ;;  %v1067_v18 = vadd.f32 %v4481_v10, %v1066_v15 }
 0x263   : > { %1567 = vst [vmem:[#allocation2 + $0x158] sm:$0xff] %v1270_v16 }
 0x264   : > { %v1468_v21 = vadd.f32 %v1467_v17, %v1067_v18  ;;  %v685_v17 = vld [vmem:[%s4139_s12 + $0x7f8] sm:$0xff] }
 0x265   : > { %v1659_v18 = vld [vmem:[%s4147_s17 + $0x38] sm:$0xff] }
 0x266   : > { %1633 = vst [vmem:[#allocation2 + $0x368] sm:$0xff] %v1468_v21  ;;  %1116 = vmatmul.f32.gmra.mxu3 %v682_v19  ;;  %v871_v22 = vpop.f32.mrf.mxu0  ;;  %v1272_v23 = vpop.f32.mrf.mxu1 }
 0x267   : > { %1702 = vmatmul.f32.gmra.mxu2 %v1654_v20  ;;  %v872_v26 = vadd.f32 %v4481_v10, %v871_v22  ;;  %v560_v22 = vld [vmem:[%s4139_s12 + $0x410] sm:$0xff] }
 0x269   : > { %v1069_v27 = vpop.f32.mrf.mxu3  ;;  %v1273_v28 = vadd.f32 %v1272_v23, %v872_v26  ;;  %918 = vmatmul.f32.gmra.mxu0 %v550_v24  ;;  %1319 = vmatmul.f32.gmra.mxu1 %v551_v25  ;;  %v561_v23 = vld [vmem:[%s4139_s12 + $0x418] sm:$0xff] }
 0x26a   : > { %v1470_v29 = vpop.f32.mrf.mxu2  ;;  %v1070_v30 = vadd.f32 %v4481_v10, %v1069_v27 }
 0x26b   : > { %1568 = vst [vmem:[#allocation2 + $0x160] sm:$0xff] %v1273_v28 }
 0x26c   : > { %v1471_v33 = vadd.f32 %v1470_v29, %v1070_v30 }
 0x26e   : > { %1634 = vst [vmem:[#allocation2 + $0x370] sm:$0xff] %v1471_v33  ;;  %1119 = vmatmul.f32.gmra.mxu3 %v684_v31  ;;  %v874_v34 = vpop.f32.mrf.mxu0  ;;  %v1275_v35 = vpop.f32.mrf.mxu1 }
 0x26f   : > { %1705 = vmatmul.f32.gmra.mxu2 %v1655_v32  ;;  %v875_v38 = vadd.f32 %v4481_v10, %v874_v34 }
 0x271   : > { %v1072_v39 = vpop.f32.mrf.mxu3  ;;  %v1276_v40 = vadd.f32 %v1275_v35, %v875_v38  ;;  %921 = vmatmul.f32.gmra.mxu0 %v552_v36  ;;  %1322 = vmatmul.f32.gmra.mxu1 %v553_v37 }
 0x272   : > { %v1473_v41 = vpop.f32.mrf.mxu2  ;;  %v1073_v43 = vadd.f32 %v4481_v10, %v1072_v39 }
 0x273   : > { %1569 = vst [vmem:[#allocation2 + $0x168] sm:$0xff] %v1276_v40 }
 0x274   : > { %v1474_v46 = vadd.f32 %v1473_v41, %v1073_v43 }
 0x276   : > { %1635 = vst [vmem:[#allocation2 + $0x378] sm:$0xff] %v1474_v46  ;;  %1511 = vmatmul.f32.vlgmr.msrb.gmra.mxu3 %v679_v44  ;;  %v877_v47 = vpop.f32.mrf.mxu0  ;;  %v1278_v48 = vpop.f32.mrf.mxu1 }
 0x277   : > { %1708 = vmatmul.f32.gmra.mxu2 %v1656_v45  ;;  %v878_v51 = vadd.f32 %v4481_v10, %v877_v47 }
 0x279   : > { %v1075_v52 = vpop.f32.mrf.mxu3  ;;  %v1279_v53 = vadd.f32 %v1278_v48, %v878_v51  ;;  %924 = vmatmul.f32.gmra.mxu0 %v554_v49  ;;  %1325 = vmatmul.f32.gmra.mxu1 %v555_v50 }
 0x27a   : > { %v1476_v54 = vpop.f32.mrf.mxu2  ;;  %v1076_v55 = vadd.f32 %v4481_v10, %v1075_v52 }
 0x27b   : > { %1570 = vst [vmem:[#allocation2 + $0x170] sm:$0xff] %v1279_v53 }
 0x27c   : > { %v1477_v58 = vadd.f32 %v1476_v54, %v1076_v55 }
 0x27e   : > { %1636 = vst [vmem:[#allocation2 + $0x380] sm:$0xff] %v1477_v58  ;;  %1514 = vmatmul.f32.gmra.mxu3 %v681_v56  ;;  %v880_v59 = vpop.f32.mrf.mxu0  ;;  %v1281_v60 = vpop.f32.mrf.mxu1 }
 0x27f   : > { %1711 = vmatmul.f32.gmra.mxu2 %v1657_v57  ;;  %v881_v63 = vadd.f32 %v4481_v10, %v880_v59 }
 0x281   : > { %v1078_v1 = vpop.f32.mrf.mxu3  ;;  %v1282_v2 = vadd.f32 %v1281_v60, %v881_v63  ;;  %927 = vmatmul.f32.gmra.mxu0 %v556_v61  ;;  %1328 = vmatmul.f32.gmra.mxu1 %v557_v62 }
 0x282   : > { %v1479_v3 = vpop.f32.mrf.mxu2  ;;  %v1079_v4 = vadd.f32 %v4481_v10, %v1078_v1 }
 0x283   : > { %1571 = vst [vmem:[#allocation2 + $0x178] sm:$0xff] %v1282_v2 }
 0x284   : > { %v1480_v7 = vadd.f32 %v1479_v3, %v1079_v4 }
 0x286   : > { %1637 = vst [vmem:[#allocation2 + $0x388] sm:$0xff] %v1480_v7  ;;  %1517 = vmatmul.f32.gmra.mxu3 %v683_v5  ;;  %v883_v8 = vpop.f32.mrf.mxu0  ;;  %v1284_v9 = vpop.f32.mrf.mxu1 }
 0x287   : > { %1714 = vmatmul.f32.gmra.mxu2 %v1658_v6  ;;  %v884_v13 = vadd.f32 %v4481_v10, %v883_v8 }
 0x289   : > { %v1081_v14 = vpop.f32.mrf.mxu3  ;;  %v1285_v42 = vadd.f32 %v1284_v9, %v884_v13  ;;  %930 = vmatmul.f32.gmra.mxu0 %v558_v11  ;;  %1331 = vmatmul.f32.gmra.mxu1 %v559_v12 }
 0x28a   : > { %v1482_v15 = vpop.f32.mrf.mxu2  ;;  %v1082_v16 = vadd.f32 %v4481_v10, %v1081_v14 }
 0x28b   : > { %1572 = vst [vmem:[#allocation2 + $0x180] sm:$0xff] %v1285_v42 }
 0x28c   : > { %v1483_v19 = vadd.f32 %v1482_v15, %v1082_v16 }
 0x28e   : > { %1638 = vst [vmem:[#allocation2 + $0x390] sm:$0xff] %v1483_v19  ;;  %1520 = vmatmul.f32.gmra.mxu3 %v685_v17  ;;  %v886_v20 = vpop.f32.mrf.mxu0  ;;  %v1287_v21 = vpop.f32.mrf.mxu1 }
 0x28f   : > { %1717 = vmatmul.f32.gmra.mxu2 %v1659_v18  ;;  %v887_v24 = vadd.f32 %v4481_v10, %v886_v20 }
 0x291   : > { %v1084_v25 = vpop.f32.mrf.mxu3  ;;  %v1288_v26 = vadd.f32 %v1287_v21, %v887_v24  ;;  %933 = vmatmul.f32.gmra.mxu0 %v560_v22  ;;  %1334 = vmatmul.f32.gmra.mxu1 %v561_v23 }
 0x292   : > { %v1485_v27 = vpop.f32.mrf.mxu2  ;;  %v1085_v28 = vadd.f32 %v4481_v10, %v1084_v25 }
 0x293   : > { %1573 = vst [vmem:[#allocation2 + $0x188] sm:$0xff] %v1288_v26 }
 0x294   : > { %v1486_v29 = vadd.f32 %v1485_v27, %v1085_v28 }
 0x296   : > { %1639 = vst [vmem:[#allocation2 + $0x398] sm:$0xff] %v1486_v29  ;;  %v889_v30 = vpop.f32.mrf.mxu0  ;;  %v1290_v31 = vpop.f32.mrf.mxu1 }
 0x297   : > { %v890_v32 = vadd.f32 %v4481_v10, %v889_v30 }
 0x299   : > { %v1087_v33 = vpop.f32.mrf.mxu3  ;;  %v1291_v34 = vadd.f32 %v1290_v31, %v890_v32 }
 0x29a   : > { %v1488_v35 = vpop.f32.mrf.mxu2  ;;  %v1088_v36 = vadd.f32 %v4481_v10, %v1087_v33 }
 0x29b   : > { %1574 = vst [vmem:[#allocation2 + $0x190] sm:$0xff] %v1291_v34  ;;  %v4632_v34 = vld [vmem:[#allocation16] ss:$0 sm:$0xff] }
 0x29c   : > { %v1489_v37 = vadd.f32 %v1488_v35, %v1088_v36 }
 0x29e   : > { %1640 = vst [vmem:[#allocation2 + $0x3a0] sm:$0xff] %v1489_v37  ;;  %v892_v38 = vpop.f32.mrf.mxu0  ;;  %v1293_v39 = vpop.f32.mrf.mxu1 }
 0x29f   : > { %v893_v40 = vadd.f32 %v4481_v10, %v892_v38 }
 0x2a1   : > { %v1090_v41 = vpop.f32.mrf.mxu3  ;;  %v1294_v43 = vadd.f32 %v1293_v39, %v893_v40 }
 0x2a2   : > { %v1491_v44 = vpop.f32.mrf.mxu2  ;;  %v1091_v45 = vadd.f32 %v4481_v10, %v1090_v41 }
 0x2a3   : > { %1575 = vst [vmem:[#allocation2 + $0x198] sm:$0xff] %v1294_v43 }
 0x2a4   : > { %v1492_v46 = vadd.f32 %v1491_v44, %v1091_v45 }
 0x2a6   : > { %1641 = vst [vmem:[#allocation2 + $0x3a8] sm:$0xff] %v1492_v46  ;;  %v895_v47 = vpop.f32.mrf.mxu0  ;;  %v1296_v48 = vpop.f32.mrf.mxu1 }
 0x2a7   : > { %v896_v49 = vadd.f32 %v4481_v10, %v895_v47 }
 0x2a9   : > { %v1093_v50 = vpop.f32.mrf.mxu3  ;;  %v1297_v51 = vadd.f32 %v1296_v48, %v896_v49 }
 0x2aa   : > { %v1494_v52 = vpop.f32.mrf.mxu2  ;;  %v1094_v53 = vadd.f32 %v4481_v10, %v1093_v50 }
 0x2ab   : > { %1576 = vst [vmem:[#allocation2 + $0x1a0] sm:$0xff] %v1297_v51 }
 0x2ac   : > { %v1495_v54 = vadd.f32 %v1494_v52, %v1094_v53 }
 0x2ae   : > { %1642 = vst [vmem:[#allocation2 + $0x3b0] sm:$0xff] %v1495_v54  ;;  %v898_v55 = vpop.f32.mrf.mxu0  ;;  %v1299_v56 = vpop.f32.mrf.mxu1 }
 0x2af   : > { %v899_v57 = vadd.f32 %v4481_v10, %v898_v55 }
 0x2b1   : > { %v1096_v58 = vpop.f32.mrf.mxu3  ;;  %v1300_v59 = vadd.f32 %v1299_v56, %v899_v57  ;;  %v3331_v57 = vld [vmem:[#allocation13] ss:$0 sm:$0xff] }
 0x2b2   : > { %v1497_v60 = vpop.f32.mrf.mxu2  ;;  %v1097_v61 = vadd.f32 %v4481_v10, %v1096_v58 }
 0x2b3   : > { %1577 = vst [vmem:[#allocation2 + $0x1a8] sm:$0xff] %v1300_v59 }
 0x2b4   : > { %v1498_v62 = vadd.f32 %v1497_v60, %v1097_v61 }
 0x2b6   : > { %1643 = vst [vmem:[#allocation2 + $0x3b8] sm:$0xff] %v1498_v62  ;;  %v901_v63 = vpop.f32.mrf.mxu0  ;;  %v1302_v1 = vpop.f32.mrf.mxu1 }
 0x2b7   : > { %v902_v2 = vadd.f32 %v4481_v10, %v901_v63  ;;  %v1730_v63 = vlaneseq }
 0x2b9   : > { %v1099_v3 = vpop.f32.mrf.mxu3  ;;  %v1303_v4 = vadd.f32 %v1302_v1, %v902_v2 }
 0x2ba   : > { %v1500_v5 = vpop.f32.mrf.mxu2  ;;  %v1100_v6 = vadd.f32 %v4481_v10, %v1099_v3 }
 0x2bb   : > { %1578 = vst [vmem:[#allocation2 + $0x1b0] sm:$0xff] %v1303_v4 }
 0x2bc   : > { %v1501_v7 = vadd.f32 %v1500_v5, %v1100_v6 }
 0x2be   : > { %1644 = vst [vmem:[#allocation2 + $0x3c0] sm:$0xff] %v1501_v7  ;;  %v904_v8 = vpop.f32.mrf.mxu0  ;;  %v1305_v9 = vpop.f32.mrf.mxu1 }
 0x2bf   : > { %v905_v11 = vadd.f32 %v4481_v10, %v904_v8 }
 0x2c1   : > { %v1102_v12 = vpop.f32.mrf.mxu3  ;;  %v1306_v13 = vadd.f32 %v1305_v9, %v905_v11 }
 0x2c2   : > { %v1503_v14 = vpop.f32.mrf.mxu2  ;;  %v1103_v42 = vadd.f32 %v4481_v10, %v1102_v12 }
 0x2c3   : > { %1579 = vst [vmem:[#allocation2 + $0x1b8] sm:$0xff] %v1306_v13 }
 0x2c4   : > { %v1504_v15 = vadd.f32 %v1503_v14, %v1103_v42 }
 0x2c6   : > { %1645 = vst [vmem:[#allocation2 + $0x3c8] sm:$0xff] %v1504_v15  ;;  %v907_v16 = vpop.f32.mrf.mxu0  ;;  %v1308_v17 = vpop.f32.mrf.mxu1 }
 0x2c7   : > { %v908_v18 = vadd.f32 %v4481_v10, %v907_v16 }
 0x2c9   : > { %v1105_v19 = vpop.f32.mrf.mxu3  ;;  %v1309_v20 = vadd.f32 %v1308_v17, %v908_v18 }
 0x2ca   : > { %v1506_v21 = vpop.f32.mrf.mxu2  ;;  %v1106_v22 = vadd.f32 %v4481_v10, %v1105_v19 }
 0x2cb   : > { %1580 = vst [vmem:[#allocation2 + $0x1c0] sm:$0xff] %v1309_v20 }
 0x2cc   : > { %v1507_v23 = vadd.f32 %v1506_v21, %v1106_v22 }
 0x2ce   : > { %1646 = vst [vmem:[#allocation2 + $0x3d0] sm:$0xff] %v1507_v23  ;;  %v910_v24 = vpop.f32.mrf.mxu0  ;;  %v1311_v25 = vpop.f32.mrf.mxu1 }
 0x2cf   : > { %v911_v26 = vadd.f32 %v4481_v10, %v910_v24 }
 0x2d1   : > { %v1108_v27 = vpop.f32.mrf.mxu3  ;;  %v1312_v28 = vadd.f32 %v1311_v25, %v911_v26 }
 0x2d2   : > { %v1509_v29 = vpop.f32.mrf.mxu2  ;;  %v1109_v30 = vadd.f32 %v4481_v10, %v1108_v27 }
 0x2d3   : > { %1581 = vst [vmem:[#allocation2 + $0x1c8] sm:$0xff] %v1312_v28 }
 0x2d4   : > { %v1510_v31 = vadd.f32 %v1509_v29, %v1109_v30 }
 0x2d6   : > { %1647 = vst [vmem:[#allocation2 + $0x3d8] sm:$0xff] %v1510_v31  ;;  %v913_v32 = vpop.f32.mrf.mxu0  ;;  %v1314_v33 = vpop.f32.mrf.mxu1 }
 0x2d7   : > { %v914_v35 = vadd.f32 %v4481_v10, %v913_v32 }
 0x2d9   : > { %v1111_v36 = vpop.f32.mrf.mxu3  ;;  %v1315_v37 = vadd.f32 %v1314_v33, %v914_v35 }
 0x2da   : > { %v1697_v38 = vpop.f32.mrf.mxu2  ;;  %v1112_v4 = vadd.f32 %v3331_v57, %v1111_v36 }
 0x2db   : > { %v1698_v39 = vadd.f32 %v4632_v34, %v1697_v38  ;;  %1582 = vst [vmem:[#allocation2 + $0x1d0] sm:$0xff] %v1315_v37 }
 0x2dd   : > { %1721 = vst [vmem:[#allocation3] sm:$0xff] %v1698_v39 }
 0x2de   : > { %v916_v40 = vpop.f32.mrf.mxu0  ;;  %v1317_v41 = vpop.f32.mrf.mxu1 }
 0x2df   : > { %v917_v43 = vadd.f32 %v4481_v10, %v916_v40 }
 0x2e1   : > { %v1114_v44 = vpop.f32.mrf.mxu3  ;;  %v1318_v45 = vadd.f32 %v1317_v41, %v917_v43 }
 0x2e2   : > { %v1700_v46 = vpop.f32.mrf.mxu2  ;;  %v1115_v14 = vadd.f32 %v3331_v57, %v1114_v44 }
 0x2e3   : > { %v1701_v47 = vadd.f32 %v4632_v34, %v1700_v46  ;;  %1583 = vst [vmem:[#allocation2 + $0x1d8] sm:$0xff] %v1318_v45 }
 0x2e5   : > { %1722 = vst [vmem:[#allocation3 + $0x8] sm:$0xff] %v1701_v47 }
 0x2e6   : > { %v919_v48 = vpop.f32.mrf.mxu0  ;;  %v1320_v49 = vpop.f32.mrf.mxu1 }
 0x2e7   : > { %v920_v50 = vadd.f32 %v4481_v10, %v919_v48  ;;  %v4641_v10 = vand.u32 127, %v1730_v63 }
 0x2e9   : > { %v1117_v51 = vpop.f32.mrf.mxu3  ;;  %v1321_v52 = vadd.f32 %v1320_v49, %v920_v50 }
 0x2ea   : > { %v1703_v53 = vpop.f32.mrf.mxu2  ;;  %v1118_v22 = vadd.f32 %v3331_v57, %v1117_v51 }
 0x2eb   : > { %v1704_v54 = vadd.f32 %v4632_v34, %v1703_v53  ;;  %1584 = vst [vmem:[#allocation2 + $0x1e0] sm:$0xff] %v1321_v52 }
 0x2ed   : > { %1723 = vst [vmem:[#allocation3 + $0x10] sm:$0xff] %v1704_v54 }
 0x2ee   : > { %v922_v55 = vpop.f32.mrf.mxu0  ;;  %v1323_v56 = vpop.f32.mrf.mxu1 }
 0x2ef   : > { %v923_v58 = vadd.f32 %v3331_v57, %v922_v55 }
 0x2f1   : > { %v1120_v59 = vpop.f32.mrf.mxu3  ;;  %v1324_v60 = vadd.f32 %v1323_v56, %v923_v58 }
 0x2f2   : > { %v1706_v61 = vpop.f32.mrf.mxu2  ;;  %v1121_v31 = vadd.f32 %v3331_v57, %v1120_v59 }
 0x2f3   : > { %v1707_v62 = vadd.f32 %v4632_v34, %v1706_v61  ;;  %1585 = vst [vmem:[#allocation2 + $0x1e8] sm:$0xff] %v1324_v60 }
 0x2f5   : > { %1724 = vst [vmem:[#allocation3 + $0x18] sm:$0xff] %v1707_v62 }
 0x2f6   : > { %v925_v1 = vpop.f32.mrf.mxu0  ;;  %v1326_v2 = vpop.f32.mrf.mxu1 }
 0x2f7   : > { %v926_v3 = vadd.f32 %v3331_v57, %v925_v1 }
 0x2f9   : > { %v1327_v5 = vadd.f32 %v1326_v2, %v926_v3  ;;  %v1512_v6 = vpop.f32.mrf.mxu3 }
 0x2fa   : > { %v1709_v7 = vpop.f32.mrf.mxu2  ;;  %v1513_v8 = vadd.f32 %v1512_v6, %v1112_v4 }
 0x2fb   : > { %v1710_v9 = vadd.f32 %v4632_v34, %v1709_v7  ;;  %1586 = vst [vmem:[#allocation2 + $0x1f0] sm:$0xff] %v1327_v5 }
 0x2fc   : > { %1648 = vst [vmem:[#allocation2 + $0x3e0] sm:$0xff] %v1513_v8 }
 0x2fd   : > { %1725 = vst [vmem:[#allocation3 + $0x20] sm:$0xff] %v1710_v9 }
 0x2fe   : > { %v928_v11 = vpop.f32.mrf.mxu0  ;;  %v1329_v12 = vpop.f32.mrf.mxu1 }
 0x2ff   : > { %v929_v13 = vadd.f32 %v3331_v57, %v928_v11 }
 0x301   : > { %v1330_v42 = vadd.f32 %v1329_v12, %v929_v13  ;;  %v1515_v15 = vpop.f32.mrf.mxu3 }
 0x302   : > { %v1712_v16 = vpop.f32.mrf.mxu2  ;;  %v1516_v17 = vadd.f32 %v1515_v15, %v1115_v14 }
 0x303   : > { %v1713_v18 = vadd.f32 %v4632_v34, %v1712_v16  ;;  %1587 = vst [vmem:[#allocation2 + $0x1f8] sm:$0xff] %v1330_v42 }
 0x304   : > { %1649 = vst [vmem:[#allocation2 + $0x3e8] sm:$0xff] %v1516_v17 }
 0x305   : > { %1726 = vst [vmem:[#allocation3 + $0x28] sm:$0xff] %v1713_v18 }
 0x306   : > { %v931_v19 = vpop.f32.mrf.mxu0  ;;  %v1332_v20 = vpop.f32.mrf.mxu1 }
 0x307   : > { %v932_v21 = vadd.f32 %v3331_v57, %v931_v19 }
 0x309   : > { %v1333_v23 = vadd.f32 %v1332_v20, %v932_v21  ;;  %v1518_v24 = vpop.f32.mrf.mxu3 }
 0x30a   : > { %v1715_v25 = vpop.f32.mrf.mxu2  ;;  %v1519_v26 = vadd.f32 %v1518_v24, %v1118_v22 }
 0x30b   : > { %v1716_v27 = vadd.f32 %v4632_v34, %v1715_v25  ;;  %1588 = vst [vmem:[#allocation2 + $0x200] sm:$0xff] %v1333_v23 }
 0x30c   : > { %1650 = vst [vmem:[#allocation2 + $0x3f0] sm:$0xff] %v1519_v26 }
 0x30d   : > { %1727 = vst [vmem:[#allocation3 + $0x30] sm:$0xff] %v1716_v27 }
 0x30e   : > { %v934_v28 = vpop.f32.mrf.mxu0  ;;  %v1335_v29 = vpop.f32.mrf.mxu1 }
 0x30f   : > { %v935_v30 = vadd.f32 %v3331_v57, %v934_v28 }
 0x311   : > { %v1336_v32 = vadd.f32 %v1335_v29, %v935_v30  ;;  %v1521_v33 = vpop.f32.mrf.mxu3 }
 0x312   : > { %v1718_v35 = vpop.f32.mrf.mxu2  ;;  %v1522_v36 = vadd.f32 %v1521_v33, %v1121_v31 }
 0x313   : > { %v1719_v37 = vadd.f32 %v4632_v34, %v1718_v35  ;;  %1589 = vst [vmem:[#allocation2 + $0x208] sm:$0xff] %v1336_v32 }
 0x314   : > { %1651 = vst [vmem:[#allocation2 + $0x3f8] sm:$0xff] %v1522_v36 }
 0x315   : > { %1728 = vst [vmem:[#allocation3 + $0x38] sm:$0xff] %v1719_v37 }
 0x316 LB: >> { %s3143_s5 = sshll.u32 %s3917_s4, 3  ;;  %s3144_s21 = sshll.u32 %s3917_s4, 7  ;;  %v4694_v51 = vperm.slane %v4166_v0, 0  ;;  %vm2558_vm0 = vcmask 130112   ;;  %vm2562_vm1 = vcmask 195712   ;;  %vm2566_vm2 = vcmask 261312   ;;  %s3917_s4 = sphi %s4651_s4, %s1737_s4  }
 0x317   : >> { %s1739_s24 = scalar_lea.vmem [#allocation3], %s3143_s5  ;;  %s4660_s3 = scalar_lea.vmem [#allocation2], %s3144_s21  ;;  %vm2570_vm3 = vcmask 326912   ;;  %vm2574_vm4 = vcmask 392512   ;;  %vm2578_vm5 = vcmask 458112   ;;  %vm2582_vm6 = vcmask 523712  }
 0x318   : >> { %vm2586_vm7 = vcmask 589312   ;;  %vm2590_vm8 = vcmask 654912   ;;  %vm2594_vm9 = vcmask 720512   ;;  %vm2598_vm10 = vcmask 786112   ;;  %s3145_s28 = sshll.u32 %s4003_s15, 3  ;;  %s3159_s7 = sshll.u32 %s3917_s4, 8 }
 0x319   : >> { %vm2602_vm11 = vcmask 851712   ;;  %vm2606_vm12 = vcmask 917312   ;;  %vm2610_vm13 = vcmask 982912   ;;  %vm2614_vm14 = vcmask 1048512   ;;  %s2850_s14 = sadd.s32 %s3917_s4, %s3145_s28  ;;  %s5474_s6 = scalar_lea.vmem %s4139_s12, %s3159_s7 [#allocation7] }
 0x31a   : >> { %vm2833_vm15 = vcmask 1041409   ;;  %s2851_s30 = sld [smem:[#allocation6 + %s2850_s14]]  ;;  %s3160_s29 = sshll.u32 %s3917_s4, 4 }
 0x31b   : >> { %v4663_v34 = vld [vmem:[%s4660_s3 + $0x20] sm:$0xff]  ;;  %v4669_v40 = vld [vmem:[%s4660_s3 + $0x10] sm:$0xff]  ;;  %v4675_v43 = vld [vmem:[%s4660_s3 + $0x28] sm:$0xff]  ;;  %s2943_s25 = scalar_lea.vmem %s4649_s23, %s3160_s29 [#allocation19]  ;;  %s1737_s4 = sadd.s32 1, %s3917_s4  }
 0x31c   : >> { %v4658_v38 = vld [vmem:[%s1739_s24] sm:$0xff]  ;;  %v4680_v45 = vld [vmem:[%s4660_s3 + $0x18] sm:$0xff]  ;;  %v4689_v49 = vld [vmem:[%s4660_s3 + $0x8] sm:$0xff]  ;;  %p1734_p1 = scmp.ge.s32.totalorder %s1737_s4, 8  }
 0x31d   : >> { %v4666_v39 = vperm.slane %v4658_v38, 0  ;;  %v4672_v41 = vld [vmem:[%s4660_s3] sm:$0xff]  ;;  %v4703_v56 = vld [vmem:[%s4660_s3 + $0x38] sm:$0xff]  ;;  %v4708_v59 = vld [vmem:[%s4660_s3 + $0x30] sm:$0xff]  ;;  %v1761_v21 = vrot.slane %v4658_v38, 1  ;;  %s3162_s1 = sshll.u32 (%p1734_p1), %s4003_s15, 7 }
 0x31e   : >> { %v4699_v53 = vld [vmem:[%s4660_s3 + $0x40] sm:$0xff]  ;;  %v4718_v6 = vld [vmem:[%s4660_s3 + $0x58] sm:$0xff]  ;;  %v4722_v8 = vld [vmem:[%s4660_s3 + $0x50] sm:$0xff]  ;;  %s2959_s20 = scalar_lea.hbm (%p1734_p1), %s5557_s8, %s3162_s1  ;;  %s2960_s17 = sshll.u32 (%p1734_p1), %s4649_s23, 4  ;;  %s2961_s17 = int_to_ptr.vmem [resolvable:$true] %s2960_s17 }
 0x31f   : >> { %v1788_v44 = vadd.f32 %v4666_v39, %v4663_v34  ;;  %v1786_v46 = vadd.f32 %v4666_v39, %v4669_v40  ;;  %v1784_v47 = vadd.f32 %v4666_v39, %v4672_v41  ;;  %v1789_v48 = vadd.f32 %v4666_v39, %v4675_v43  ;;  %v4728_v12 = vld [vmem:[%s4660_s3 + $0x48] sm:$0xff]  ;;  %v4736_v18 = vld [vmem:[%s4660_s3 + $0x70] sm:$0xff]  ;;  %v4747_v24 = vld [vmem:[%s4660_s3 + $0x60] sm:$0xff]  ;;  %s2962_s22 = sshll.u32 (%p1734_p1), %s2959_s20, 4  ;;  %s2947_s5 = scalar_lea.sflag (%p1734_p1), [#allocation9], %s4135_s13  ;;  %s2963_s22 = int_to_ptr.hbm [resolvable:$true] %s2962_s22 }
 0x320   : >> { %v1787_v50 = vadd.f32 %v4666_v39, %v4680_v45  ;;  %v1785_v52 = vadd.f32 %v4666_v39, %v4689_v49  ;;  %v1792_v58 = vadd.f32 %v4666_v39, %v4699_v53  ;;  %v1791_v1 = vadd.f32 %v4666_v39, %v4703_v56  ;;  %v4740_v20 = vld [vmem:[%s4660_s3 + $0x68] sm:$0xff]  ;;  %v4759_v35 = vld [vmem:[%s4660_s3 + $0x78] sm:$0xff]  ;;  %s3839_s21 = sshra.s32 (%p1734_p1), %s2963_s22, 4  ;;  %s3845_s15 = scalar_lea.hbm (%p1734_p1), %s5557_s8, 256  ;;  %s3840_s21 = int_to_ptr.hbm [resolvable:$true] %s3839_s21 }
 0x321   : >> { %3332 = vtanh.f32 %v1788_v44  ;;  %v1790_v2 = vadd.f32 %v4666_v39, %v4708_v59  ;;  %v1795_v11 = vadd.f32 %v4666_v39, %v4718_v6  ;;  %v1794_v14 = vadd.f32 %v4666_v39, %v4722_v8  ;;  %s3841_s24 = scalar_lea.hbm (%p1734_p1), %s3840_s21, 128  ;;  %p3846_p9 = scmp.lt.s32.totalorder (%p1734_p1), %s3840_s21, %s5557_s8 }
 0x322   : >> { %3334 = vtanh.f32 %v1786_v46  ;;  %v1793_v42 = vadd.f32 %v4666_v39, %v4728_v12  ;;  %v1798_v23 = vadd.f32 %v4666_v39, %v4736_v18  ;;  %v1797_v26 = vadd.f32 %v4666_v39, %v4740_v20  ;;  %p3842_p3 = scmp.ne.s32.totalorder (%p1734_p1), %s3840_s21, %s3841_s24  ;;  %p3847_p5 = scmp.lt.s32.totalorder (%p1734_p1), %s3845_s15, %s3841_s24 }
 0x323   : >> { %3336 = vtanh.f32 %v1784_v47  ;;  %v1796_v27 = vadd.f32 %v4666_v39, %v4747_v24  ;;  %v4753_v29 = vperm.slane %v1761_v21, 0  ;;  %v1799_v46 = vadd.f32 %v4666_v39, %v4759_v35 }
 0x324   : >> { %3338 = vtanh.f32 %v1789_v48  ;;  %p3843_p13 = pnand (%p1734_p1), %p3842_p3, %p4075_p0  ;;  %p3848_p8 = por (%p1734_p1), %p3847_p5, %p3846_p9 }
 0x325   : >> { %3340 = vtanh.f32 %v1787_v50  ;;  %v1801_v36 = vadd.f32 %v4753_v29, %v4689_v49  ;;  %v1800_v44 = vadd.f32 %v4753_v29, %v4672_v41  ;;  %v1803_v39 = vadd.f32 %v4753_v29, %v4680_v45 }
 0x326   : >> { %3342 = vtanh.f32 %v1785_v52  ;;  %p3844_p7 = pneg (%p1734_p1), %p3843_p13 }
 0x327   : >> { %v3333_v54 = vpop.eup %3332  ;;  %3344 = vtanh.f32 %v1792_v58  ;;  %v1802_v58 = vadd.f32 %v4753_v29, %v4669_v40 }
 0x328   : >> { %v2047_v55 = vmul.f32 %v3333_v54, %v4694_v51  ;;  %v3335_v57 = vpop.eup %3334  ;;  %3346 = vtanh.f32 %v1791_v1  ;;  %p3849_p10 = pnand (%p1734_p1), %p3848_p8, %p3844_p7 }
 0x329   : >> { %v3337_v60 = vpop.eup %3336  ;;  %v2045_v61 = vmul.f32 %v3335_v57, %v4694_v51  ;;  %3348 = vtanh.f32 %v1790_v2  ;;  %v1807_v2 = vadd.f32 %v4753_v29, %v4703_v56 }
 0x32a   : >> { %2179 = vadd.xlane.f32.xlu2 %v2047_v55  ;;  %v3339_v62 = vpop.eup %3338  ;;  %v2043_v63 = vmul.f32 %v3337_v60, %v4694_v51  ;;  %3350 = vtanh.f32 %v1795_v11  ;;  %v1804_v55 = vadd.f32 %v4753_v29, %v4663_v34 }
 0x32b   : >> { %2175 = vadd.xlane.f32.xlu1 %v2045_v61  ;;  %v3341_v3 = vpop.eup %3340  ;;  %v2048_v5 = vmul.f32 %v3339_v62, %v4694_v51  ;;  %3352 = vtanh.f32 %v1794_v14 }
 0x32c   : >> { %2171 = vadd.xlane.f32.xlu0 %v2043_v63  ;;  %v3343_v4 = vpop.eup %3342  ;;  %v2046_v7 = vmul.f32 %v3341_v3, %v4694_v51  ;;  %3354 = vtanh.f32 %v1793_v42  ;;  %v1810_v42 = vadd.f32 %v4753_v29, %v4722_v8 }
 0x32d   : >> { %v2044_v9 = vmul.f32 %v3343_v4, %v4694_v51  ;;  %v3345_v13 = vpop.eup %3344  ;;  %3356 = vtanh.f32 %v1798_v23  ;;  %v1806_v4 = vadd.f32 %v4753_v29, %v4708_v59 }
 0x32e   : >> { %v3347_v15 = vpop.eup %3346  ;;  %v2051_v17 = vmul.f32 %v3345_v13, %v4694_v51  ;;  %3358 = vtanh.f32 %v1797_v26 }
 0x32f   : >> { %v3349_v16 = vpop.eup %3348  ;;  %v2050_v19 = vmul.f32 %v3347_v15, %v4694_v51  ;;  %3360 = vtanh.f32 %v1796_v27  ;;  %v1813_v27 = vadd.f32 %v4753_v29, %v4740_v20 }
 0x330   : >> { %v2049_v22 = vmul.f32 %v3349_v16, %v4694_v51  ;;  %v3351_v25 = vpop.eup %3350  ;;  %3362 = vtanh.f32 %v1801_v36  ;;  %v1809_v16 = vadd.f32 %v4753_v29, %v4728_v12 }
 0x331   : >> { %v3353_v28 = vpop.eup %3352  ;;  %v2054_v31 = vmul.f32 %v3351_v25, %v4694_v51  ;;  %3364 = vtanh.f32 %v1800_v44  ;;  %v1762_v25 = vrot.slane %v4658_v38, 2  ;;  %v1763_v44 = vrot.slane %v4658_v38, 3 }
 0x332   : >> { %2181 = vadd.xlane.f32.xlu2 %v2048_v5  ;;  %v3355_v30 = vpop.eup %3354  ;;  %v2053_v32 = vmul.f32 %v3353_v28, %v4694_v51  ;;  %3366 = vtanh.f32 %v1799_v46  ;;  %v1805_v5 = vadd.f32 %v4753_v29, %v4675_v43 }
 0x333   : >> { %2177 = vadd.xlane.f32.xlu1 %v2046_v7  ;;  %v2052_v33 = vmul.f32 %v3355_v30, %v4694_v51  ;;  %v3357_v37 = vpop.eup %3356  ;;  %3368 = vtanh.f32 %v1804_v55  ;;  %v1812_v30 = vadd.f32 %v4753_v29, %v4747_v24 }
 0x334   : >> { %2173 = vadd.xlane.f32.xlu0 %v2044_v9  ;;  %v3359_v47 = vpop.eup %3358  ;;  %v2057_v50 = vmul.f32 %v3357_v37, %v4694_v51  ;;  %3370 = vtanh.f32 %v1803_v39 }
 0x335   : >> { %v3361_v48 = vpop.eup %3360  ;;  %v2056_v52 = vmul.f32 %v3359_v47, %v4694_v51  ;;  %3372 = vtanh.f32 %v1802_v58 }
 0x336   : >> { %v2055_v54 = vmul.f32 %v3361_v48, %v4694_v51  ;;  %v3363_v57 = vpop.eup %3362  ;;  %3374 = vtanh.f32 %v1807_v2  ;;  %v1815_v48 = vadd.f32 %v4753_v29, %v4759_v35 }
 0x337   : >> { %v3365_v60 = vpop.eup %3364  ;;  %v2060_v62 = vmul.f32 %v3363_v57, %v4694_v51  ;;  %3376 = vtanh.f32 %v1806_v4 }
 0x338   : >> { %v3367_v61 = vpop.eup %3366  ;;  %v2059_v63 = vmul.f32 %v3365_v60, %v4694_v51  ;;  %3378 = vtanh.f32 %v1805_v5  ;;  %v1764_v5 = vrot.slane %v4658_v38, 4 }
 0x339   : >> { %v2058_v1 = vmul.f32 %v3367_v61, %v4694_v51  ;;  %v3369_v3 = vpop.eup %3368  ;;  %3380 = vtanh.f32 %v1810_v42 }
 0x33a   : >> { %2187 = vadd.xlane.f32.xlu2 %v2051_v17  ;;  %v3371_v7 = vpop.eup %3370  ;;  %v2063_v11 = vmul.f32 %v3369_v3, %v4694_v51  ;;  %v1808_v17 = vadd.f32 %v4753_v29, %v4699_v53  ;;  %3382 = vtanh.f32 %v1809_v16  ;;  %v4838_v42 = vperm.slane %v1764_v5, 0 }
 0x33b   : >> { %2185 = vadd.xlane.f32.xlu1 %v2050_v19  ;;  %v3373_v9 = vpop.eup %3372  ;;  %v2062_v13 = vmul.f32 %v3371_v7, %v4694_v51  ;;  %v1765_v16 = vrot.slane %v4658_v38, 5 }
 0x33c   : >> { %2183 = vadd.xlane.f32.xlu0 %v2049_v22  ;;  %v2061_v14 = vmul.f32 %v3373_v9, %v4694_v51  ;;  %v3375_v15 = vpop.eup %3374  ;;  %3384 = vtanh.f32 %v1808_v17 }
 0x33d   : >> { %v3377_v19 = vpop.eup %3376  ;;  %v2066_v22 = vmul.f32 %v3375_v15, %v4694_v51  ;;  %3386 = vtanh.f32 %v1813_v27 }
 0x33e   : >> { %v3379_v21 = vpop.eup %3378  ;;  %v2065_v23 = vmul.f32 %v3377_v19, %v4694_v51  ;;  %3388 = vtanh.f32 %v1812_v30 }
 0x33f   : >> { %v2064_v26 = vmul.f32 %v3379_v21, %v4694_v51  ;;  %v3381_v28 = vpop.eup %3380 }
 0x340   : >> { %v2069_v37 = vmul.f32 %v3381_v28, %v4694_v51 }
 0x342   : >> { %2193 = vadd.xlane.f32.xlu2 %v2054_v31  ;;  %v1811_v31 = vadd.f32 %v4753_v29, %v4718_v6 }
 0x343   : >> { %2191 = vadd.xlane.f32.xlu1 %v2053_v32  ;;  %v3383_v32 = vpop.eup %3382 }
 0x344   : >> { %2189 = vadd.xlane.f32.xlu0 %v2052_v33  ;;  %v4804_v33 = vperm.slane %v1762_v25, 0  ;;  %v3385_v36 = vpop.eup %3384  ;;  %v2068_v20 = vmul.f32 %v3383_v32, %v4694_v51  ;;  %3390 = vtanh.f32 %v1811_v31 }
 0x345   : >> { %v2067_v24 = vmul.f32 %v3385_v36, %v4694_v51  ;;  %v3387_v47 = vpop.eup %3386 }
 0x346   : >> { %v1816_v46 = vadd.f32 %v4804_v33, %v4672_v41  ;;  %v2072_v57 = vmul.f32 %v3387_v47, %v4694_v51  ;;  %v1819_v7 = vadd.f32 %v4804_v33, %v4680_v45  ;;  %v1820_v19 = vadd.f32 %v4804_v33, %v4663_v34 }
 0x348   : >> { %3392 = vtanh.f32 %v1816_v46 }
 0x349   : >> { %3394 = vtanh.f32 %v1815_v48  ;;  %v1766_v48 = vrot.slane %v4658_v38, 6 }
 0x34a   : >> { %2199 = vadd.xlane.f32.xlu2 %v2057_v50  ;;  %v1814_v50 = vadd.f32 %v4753_v29, %v4736_v18  ;;  %v1818_v18 = vadd.f32 %v4804_v33, %v4669_v40  ;;  %v1817_v29 = vadd.f32 %v4804_v33, %v4689_v49 }
 0x34b   : >> { %2197 = vadd.xlane.f32.xlu1 %v2056_v52  ;;  %v3389_v52 = vpop.eup %3388 }
 0x34c   : >> { %2195 = vadd.xlane.f32.xlu0 %v2055_v54  ;;  %v4816_v54 = vperm.slane %v1763_v44, 0  ;;  %v3391_v55 = vpop.eup %3390  ;;  %v2071_v39 = vmul.f32 %v3389_v52, %v4694_v51  ;;  %3396 = vtanh.f32 %v1814_v50 }
 0x34d   : >> { %v2070_v58 = vmul.f32 %v3391_v55, %v4694_v51 }
 0x34e   : >> { %v1832_v35 = vadd.f32 %v4816_v54, %v4672_v41  ;;  %v3393_v60 = vpop.eup %3392  ;;  %v1834_v3 = vadd.f32 %v4816_v54, %v4669_v40  ;;  %v1833_v9 = vadd.f32 %v4816_v54, %v4689_v49  ;;  %v1836_v52 = vadd.f32 %v4816_v54, %v4663_v34 }
 0x34f   : >> { %v3395_v61 = vpop.eup %3394 }
 0x350   : >> { %3398 = vtanh.f32 %v1832_v35  ;;  %v4870_v35 = vperm.slane %v1766_v48, 0 }
 0x351   : >> { %3400 = vtanh.f32 %v1818_v18 }
 0x352   : >> { %2205 = vadd.xlane.f32.xlu2 %v2060_v62  ;;  %v3397_v62 = vpop.eup %3396  ;;  %3402 = vtanh.f32 %v1817_v29  ;;  %v1882_v48 = vadd.f32 %v4870_v35, %v4669_v40 }
 0x353   : >> { %2203 = vadd.xlane.f32.xlu1 %v2059_v63  ;;  %v2075_v63 = vmul.f32 %v3393_v60, %v4694_v51  ;;  %v2073_v2 = vmul.f32 %v3397_v62, %v4694_v51  ;;  %3404 = vtanh.f32 %v1834_v3  ;;  %v1880_v62 = vadd.f32 %v4870_v35, %v4672_v41 }
 0x354   : >> { %2201 = vadd.xlane.f32.xlu0 %v2058_v1  ;;  %v2074_v1 = vmul.f32 %v3395_v61, %v4694_v51  ;;  %3406 = vtanh.f32 %v1819_v7 }
 0x355   : >> { %3408 = vtanh.f32 %v1833_v9 }
 0x356   : >> { %v3399_v4 = vpop.eup %3398  ;;  %3410 = vtanh.f32 %v1820_v19 }
 0x35a   : >> { %2211 = vadd.xlane.f32.xlu2 %v2063_v11  ;;  %v3401_v11 = vpop.eup %3400 }
 0x35b   : >> { %2209 = vadd.xlane.f32.xlu1 %v2062_v13  ;;  %v3403_v13 = vpop.eup %3402  ;;  %v2077_v15 = vmul.f32 %v3401_v11, %v4694_v51 }
 0x35c   : >> { %2207 = vadd.xlane.f32.xlu0 %v2061_v14  ;;  %v2091_v14 = vmul.f32 %v3399_v4, %v4694_v51  ;;  %v2076_v17 = vmul.f32 %v3403_v13, %v4694_v51  ;;  %v3405_v21 = vpop.eup %3404 }
 0x35d   : >> { %v3407_v25 = vpop.eup %3406  ;;  %v2093_v28 = vmul.f32 %v3405_v21, %v4694_v51  ;;  %v1881_v21 = vadd.f32 %v4870_v35, %v4689_v49 }
 0x35e   : >> { %v3409_v27 = vpop.eup %3408  ;;  %v2078_v30 = vmul.f32 %v3407_v25, %v4694_v51  ;;  %v4893_v25 = vadd.s32 4294967272, %v4641_v10 }
 0x35f   : >> { %v2092_v31 = vmul.f32 %v3409_v27, %v4694_v51  ;;  %v3411_v36 = vpop.eup %3410  ;;  %v4896_v27 = vadd.s32 4294967288, %v4641_v10 }
 0x360   : >> { %v2079_v46 = vmul.f32 %v3411_v36, %v4694_v51 }
 0x362   : >> { %2217 = vadd.xlane.f32.xlu2 %v2066_v22  ;;  %v1849_v22 = vadd.f32 %v4838_v42, %v4689_v49 }
 0x363   : >> { %2215 = vadd.xlane.f32.xlu1 %v2065_v23  ;;  %v1848_v23 = vadd.f32 %v4838_v42, %v4672_v41 }
 0x364   : >> { %2213 = vadd.xlane.f32.xlu0 %v2064_v26  ;;  %v4849_v26 = vperm.slane %v1765_v16, 0  ;;  %3412 = vtanh.f32 %v1849_v22 }
 0x365   : >> { %3414 = vtanh.f32 %v1848_v23 }
 0x366   : >> { %v1864_v32 = vadd.f32 %v4849_v26, %v4672_v41 }
 0x368   : >> { %3416 = vtanh.f32 %v1864_v32  ;;  %v4906_v32 = vadd.s32 4294967256, %v4641_v10 }
 0x36a   : >> { %2223 = vadd.xlane.f32.xlu2 %v2069_v37  ;;  %v1850_v37 = vadd.f32 %v4838_v42, %v4669_v40  ;;  %v3413_v44 = vpop.eup %3412 }
 0x36b   : >> { %2221 = vadd.xlane.f32.xlu1 %v2068_v20  ;;  %v1835_v20 = vadd.f32 %v4816_v54, %v4680_v45  ;;  %v2108_v47 = vmul.f32 %v3413_v44, %v4694_v51 }
 0x36c   : >> { %2219 = vadd.xlane.f32.xlu0 %v2067_v24  ;;  %v3415_v24 = vpop.eup %3414  ;;  %3418 = vtanh.f32 %v1850_v37 }
 0x36d   : >> { %3420 = vtanh.f32 %v1835_v20  ;;  %v2107_v50 = vmul.f32 %v3415_v24, %v4694_v51 }
 0x36e   : >> { %v3417_v55 = vpop.eup %3416  ;;  %3422 = vtanh.f32 %v1836_v52 }
 0x36f   : >> { %v2123_v18 = vmul.f32 %v3417_v55, %v4694_v51 }
 0x372   : >> { %2229 = vadd.xlane.f32.xlu2 %v2072_v57  ;;  %v1821_v57 = vadd.f32 %v4804_v33, %v4675_v43 }
 0x373   : >> { %2227 = vadd.xlane.f32.xlu1 %v2071_v39  ;;  %v1865_v39 = vadd.f32 %v4849_v26, %v4689_v49 }
 0x374   : >> { %2225 = vadd.xlane.f32.xlu0 %v2070_v58  ;;  %v3419_v58 = vpop.eup %3418  ;;  %3424 = vtanh.f32 %v1821_v57 }
 0x375   : >> { %v3421_v60 = vpop.eup %3420  ;;  %v2109_v29 = vmul.f32 %v3419_v58, %v4694_v51  ;;  %3426 = vtanh.f32 %v1865_v39  ;;  %v4920_v58 = vadd.s32 4294967240, %v4641_v10 }
 0x376   : >> { %v2094_v61 = vmul.f32 %v3421_v60, %v4694_v51  ;;  %3428 = vtanh.f32 %v1880_v62  ;;  %v1867_v60 = vadd.f32 %v4849_v26, %v4680_v45 }
 0x37a   : >> { %2235 = vadd.xlane.f32.xlu2 %v2075_v63  ;;  %v1851_v63 = vadd.f32 %v4838_v42, %v4680_v45 }
 0x37b   : >> { %2233 = vadd.xlane.f32.xlu1 %v2074_v1  ;;  %v3423_v1 = vpop.eup %3422 }
 0x37c   : >> { %2231 = vadd.xlane.f32.xlu0 %v2073_v2  ;;  %v1866_v2 = vadd.f32 %v4849_v26, %v4669_v40  ;;  %v3425_v3 = vpop.eup %3424  ;;  %v2095_v7 = vmul.f32 %v3423_v1, %v4694_v51  ;;  %3430 = vtanh.f32 %v1851_v63  ;;  %v4931_v63 = vadd.s32 4294967232, %v4641_v10 }
 0x37d   : >> { %v3427_v5 = vpop.eup %3426  ;;  %v2080_v13 = vmul.f32 %v3425_v3, %v4694_v51 }
 0x37e   : >> { %3432 = vtanh.f32 %v1866_v2  ;;  %v3429_v16 = vpop.eup %3428  ;;  %v4934_v2 = vadd.s32 4294967248, %v4641_v10 }
 0x382   : >> { %2267 = vadd.xlane.f32.xlu2 %v2091_v14  ;;  %v2124_v14 = vmul.f32 %v3427_v5, %v4694_v51  ;;  %v3431_v19 = vpop.eup %3430 }
 0x383   : >> { %2239 = vadd.xlane.f32.xlu1 %v2077_v15  ;;  %v1837_v15 = vadd.f32 %v4816_v54, %v4675_v43  ;;  %v2110_v20 = vmul.f32 %v3431_v19, %v4694_v51 }
 0x384   : >> { %2237 = vadd.xlane.f32.xlu0 %v2076_v17  ;;  %v1822_v17 = vadd.f32 %v4804_v33, %v4708_v59  ;;  %v3433_v22 = vpop.eup %3432 }
 0x385   : >> { %3434 = vtanh.f32 %v1837_v15  ;;  %v2125_v44 = vmul.f32 %v3433_v22, %v4694_v51 }
 0x386   : >> { %3436 = vtanh.f32 %v1822_v17 }
 0x387   : >> { %3438 = vtanh.f32 %v1881_v21  ;;  %v1823_v21 = vadd.f32 %v4804_v33, %v4703_v56 }
 0x388   : >> { %3440 = vtanh.f32 %v1882_v48  ;;  %v4962_v48 = vadd.s32 4294967224, %v4641_v10 }
 0x389   : >> { %3442 = vtanh.f32 %v1867_v60 }
 0x38a   : >> { %2271 = vadd.xlane.f32.xlu2 %v2093_v28  ;;  %v4899_v28 = vadd.s32 4294967280, %v4641_v10 }
 0x38b   : >> { %2241 = vadd.xlane.f32.xlu1 %v2078_v30  ;;  %v2139_v30 = vmul.f32 %v3429_v16, %v4694_v51  ;;  %v3435_v55 = vpop.eup %3434 }
 0x38c   : >> { %2269 = vadd.xlane.f32.xlu0 %v2092_v31  ;;  %v4903_v31 = vadd.s32 4294967264, %v4641_v10  ;;  %v2096_v5 = vmul.f32 %v3435_v55, %v4694_v51 }
 0x392   : >> { %2243 = vadd.xlane.f32.xlu2 %v2079_v46 }
 0x393   : >> { %2301 = vadd.xlane.f32.xlu1 %v2108_v47 }
 0x394   : >> { %2299 = vadd.xlane.f32.xlu0 %v2107_v50  ;;  %v1767_v50 = vrot.slane %v4658_v38, 7 }
 0x39a   : >> { %2331 = vadd.xlane.f32.xlu2 %v2123_v18 }
 0x39b   : >> { %2303 = vadd.xlane.f32.xlu1 %v2109_v29  ;;  %v1852_v29 = vadd.f32 %v4838_v42, %v4663_v34 }
 0x39c   : >> { %2273 = vadd.xlane.f32.xlu0 %v2094_v61  ;;  %v3437_v61 = vpop.eup %3436 }
 0x39d   : >> { %v4881_v4 = vpop.xlane.xlu2 %2179  ;;  %v3439_v3 = vpop.eup %3438  ;;  %v2081_v15 = vmul.f32 %v3437_v61, %v4694_v51  ;;  %3444 = vtanh.f32 %v1852_v29 }
 0x39e   : >> { %v2176_v9 = vpop.xlane.xlu1 %2175  ;;  %v2569_v18 = vperm.slane %v4881_v4, %v4903_v31  ;;  %v2140_v19 = vmul.f32 %v3439_v3, %v4694_v51  ;;  %v3441_v22 = vpop.eup %3440  ;;  %3446 = vtanh.f32 %v1823_v21  ;;  %v4977_v3 = vadd.s32 4294967192, %v4641_v10 }
 0x39f   : >> { %v2172_v11 = vpop.xlane.xlu0 %2171  ;;  %v2561_v52 = vperm.slane %v2176_v9, %v4899_v28 }
 0x3a0   : >> { %v2555_v24 = vperm.slane %v2172_v11, %v4641_v10 }
 0x3a2   : >> { %2275 = vadd.xlane.f32.xlu2 %v2095_v7  ;;  %v4938_v7 = vperm.slane %v1767_v50, 0  ;;  %v2141_v50 = vmul.f32 %v3441_v22, %v4694_v51 }
 0x3a3   : >> { %2245 = vadd.xlane.f32.xlu1 %v2080_v13 }
 0x3a4   : >> { %2333 = vadd.xlane.f32.xlu0 %v2124_v14 }
 0x3a5   : >> { %v2182_v23 = vpop.xlane.xlu2 %2181 }
 0x3a6   : >> { %v2178_v36 = vpop.xlane.xlu1 %2177  ;;  %v2573_v57 = vperm.slane %v2182_v23, %v4906_v32 }
 0x3a7   : >> { %v2174_v37 = vpop.xlane.xlu0 %2173  ;;  %v2565_v46 = vperm.slane %v2178_v36, %v4893_v25 }
 0x3a8   : >> { %v2557_v47 = vperm.slane %v2174_v37, %v4896_v27  ;;  %v4953_v37 = vadd.s32 4294967216, %v4641_v10 }
 0x3aa   : >> { %2363 = vadd.xlane.f32.xlu2 %v2139_v30  ;;  %v2559_v39 = vsel %vm2558_vm0, %v2557_v47, %v2555_v24  ;;  %v1897_v30 = vadd.f32 %v4938_v7, %v4689_v49  ;;  %v4958_v24 = vadd.s32 4294967208, %v4641_v10 }
 0x3ab   : >> { %v2563_v38 = vsel %vm2562_vm1, %v2561_v52, %v2559_v39  ;;  %2335 = vadd.xlane.f32.xlu1 %v2125_v44  ;;  %v3443_v44 = vpop.eup %3442 }
 0x3ac   : >> { %v2567_v62 = vsel %vm2566_vm2, %v2565_v46, %v2563_v38  ;;  %2305 = vadd.xlane.f32.xlu0 %v2110_v20  ;;  %v1896_v20 = vadd.f32 %v4938_v7, %v4672_v41  ;;  %v3445_v49 = vpop.eup %3444  ;;  %3448 = vtanh.f32 %v1897_v30  ;;  %v1868_v38 = vadd.f32 %v4849_v26, %v4663_v34 }
 0x3ad   : >> { %v2188_v1 = vpop.xlane.xlu2 %2187  ;;  %v2571_v4 = vsel %vm2570_vm3, %v2569_v18, %v2567_v62  ;;  %v2111_v18 = vmul.f32 %v3445_v49, %v4694_v51  ;;  %v3447_v29 = vpop.eup %3446  ;;  %v1853_v62 = vadd.f32 %v4838_v42, %v4675_v43 }
 0x3ae   : >> { %v2186_v9 = vpop.xlane.xlu1 %2185  ;;  %v2575_v11 = vsel %vm2574_vm4, %v2573_v57, %v2571_v4  ;;  %v2585_v16 = vperm.slane %v2188_v1, %v4931_v63  ;;  %v2126_v57 = vmul.f32 %v3443_v44, %v4694_v51  ;;  %3450 = vtanh.f32 %v1896_v20 }
 0x3af   : >> { %v2581_v13 = vperm.slane %v2186_v9, %v4920_v58  ;;  %v2184_v14 = vpop.xlane.xlu0 %2183  ;;  %v1838_v4 = vadd.f32 %v4816_v54, %v4708_v59  ;;  %v4982_v9 = vadd.s32 4294967184, %v4641_v10  ;;  %3452 = vtanh.f32 %v1868_v38 }
 0x3b0   : >> { %v2577_v17 = vperm.slane %v2184_v14, %v4934_v2  ;;  %v4986_v14 = vadd.s32 4294967200, %v4641_v10  ;;  %3454 = vtanh.f32 %v1853_v62  ;;  %v1824_v20 = vadd.f32 %v4804_v33, %v4699_v53 }
 0x3b1   : >> { %3456 = vtanh.f32 %v1838_v4  ;;  %v1869_v4 = vadd.f32 %v4849_v26, %v4675_v43 }
 0x3b2   : >> { %2277 = vadd.xlane.f32.xlu2 %v2096_v5  ;;  %v2579_v23 = vsel %vm2578_vm5, %v2577_v17, %v2575_v11  ;;  %v3449_v5 = vpop.eup %3448  ;;  %3458 = vtanh.f32 %v1824_v20 }
 0x3b3   : >> { %v2583_v36 = vsel %vm2582_vm6, %v2581_v13, %v2579_v23  ;;  %2247 = vadd.xlane.f32.xlu1 %v2081_v15  ;;  %v2156_v22 = vmul.f32 %v3449_v5, %v4694_v51 }
 0x3b4   : >> { %2365 = vadd.xlane.f32.xlu0 %v2140_v19  ;;  %v2587_v47 = vsel %vm2586_vm7, %v2585_v16, %v2583_v36  ;;  %v3451_v15 = vpop.eup %3450  ;;  %v2082_v16 = vmul.f32 %v3447_v29, %v4694_v51 }
 0x3b5   : >> { %v2194_v46 = vpop.xlane.xlu2 %2193  ;;  %v2155_v36 = vmul.f32 %v3451_v15, %v4694_v51  ;;  %v3453_v44 = vpop.eup %3452  ;;  %v1854_v15 = vadd.f32 %v4838_v42, %v4708_v59 }
 0x3b6   : >> { %v2192_v52 = vpop.xlane.xlu1 %2191  ;;  %v2597_v39 = vperm.slane %v2194_v46, %v4958_v24 }
 0x3b7   : >> { %v2593_v41 = vperm.slane %v2192_v52, %v4953_v37  ;;  %v2190_v55 = vpop.xlane.xlu0 %2189  ;;  %v3455_v52 = vpop.eup %3454 }
 0x3b8   : >> { %v2589_v60 = vperm.slane %v2190_v55, %v4962_v48  ;;  %v5004_v55 = vadd.s32 4294967176, %v4641_v10 }
 0x3ba   : >> { %2367 = vadd.xlane.f32.xlu2 %v2141_v50  ;;  %v2591_v61 = vsel %vm2590_vm8, %v2589_v60, %v2587_v47  ;;  %v1898_v47 = vadd.f32 %v4938_v7, %v4669_v40  ;;  %v1883_v50 = vadd.f32 %v4870_v35, %v4680_v45  ;;  %v2127_v40 = vmul.f32 %v3453_v44, %v4694_v51 }
 0x3bb   : >> { %v2595_v1 = vsel %vm2594_vm9, %v2593_v41, %v2591_v61  ;;  %2337 = vadd.xlane.f32.xlu1 %v2126_v57  ;;  %v2112_v61 = vmul.f32 %v3455_v52, %v4694_v51 }
 0x3bc   : >> { %2307 = vadd.xlane.f32.xlu0 %v2111_v18  ;;  %v2599_v13 = vsel %vm2598_vm10, %v2597_v39, %v2595_v1  ;;  %v3457_v39 = vpop.eup %3456  ;;  %3460 = vtanh.f32 %v1898_v47 }
 0x3bd   : >> { %v2200_v11 = vpop.xlane.xlu2 %2199  ;;  %3462 = vtanh.f32 %v1883_v50  ;;  %v2097_v1 = vmul.f32 %v3457_v39, %v4694_v51  ;;  %v1884_v39 = vadd.f32 %v4870_v35, %v4663_v34 }
 0x3be   : >> { %v2198_v17 = vpop.xlane.xlu1 %2197  ;;  %v2609_v23 = vperm.slane %v2200_v11, %v4982_v9  ;;  %v3459_v11 = vpop.eup %3458  ;;  %3464 = vtanh.f32 %v1869_v4 }
 0x3bf   : >> { %v2605_v19 = vperm.slane %v2198_v17, %v4977_v3  ;;  %v2196_v21 = vpop.xlane.xlu0 %2195  ;;  %3466 = vtanh.f32 %v1854_v15  ;;  %v1870_v15 = vadd.f32 %v4849_v26, %v4708_v59 }
 0x3c0   : >> { %v2601_v30 = vperm.slane %v2196_v21, %v4986_v14 }
 0x3c2   : >> { %2249 = vadd.xlane.f32.xlu2 %v2082_v16  ;;  %v2603_v46 = vsel %vm2602_vm11, %v2601_v30, %v2599_v13  ;;  %v1839_v16 = vadd.f32 %v4816_v54, %v4703_v56  ;;  %v3461_v17 = vpop.eup %3460 }
 0x3c3   : >> { %v2607_v49 = vsel %vm2606_vm12, %v2605_v19, %v2603_v46  ;;  %2397 = vadd.xlane.f32.xlu1 %v2156_v22  ;;  %v3463_v21 = vpop.eup %3462  ;;  %v2083_v22 = vmul.f32 %v3459_v11, %v4694_v51  ;;  %v2157_v20 = vmul.f32 %v3461_v17, %v4694_v51 }
 0x3c4   : >> { %2395 = vadd.xlane.f32.xlu0 %v2155_v36  ;;  %v2611_v41 = vsel %vm2610_vm13, %v2609_v23, %v2607_v49  ;;  %3468 = vtanh.f32 %v1839_v16  ;;  %v2142_v47 = vmul.f32 %v3463_v21, %v4694_v51  ;;  %v1825_v49 = vadd.f32 %v4804_v33, %v4728_v12  ;;  %v3465_v50 = vpop.eup %3464 }
 0x3c5   : >> { %v2206_v57 = vpop.xlane.xlu2 %2205 }
 0x3c6   : >> { %v2617_v60 = vperm.slane %v2206_v57, %v4896_v27  ;;  %v2204_v18 = vpop.xlane.xlu1 %2203  ;;  %3470 = vtanh.f32 %v1825_v49 }
 0x3c7   : >> { %v2202_v38 = vpop.xlane.xlu0 %2201  ;;  %v2616_v29 = vperm.slane %v2204_v18, %v4641_v10 }
 0x3c8   : >> { %v2613_v62 = vperm.slane %v2202_v38, %v5004_v55 }
 0x3c9   : >> { %v2618_v5 = vsel %vm2558_vm0, %v2617_v60, %v2616_v29  ;;  %v3467_v60 = vpop.eup %3466  ;;  %v2128_v29 = vmul.f32 %v3465_v50, %v4694_v51 }
 0x3ca   : >> { %2339 = vadd.xlane.f32.xlu2 %v2127_v40  ;;  %v5016_v13 = vsel %vm2614_vm14, %v2613_v62, %v2611_v41  ;;  %v1899_v41 = vadd.f32 %v4938_v7, %v4680_v45  ;;  %v3469_v38 = vpop.eup %3468 }
 0x3cb   : >> { %2309 = vadd.xlane.f32.xlu1 %v2112_v61  ;;  %v2098_v11 = vmul.f32 %v3469_v38, %v4694_v51  ;;  %v1885_v38 = vadd.f32 %v4870_v35, %v4675_v43 }
 0x3cc   : >> { %2279 = vadd.xlane.f32.xlu0 %v2097_v1  ;;  %3472 = vtanh.f32 %v1899_v41  ;;  %v2113_v1 = vmul.f32 %v3467_v60, %v4694_v51  ;;  %v3471_v16 = vpop.eup %3470 }
 0x3cd   : >> { %v2212_v19 = vpop.xlane.xlu2 %2211  ;;  %3474 = vtanh.f32 %v1884_v39 }
 0x3ce   : >> { %v2210_v23 = vpop.xlane.xlu1 %2209  ;;  %v2623_v46 = vperm.slane %v2212_v19, %v4903_v31  ;;  %v1855_v19 = vadd.f32 %v4838_v42, %v4703_v56  ;;  %3476 = vtanh.f32 %v1870_v15 }
 0x3cf   : >> { %v2208_v30 = vpop.xlane.xlu0 %2207  ;;  %v2621_v36 = vperm.slane %v2210_v23, %v4893_v25 }
 0x3d0   : >> { %v2619_v44 = vperm.slane %v2208_v30, %v4899_v28  ;;  %3478 = vtanh.f32 %v1855_v19 }
 0x3d2   : >> { %2251 = vadd.xlane.f32.xlu2 %v2083_v22  ;;  %v2620_v52 = vsel %vm2562_vm1, %v2619_v44, %v2618_v5  ;;  %v1840_v22 = vadd.f32 %v4816_v54, %v4699_v53  ;;  %v3473_v23 = vpop.eup %3472 }
 0x3d3   : >> { %v2622_v57 = vsel %vm2566_vm2, %v2621_v36, %v2620_v52  ;;  %2399 = vadd.xlane.f32.xlu1 %v2157_v20  ;;  %v3475_v59 = vpop.eup %3474  ;;  %v2084_v20 = vmul.f32 %v3471_v16, %v4694_v51  ;;  %v2158_v49 = vmul.f32 %v3473_v23, %v4694_v51  ;;  %v1871_v16 = vadd.f32 %v4849_v26, %v4703_v56 }
 0x3d4   : >> { %2369 = vadd.xlane.f32.xlu0 %v2142_v47  ;;  %v2624_v40 = vsel %vm2570_vm3, %v2623_v46, %v2622_v57  ;;  %3480 = vtanh.f32 %v1840_v22  ;;  %v2143_v41 = vmul.f32 %v3475_v59, %v4694_v51  ;;  %v1826_v57 = vadd.f32 %v4804_v33, %v4722_v8  ;;  %v3477_v39 = vpop.eup %3476 }
 0x3d5   : >> { %v2218_v18 = vpop.xlane.xlu2 %2217  ;;  %v1841_v23 = vadd.f32 %v4816_v54, %v4728_v12 }
 0x3d6   : >> { %v2216_v61 = vpop.xlane.xlu1 %2215  ;;  %v2629_v5 = vperm.slane %v2218_v18, %v4920_v58  ;;  %3482 = vtanh.f32 %v1826_v57  ;;  %v3592_v57 = vld [vmem:[%s4660_s3 + $0x28] sm:$0xff] }
 0x3d7   : >> { %v2214_v62 = vpop.xlane.xlu0 %2213  ;;  %v2627_v45 = vperm.slane %v2216_v61, %v4934_v2 }
 0x3d8   : >> { %v2625_v4 = vperm.slane %v2214_v62, %v4906_v32 }
 0x3da   : >> { %2341 = vadd.xlane.f32.xlu2 %v2128_v29  ;;  %v2626_v17 = vsel %vm2574_vm4, %v2625_v4, %v2624_v40  ;;  %v1900_v40 = vadd.f32 %v4938_v7, %v4663_v34  ;;  %v3479_v29 = vpop.eup %3478 }
 0x3db   : >> { %v2628_v21 = vsel %vm2578_vm5, %v2627_v45, %v2626_v17  ;;  %2311 = vadd.xlane.f32.xlu1 %v2113_v1  ;;  %v3481_v8 = vpop.eup %3480  ;;  %v2129_v45 = vmul.f32 %v3477_v39, %v4694_v51  ;;  %v1901_v39 = vadd.f32 %v3592_v57, %v4938_v7 }
 0x3dc   : >> { %2281 = vadd.xlane.f32.xlu0 %v2098_v11  ;;  %v2630_v30 = vsel %vm2582_vm6, %v2629_v5, %v2628_v21  ;;  %3484 = vtanh.f32 %v1900_v40  ;;  %v2114_v5 = vmul.f32 %v3479_v29, %v4694_v51  ;;  %v2099_v15 = vmul.f32 %v3481_v8, %v4694_v51  ;;  %v3483_v17 = vpop.eup %3482  ;;  %v3593_v40 = vld [vmem:[%s4660_s3 + $0x30] sm:$0xff] }
 0x3dd   : >> { %v2224_v36 = vpop.xlane.xlu2 %2223  ;;  %3486 = vtanh.f32 %v1885_v38  ;;  %v1856_v21 = vadd.f32 %v4838_v42, %v4699_v53 }
 0x3de   : >> { %v2222_v44 = vpop.xlane.xlu1 %2221  ;;  %v2635_v52 = vperm.slane %v2224_v36, %v4953_v37  ;;  %3488 = vtanh.f32 %v1871_v16 }
 0x3df   : >> { %v2220_v46 = vpop.xlane.xlu0 %2219  ;;  %v2633_v47 = vperm.slane %v2222_v44, %v4962_v48  ;;  %3490 = vtanh.f32 %v1856_v21 }
 0x3e0   : >> { %v2631_v50 = vperm.slane %v2220_v46, %v4931_v63  ;;  %3492 = vtanh.f32 %v1841_v23 }
 0x3e2   : >> { %2253 = vadd.xlane.f32.xlu2 %v2084_v20  ;;  %v2632_v60 = vsel %vm2586_vm7, %v2631_v50, %v2630_v30  ;;  %v3485_v30 = vpop.eup %3484  ;;  %v2085_v20 = vmul.f32 %v3483_v17, %v4694_v51  ;;  %v1827_v50 = vadd.f32 %v4804_v33, %v4718_v6  ;;  %v5111_v17 = vld [vmem:[%s4660_s3 + $0x48] sm:$0xff] }
 0x3e3   : >> { %v2634_v18 = vsel %vm2590_vm8, %v2633_v47, %v2632_v60  ;;  %2401 = vadd.xlane.f32.xlu1 %v2158_v49  ;;  %v3487_v56 = vpop.eup %3486  ;;  %v2159_v47 = vmul.f32 %v3485_v30, %v4694_v51 }
 0x3e4   : >> { %2371 = vadd.xlane.f32.xlu0 %v2143_v41  ;;  %v2636_v61 = vsel %vm2594_vm9, %v2635_v52, %v2634_v18  ;;  %v2144_v49 = vmul.f32 %v3487_v56, %v4694_v51  ;;  %v3489_v52 = vpop.eup %3488  ;;  %v1886_v18 = vadd.f32 %v3593_v40, %v4870_v35  ;;  %3494 = vtanh.f32 %v1827_v50 }
 0x3e5   : >> { %v2230_v62 = vpop.xlane.xlu2 %2229  ;;  %v3491_v38 = vpop.eup %3490  ;;  %3496 = vtanh.f32 %v1901_v39 }
 0x3e6   : >> { %v2228_v1 = vpop.xlane.xlu1 %2227  ;;  %v2641_v43 = vperm.slane %v2230_v62, %v4977_v3  ;;  %v2130_v62 = vmul.f32 %v3489_v52, %v4694_v51  ;;  %3498 = vtanh.f32 %v1886_v18  ;;  %v5129_v52 = vld [vmem:[%s4660_s3 + $0x60] sm:$0xff]  ;;  %v1902_v18 = vadd.f32 %v3593_v40, %v4938_v7 }
 0x3e7   : >> { %v2226_v4 = vpop.xlane.xlu0 %2225  ;;  %v2639_v34 = vperm.slane %v2228_v1, %v4986_v14 }
 0x3e8   : >> { %v2637_v11 = vperm.slane %v2226_v4, %v4958_v24 }
 0x3ea   : >> { %2343 = vadd.xlane.f32.xlu2 %v2129_v45  ;;  %v2638_v19 = vsel %vm2598_vm10, %v2637_v11, %v2636_v61  ;;  %v3493_v61 = vpop.eup %3492  ;;  %v5105_v11 = vld [vmem:[%s4660_s3 + $0x40] sm:$0xff] }
 0x3eb   : >> { %v2640_v22 = vsel %vm2602_vm11, %v2639_v34, %v2638_v19  ;;  %2313 = vadd.xlane.f32.xlu1 %v2114_v5  ;;  %v2115_v34 = vmul.f32 %v3491_v38, %v4694_v51  ;;  %v2100_v5 = vmul.f32 %v3493_v61, %v4694_v51  ;;  %v1857_v19 = vadd.f32 %v5111_v17, %v4838_v42 }
 0x3ec   : >> { %2283 = vadd.xlane.f32.xlu0 %v2099_v15  ;;  %v2642_v36 = vsel %vm2606_vm12, %v2641_v43, %v2640_v22  ;;  %v1872_v43 = vadd.f32 %v5105_v11, %v4849_v26  ;;  %v3495_v15 = vpop.eup %3494  ;;  %v5117_v22 = vld [vmem:[%s4660_s3 + $0x50] sm:$0xff] }
 0x3ed   : >> { %v2236_v59 = vpop.xlane.xlu2 %2235  ;;  %v1842_v23 = vadd.f32 %v5117_v22, %v4816_v54  ;;  %v3497_v30 = vpop.eup %3496  ;;  %v2086_v56 = vmul.f32 %v3495_v15, %v4694_v51 }
 0x3ee   : >> { %v2234_v44 = vpop.xlane.xlu1 %2233  ;;  %v2647_v8 = vperm.slane %v2236_v59, %v4641_v10  ;;  %3500 = vtanh.f32 %v1872_v43  ;;  %v3499_v59 = vpop.eup %3498 }
 0x3ef   : >> { %v2232_v53 = vpop.xlane.xlu0 %2231  ;;  %v2645_v46 = vperm.slane %v2234_v44, %v5004_v55  ;;  %3502 = vtanh.f32 %v1857_v19  ;;  %v2145_v50 = vmul.f32 %v3499_v59, %v4694_v51  ;;  %v1873_v19 = vadd.f32 %v5111_v17, %v4849_v26 }
 0x3f0   : >> { %v2643_v12 = vperm.slane %v2232_v53, %v4982_v9  ;;  %3504 = vtanh.f32 %v1842_v23 }
 0x3f2   : >> { %2255 = vadd.xlane.f32.xlu2 %v2085_v20  ;;  %v2644_v41 = vsel %vm2610_vm13, %v2643_v12, %v2642_v36  ;;  %v2160_v12 = vmul.f32 %v3497_v30, %v4694_v51  ;;  %v1858_v30 = vadd.f32 %v5117_v22, %v4838_v42 }
 0x3f3   : >> { %v2646_v60 = vsel %vm2614_vm14, %v2645_v46, %v2644_v41  ;;  %2403 = vadd.xlane.f32.xlu1 %v2159_v47  ;;  %v1828_v41 = vadd.f32 %v5129_v52, %v4804_v33 }
 0x3f4   : >> { %v5096_v29 = vsel %vm2833_vm15, %v2646_v60, %v5016_v13  ;;  %2373 = vadd.xlane.f32.xlu0 %v2144_v49  ;;  %v3501_v39 = vpop.eup %3500 }
 0x3f5   : >> { %v2268_v6 = vpop.xlane.xlu2 %2267  ;;  %3506 = vtanh.f32 %v1828_v41 }
 0x3f6   : >> { %v2240_v45 = vpop.xlane.xlu1 %2239  ;;  %v2678_v20 = vperm.slane %v2268_v6, %v4641_v10  ;;  %v3598_v6 = vld [vmem:[%s4660_s3 + $0x38] sm:$0xff]  ;;  %3508 = vtanh.f32 %v1902_v18 }
 0x3f7   : >> { %v2238_v1 = vpop.xlane.xlu0 %2237  ;;  %v2650_v4 = vperm.slane %v2240_v45, %v4899_v28  ;;  %v1887_v61 = vadd.f32 %v3598_v6, %v4870_v35 }
 0x3f8   : >> { %v2648_v13 = vperm.slane %v2238_v1, %v4896_v27 }
 0x3f9   : >> { %3510 = vtanh.f32 %v1887_v61 }
 0x3fa   : >> { %2345 = vadd.xlane.f32.xlu2 %v2130_v62  ;;  %v2649_v16 = vsel %vm2558_vm0, %v2648_v13, %v2647_v8  ;;  %v3503_v62 = vpop.eup %3502  ;;  %3512 = vtanh.f32 %v1873_v19 }
 0x3fb   : >> { %v2651_v21 = vsel %vm2562_vm1, %v2650_v4, %v2649_v16  ;;  %2315 = vadd.xlane.f32.xlu1 %v2115_v34  ;;  %v3505_v45 = vpop.eup %3504  ;;  %v2131_v4 = vmul.f32 %v3501_v39, %v4694_v51  ;;  %v2116_v43 = vmul.f32 %v3503_v62, %v4694_v51  ;;  %3514 = vtanh.f32 %v1858_v30 }
 0x3fc   : >> { %2285 = vadd.xlane.f32.xlu0 %v2100_v5  ;;  %v2101_v16 = vmul.f32 %v3505_v45, %v4694_v51  ;;  %v1903_v62 = vadd.f32 %v3598_v6, %v4938_v7 }
 0x3fd   : >> { %v2272_v36 = vpop.xlane.xlu2 %2271 }
 0x3fe   : >> { %v2242_v44 = vpop.xlane.xlu1 %2241  ;;  %v2681_v46 = vperm.slane %v2272_v36, %v4899_v28  ;;  %v5152_v36 = vld [vmem:[%s4660_s3 + $0x58] sm:$0xff] }
 0x3ff   : >> { %v2270_v53 = vpop.xlane.xlu0 %2269  ;;  %v2652_v47 = vperm.slane %v2242_v44, %v4893_v25  ;;  %v1843_v59 = vadd.f32 %v5152_v36, %v4816_v54 }
 0x400   : >> { %v2679_v49 = vperm.slane %v2270_v53, %v4896_v27 }
 0x401   : >> { %v2653_v57 = vsel %vm2566_vm2, %v2652_v47, %v2651_v21  ;;  %v3507_v21 = vpop.eup %3506  ;;  %3516 = vtanh.f32 %v1843_v59 }
 0x402   : >> { %2257 = vadd.xlane.f32.xlu2 %v2086_v56  ;;  %v2680_v60 = vsel %vm2558_vm0, %v2679_v49, %v2678_v20  ;;  %v3509_v56 = vpop.eup %3508  ;;  %v2087_v53 = vmul.f32 %v3507_v21, %v4694_v51 }
 0x403   : >> { %v2682_v38 = vsel %vm2562_vm1, %v2681_v46, %v2680_v60  ;;  %2405 = vadd.xlane.f32.xlu1 %v2160_v12  ;;  %v3511_v44 = vpop.eup %3510  ;;  %v2161_v49 = vmul.f32 %v3509_v56, %v4694_v51 }
 0x404   : >> { %2375 = vadd.xlane.f32.xlu0 %v2145_v50  ;;  %v2146_v41 = vmul.f32 %v3511_v44, %v4694_v51  ;;  %v3513_v18 = vpop.eup %3512  ;;  %v1844_v44 = vadd.f32 %v5129_v52, %v4816_v54 }
 0x405   : >> { %v2244_v8 = vpop.xlane.xlu2 %2243  ;;  %v3515_v45 = vpop.eup %3514 }
 0x406   : >> { %v2654_v1 = vperm.slane %v2244_v8, %v4903_v31  ;;  %v2302_v34 = vpop.xlane.xlu1 %2301  ;;  %v1888_v8 = vadd.f32 %v5105_v11, %v4870_v35 }
 0x407   : >> { %v2300_v13 = vpop.xlane.xlu0 %2299  ;;  %v2710_v5 = vperm.slane %v2302_v34, %v4896_v27 }
 0x408   : >> { %v2655_v40 = vsel %vm2570_vm3, %v2654_v1, %v2653_v57  ;;  %v2709_v15 = vperm.slane %v2300_v13, %v4641_v10  ;;  %v5162_v57 = vld [vmem:[%s4660_s3 + $0x68] sm:$0xff]  ;;  %v2132_v13 = vmul.f32 %v3513_v18, %v4694_v51 }
 0x409   : >> { %v1829_v39 = vadd.f32 %v5162_v57, %v4804_v33 }
 0x40a   : >> { %2347 = vadd.xlane.f32.xlu2 %v2131_v4  ;;  %v2711_v23 = vsel %vm2558_vm0, %v2710_v5, %v2709_v15  ;;  %v3517_v4 = vpop.eup %3516 }
 0x40b   : >> { %2317 = vadd.xlane.f32.xlu1 %v2116_v43  ;;  %3518 = vtanh.f32 %v1829_v39  ;;  %v2102_v21 = vmul.f32 %v3517_v4, %v4694_v51  ;;  %v1904_v4 = vadd.f32 %v5105_v11, %v4938_v7 }
 0x40c   : >> { %2287 = vadd.xlane.f32.xlu0 %v2101_v16  ;;  %3520 = vtanh.f32 %v1903_v62  ;;  %v2117_v16 = vmul.f32 %v3515_v45, %v4694_v51 }
 0x40d   : >> { %v2332_v20 = vpop.xlane.xlu2 %2331  ;;  %3522 = vtanh.f32 %v1888_v8 }
 0x40e   : >> { %v2304_v46 = vpop.xlane.xlu1 %2303  ;;  %v2740_v5 = vperm.slane %v2332_v20, %v4641_v10  ;;  %v1859_v20 = vadd.f32 %v5152_v36, %v4838_v42 }
 0x40f   : >> { %v2274_v47 = vpop.xlane.xlu0 %2273  ;;  %v2712_v12 = vperm.slane %v2304_v46, %v4899_v28 }
 0x410   : >> { %v2683_v50 = vperm.slane %v2274_v47, %v4893_v25 }
 0x411   : >> { %v2713_v60 = vsel %vm2562_vm1, %v2712_v12, %v2711_v23  ;;  %v1874_v23 = vadd.f32 %v5117_v22, %v4849_v26  ;;  %v3519_v59 = vpop.eup %3518 }
 0x412   : >> { %2259 = vadd.xlane.f32.xlu2 %v2087_v53  ;;  %v2684_v61 = vsel %vm2566_vm2, %v2683_v50, %v2682_v38  ;;  %v3521_v53 = vpop.eup %3520  ;;  %v2088_v12 = vmul.f32 %v3519_v59, %v4694_v51 }
 0x413   : >> { %2407 = vadd.xlane.f32.xlu1 %v2161_v49  ;;  %3524 = vtanh.f32 %v1874_v23  ;;  %v3523_v47 = vpop.eup %3522 }
 0x414   : >> { %2377 = vadd.xlane.f32.xlu0 %v2146_v41  ;;  %3526 = vtanh.f32 %v1859_v20  ;;  %v2162_v41 = vmul.f32 %v3521_v53, %v4694_v51  ;;  %v2147_v18 = vmul.f32 %v3523_v47, %v4694_v51  ;;  %v1875_v20 = vadd.f32 %v5152_v36, %v4849_v26 }
 0x415   : >> { %v2276_v1 = vpop.xlane.xlu2 %2275  ;;  %3528 = vtanh.f32 %v1844_v44  ;;  %v1845_v47 = vadd.f32 %v5162_v57, %v4816_v54 }
 0x416   : >> { %v2685_v34 = vperm.slane %v2276_v1, %v4903_v31  ;;  %v2246_v43 = vpop.xlane.xlu1 %2245 }
 0x417   : >> { %v2334_v38 = vpop.xlane.xlu0 %2333  ;;  %v2656_v15 = vperm.slane %v2246_v43, %v4906_v32 }
 0x418   : >> { %v2686_v6 = vsel %vm2570_vm3, %v2685_v34, %v2684_v61  ;;  %v2741_v19 = vperm.slane %v2334_v38, %v4896_v27  ;;  %v5193_v61 = vld [vmem:[%s4660_s3 + $0x70] sm:$0xff]  ;;  %v1889_v34 = vadd.f32 %v5111_v17, %v4870_v35 }
 0x419   : >> { %v2657_v30 = vsel %vm2574_vm4, %v2656_v15, %v2655_v40  ;;  %v1830_v62 = vadd.f32 %v5193_v61, %v4804_v33  ;;  %v3525_v45 = vpop.eup %3524 }
 0x41a   : >> { %2349 = vadd.xlane.f32.xlu2 %v2132_v13  ;;  %v2742_v56 = vsel %vm2558_vm0, %v2741_v19, %v2740_v5  ;;  %v3527_v13 = vpop.eup %3526  ;;  %v2133_v15 = vmul.f32 %v3525_v45, %v4694_v51 }
 0x41b   : >> { %2319 = vadd.xlane.f32.xlu1 %v2117_v16  ;;  %3530 = vtanh.f32 %v1830_v62  ;;  %v3529_v43 = vpop.eup %3528  ;;  %v2118_v23 = vmul.f32 %v3527_v13, %v4694_v51  ;;  %v5231_v13 = vld [vmem:[%s4660_s3 + $0x78] sm:$0xff] }
 0x41c   : >> { %2289 = vadd.xlane.f32.xlu0 %v2102_v21  ;;  %3532 = vtanh.f32 %v1904_v4 }
 0x41d   : >> { %v2364_v46 = vpop.xlane.xlu2 %2363  ;;  %3534 = vtanh.f32 %v1889_v34 }
 0x41e   : >> { %v2336_v40 = vpop.xlane.xlu1 %2335  ;;  %v2771_v16 = vperm.slane %v2364_v46, %v4641_v10  ;;  %3536 = vtanh.f32 %v1875_v20 }
 0x41f   : >> { %v2306_v49 = vpop.xlane.xlu0 %2305  ;;  %v2743_v50 = vperm.slane %v2336_v40, %v4899_v28 }
 0x420   : >> { %v2714_v39 = vperm.slane %v2306_v49, %v4893_v25 }
 0x421   : >> { %v2744_v8 = vsel %vm2562_vm1, %v2743_v50, %v2742_v56  ;;  %v2103_v56 = vmul.f32 %v3529_v43, %v4694_v51  ;;  %v3531_v53 = vpop.eup %3530 }
 0x422   : >> { %2261 = vadd.xlane.f32.xlu2 %v2088_v12  ;;  %v2715_v1 = vsel %vm2566_vm2, %v2714_v39, %v2713_v60  ;;  %v3533_v12 = vpop.eup %3532 }
 0x423   : >> { %2409 = vadd.xlane.f32.xlu1 %v2162_v41  ;;  %v3535_v49 = vpop.eup %3534  ;;  %v2163_v45 = vmul.f32 %v3533_v12, %v4694_v51 }
 0x424   : >> { %2379 = vadd.xlane.f32.xlu0 %v2147_v18  ;;  %v2148_v34 = vmul.f32 %v3535_v49, %v4694_v51 }
 0x425   : >> { %v2278_v5 = vpop.xlane.xlu2 %2277 }
 0x426   : >> { %v2687_v38 = vperm.slane %v2278_v5, %v4906_v32  ;;  %v2248_v19 = vpop.xlane.xlu1 %2247  ;;  %v1831_v5 = vadd.f32 %v5231_v13, %v4804_v33 }
 0x427   : >> { %v2366_v60 = vpop.xlane.xlu0 %2365  ;;  %v2658_v21 = vperm.slane %v2248_v19, %v4934_v2  ;;  %v1890_v19 = vadd.f32 %v5117_v22, %v4870_v35 }
 0x428   : >> { %v5207_v11 = vsel %vm2574_vm4, %v2687_v38, %v2686_v6  ;;  %v2772_v59 = vperm.slane %v2366_v60, %v4896_v27  ;;  %v1860_v6 = vadd.f32 %v5129_v52, %v4838_v42  ;;  %v3537_v38 = vpop.eup %3536 }
 0x429   : >> { %v2659_v44 = vsel %vm2578_vm5, %v2658_v21, %v2657_v30  ;;  %v2089_v30 = vmul.f32 %v3531_v53, %v4694_v51 }
 0x42a   : >> { %2351 = vadd.xlane.f32.xlu2 %v2133_v15  ;;  %v2773_v46 = vsel %vm2558_vm0, %v2772_v59, %v2771_v16  ;;  %3538 = vtanh.f32 %v1860_v6  ;;  %v1905_v16 = vadd.f32 %v5111_v17, %v4938_v7  ;;  %v1876_v6 = vadd.f32 %v5129_v52, %v4849_v26 }
 0x42b   : >> { %2321 = vadd.xlane.f32.xlu1 %v2118_v23  ;;  %3540 = vtanh.f32 %v1845_v47 }
 0x42c   : >> { %2291 = vadd.xlane.f32.xlu0 %v2103_v56  ;;  %3542 = vtanh.f32 %v1831_v5 }
 0x42d   : >> { %v2368_v40 = vpop.xlane.xlu2 %2367  ;;  %3544 = vtanh.f32 %v1905_v16  ;;  %v1847_v16 = vadd.f32 %v5231_v13, %v4816_v54 }
 0x42e   : >> { %v2774_v50 = vperm.slane %v2368_v40, %v4899_v28  ;;  %v2338_v41 = vpop.xlane.xlu1 %2337  ;;  %3546 = vtanh.f32 %v1890_v19  ;;  %v1861_v40 = vadd.f32 %v5162_v57, %v4838_v42 }
 0x42f   : >> { %v2308_v39 = vpop.xlane.xlu0 %2307  ;;  %v2745_v62 = vperm.slane %v2338_v41, %v4893_v25  ;;  %3548 = vtanh.f32 %v1876_v6  ;;  %v1892_v6 = vadd.f32 %v5129_v52, %v4870_v35 }
 0x430   : >> { %v5224_v18 = vsel %vm2562_vm1, %v2774_v50, %v2773_v46  ;;  %v2716_v4 = vperm.slane %v2308_v39, %v4903_v31  ;;  %v3539_v60 = vpop.eup %3538  ;;  %3550 = vtanh.f32 %v1861_v40 }
 0x431   : >> { %v2746_v43 = vsel %vm2566_vm2, %v2745_v62, %v2744_v8  ;;  %v3541_v23 = vpop.eup %3540  ;;  %v2134_v8 = vmul.f32 %v3537_v38, %v4694_v51  ;;  %v2119_v20 = vmul.f32 %v3539_v60, %v4694_v51 }
 0x432   : >> { %2263 = vadd.xlane.f32.xlu2 %v2089_v30  ;;  %v2717_v15 = vsel %vm2570_vm3, %v2716_v4, %v2715_v1  ;;  %v2104_v46 = vmul.f32 %v3541_v23, %v4694_v51  ;;  %v3543_v47 = vpop.eup %3542  ;;  %v1891_v23 = vadd.f32 %v5152_v36, %v4870_v35 }
 0x433   : >> { %2411 = vadd.xlane.f32.xlu1 %v2163_v45  ;;  %v2090_v41 = vmul.f32 %v3543_v47, %v4694_v51 }
 0x434   : >> { %2381 = vadd.xlane.f32.xlu0 %v2148_v34 }
 0x435   : >> { %v2250_v21 = vpop.xlane.xlu2 %2249 }
 0x436   : >> { %v2660_v33 = vperm.slane %v2250_v21, %v4920_v58  ;;  %v2398_v59 = vpop.xlane.xlu1 %2397 }
 0x437   : >> { %v2396_v56 = vpop.xlane.xlu0 %2395  ;;  %v2803_v17 = vperm.slane %v2398_v59, %v4896_v27  ;;  %v1846_v27 = vadd.f32 %v5193_v61, %v4816_v54 }
 0x438   : >> { %v2661_v1 = vsel %vm2582_vm6, %v2660_v33, %v2659_v44  ;;  %v2802_v53 = vperm.slane %v2396_v56, %v4641_v10  ;;  %v3545_v44 = vpop.eup %3544 }
 0x439   : >> { %v3547_v50 = vpop.eup %3546  ;;  %v2164_v34 = vmul.f32 %v3545_v44, %v4694_v51  ;;  %3552 = vtanh.f32 %v1846_v27 }
 0x43a   : >> { %2353 = vadd.xlane.f32.xlu2 %v2134_v8  ;;  %v2804_v12 = vsel %vm2558_vm0, %v2803_v17, %v2802_v53  ;;  %v2149_v38 = vmul.f32 %v3547_v50, %v4694_v51  ;;  %v3549_v60 = vpop.eup %3548  ;;  %3554 = vtanh.f32 %v1847_v16  ;;  %vm2835_vm0 = vcmask 1042434  }
 0x43b   : >> { %2323 = vadd.xlane.f32.xlu1 %v2119_v20  ;;  %v3551_v33 = vpop.eup %3550 }
 0x43c   : >> { %2293 = vadd.xlane.f32.xlu0 %v2104_v46  ;;  %v2120_v20 = vmul.f32 %v3551_v33, %v4694_v51 }
 0x43d   : >> { %v2340_v49 = vpop.xlane.xlu2 %2339 }
 0x43e   : >> { %v2747_v30 = vperm.slane %v2340_v49, %v4903_v31  ;;  %v2310_v39 = vpop.xlane.xlu1 %2309 }
 0x43f   : >> { %v2280_v62 = vpop.xlane.xlu0 %2279  ;;  %v2718_v4 = vperm.slane %v2310_v39, %v4906_v32  ;;  %v3553_v59 = vpop.eup %3552 }
 0x440   : >> { %v2748_v45 = vsel %vm2570_vm3, %v2747_v30, %v2746_v43  ;;  %v2689_v5 = vperm.slane %v2280_v62, %v4934_v2  ;;  %v1906_v43 = vadd.f32 %v5117_v22, %v4938_v7  ;;  %v2105_v46 = vmul.f32 %v3553_v59, %v4694_v51  ;;  %v3555_v40 = vpop.eup %3554 }
 0x441   : >> { %v2719_v19 = vsel %vm2574_vm4, %v2718_v4, %v2717_v15  ;;  %v2135_v15 = vmul.f32 %v3549_v60, %v4694_v51 }
 0x442   : >> { %2265 = vadd.xlane.f32.xlu2 %v2090_v41  ;;  %v2690_v21 = vsel %vm2578_vm5, %v2689_v5, %v5207_v11  ;;  %3556 = vtanh.f32 %v1906_v43 }
 0x443   : >> { %2413 = vadd.xlane.f32.xlu1 %v2164_v34  ;;  %3558 = vtanh.f32 %v1891_v23  ;;  %v1907_v23 = vadd.f32 %v5152_v36, %v4938_v7 }
 0x444   : >> { %2383 = vadd.xlane.f32.xlu0 %v2149_v38  ;;  %3560 = vtanh.f32 %v1892_v6  ;;  %v1878_v38 = vadd.f32 %v5193_v61, %v4849_v26 }
 0x445   : >> { %v2252_v8 = vpop.xlane.xlu2 %2251 }
 0x446   : >> { %v2662_v54 = vperm.slane %v2252_v8, %v4931_v63  ;;  %v2400_v56 = vpop.xlane.xlu1 %2399 }
 0x447   : >> { %v2370_v17 = vpop.xlane.xlu0 %2369  ;;  %v2805_v22 = vperm.slane %v2400_v56, %v4899_v28  ;;  %v1877_v28 = vadd.f32 %v5162_v57, %v4849_v26 }
 0x448   : >> { %v2663_v11 = vsel %vm2586_vm7, %v2662_v54, %v2661_v1  ;;  %v2776_v53 = vperm.slane %v2370_v17, %v4893_v25  ;;  %v1862_v1 = vadd.f32 %v5193_v61, %v4838_v42  ;;  %v3557_v44 = vpop.eup %3556 }
 0x449   : >> { %v2806_v47 = vsel %vm2562_vm1, %v2805_v22, %v2804_v12  ;;  %v3559_v50 = vpop.eup %3558  ;;  %v2106_v12 = vmul.f32 %v3555_v40, %v4694_v51  ;;  %3562 = vtanh.f32 %v1877_v28  ;;  %v2165_v4 = vmul.f32 %v3557_v44, %v4694_v51 }
 0x44a   : >> { %2355 = vadd.xlane.f32.xlu2 %v2135_v15  ;;  %v2777_v27 = vsel %vm2566_vm2, %v2776_v53, %v5224_v18  ;;  %3564 = vtanh.f32 %v1862_v1  ;;  %v2150_v5 = vmul.f32 %v3559_v50, %v4694_v51  ;;  %v3561_v60 = vpop.eup %3560  ;;  %vm2837_vm1 = vcmask 1043459  }
 0x44b   : >> { %2325 = vadd.xlane.f32.xlu1 %v2120_v20  ;;  %3566 = vtanh.f32 %v1878_v38  ;;  %v1879_v20 = vadd.f32 %v5231_v13, %v4849_v26 }
 0x44c   : >> { %2295 = vadd.xlane.f32.xlu0 %v2105_v46 }
 0x44d   : >> { %v2342_v49 = vpop.xlane.xlu2 %2341 }
 0x44e   : >> { %v2749_v30 = vperm.slane %v2342_v49, %v4906_v32  ;;  %v2312_v41 = vpop.xlane.xlu1 %2311 }
 0x44f   : >> { %v2282_v39 = vpop.xlane.xlu0 %2281  ;;  %v2720_v62 = vperm.slane %v2312_v41, %v4934_v2  ;;  %v3563_v33 = vpop.eup %3562  ;;  %v1895_v41 = vadd.f32 %v5231_v13, %v4870_v35 }
 0x450   : >> { %v2750_v18 = vsel %vm2574_vm4, %v2749_v30, %v2748_v45  ;;  %v2691_v34 = vperm.slane %v2282_v39, %v4920_v58  ;;  %v1863_v45 = vadd.f32 %v5231_v13, %v4838_v42  ;;  %v3565_v59 = vpop.eup %3564  ;;  %v2136_v17 = vmul.f32 %v3563_v33, %v4694_v51 }
 0x451   : >> { %v2721_v16 = vsel %vm2578_vm5, %v2720_v62, %v2719_v19  ;;  %v2151_v19 = vmul.f32 %v3561_v60, %v4694_v51  ;;  %v2121_v22 = vmul.f32 %v3565_v59, %v4694_v51  ;;  %v3567_v46 = vpop.eup %3566 }
 0x452   : >> { %2297 = vadd.xlane.f32.xlu2 %v2106_v12  ;;  %v2692_v43 = vsel %vm2582_vm6, %v2691_v34, %v2690_v21  ;;  %3568 = vtanh.f32 %v1863_v45  ;;  %v1894_v34 = vadd.f32 %v5193_v61, %v4870_v35 }
 0x453   : >> { %2415 = vadd.xlane.f32.xlu1 %v2165_v4  ;;  %3570 = vtanh.f32 %v1907_v23 }
 0x454   : >> { %2385 = vadd.xlane.f32.xlu0 %v2150_v5  ;;  %3572 = vtanh.f32 %v1879_v20 }
 0x455   : >> { %v2254_v8 = vpop.xlane.xlu2 %2253 }
 0x456   : >> { %v2664_v54 = vperm.slane %v2254_v8, %v4962_v48  ;;  %v2402_v15 = vpop.xlane.xlu1 %2401 }
 0x457   : >> { %v2372_v56 = vpop.xlane.xlu0 %2371  ;;  %v2807_v42 = vperm.slane %v2402_v15, %v4893_v25  ;;  %v1893_v25 = vadd.f32 %v5162_v57, %v4870_v35 }
 0x458   : >> { %v2665_v21 = vsel %vm2590_vm8, %v2664_v54, %v2663_v11  ;;  %v2778_v36 = vperm.slane %v2372_v56, %v4903_v31  ;;  %v1908_v11 = vadd.f32 %v5129_v52, %v4938_v7  ;;  %v3569_v40 = vpop.eup %3568  ;;  %v1911_v56 = vadd.f32 %v5231_v13, %v4938_v7 }
 0x459   : >> { %v2808_v53 = vsel %vm2566_vm2, %v2807_v42, %v2806_v47  ;;  %v3571_v1 = vpop.eup %3570  ;;  %v2137_v47 = vmul.f32 %v3567_v46, %v4694_v51  ;;  %v2122_v50 = vmul.f32 %v3569_v40, %v4694_v51  ;;  %vm2839_vm2 = vcmask 1044484  }
 0x45a   : >> { %2387 = vadd.xlane.f32.xlu2 %v2151_v19  ;;  %v2779_v6 = vsel %vm2570_vm3, %v2778_v36, %v2777_v27  ;;  %3574 = vtanh.f32 %v1908_v11  ;;  %v2166_v12 = vmul.f32 %v3571_v1, %v4694_v51  ;;  %v3573_v62 = vpop.eup %3572 }
 0x45b   : >> { %2357 = vadd.xlane.f32.xlu1 %v2136_v17  ;;  %3576 = vtanh.f32 %v1893_v25 }
 0x45c   : >> { %2327 = vadd.xlane.f32.xlu0 %v2121_v22  ;;  %3578 = vtanh.f32 %v1895_v41 }
 0x45d   : >> { %v2344_v28 = vpop.xlane.xlu2 %2343 }
 0x45e   : >> { %v2751_v26 = vperm.slane %v2344_v28, %v4934_v2  ;;  %v2314_v44 = vpop.xlane.xlu1 %2313 }
 0x45f   : >> { %v2284_v49 = vpop.xlane.xlu0 %2283  ;;  %v2722_v52 = vperm.slane %v2314_v44, %v4920_v58 }
 0x460   : >> { %v2752_v27 = vsel %vm2578_vm5, %v2751_v26, %v2750_v18  ;;  %v2693_v30 = vperm.slane %v2284_v49, %v4931_v63  ;;  %v1909_v18 = vadd.f32 %v5162_v57, %v4938_v7  ;;  %v3575_v5 = vpop.eup %3574 }
 0x461   : >> { %v2723_v39 = vsel %vm2582_vm6, %v2722_v52, %v2721_v16  ;;  %v3577_v60 = vpop.eup %3576  ;;  %v2138_v16 = vmul.f32 %v3573_v62, %v4694_v51  ;;  %v2167_v8 = vmul.f32 %v3575_v5, %v4694_v51 }
 0x462   : >> { %2359 = vadd.xlane.f32.xlu2 %v2137_v47  ;;  %v2694_v4 = vsel %vm2586_vm7, %v2693_v30, %v2692_v43  ;;  %3580 = vtanh.f32 %v1909_v18  ;;  %v2152_v59 = vmul.f32 %v3577_v60, %v4694_v51  ;;  %v3579_v19 = vpop.eup %3578 }
 0x463   : >> { %2329 = vadd.xlane.f32.xlu1 %v2122_v50  ;;  %3582 = vtanh.f32 %v1894_v34  ;;  %v2154_v22 = vmul.f32 %v3579_v19, %v4694_v51 }
 0x464   : >> { %2417 = vadd.xlane.f32.xlu0 %v2166_v12  ;;  %3584 = vtanh.f32 %v1911_v56 }
 0x465   : >> { %v2256_v38 = vpop.xlane.xlu2 %2255 }
 0x466   : >> { %v2666_v45 = vperm.slane %v2256_v38, %v4953_v37  ;;  %v2404_v23 = vpop.xlane.xlu1 %2403 }
 0x467   : >> { %v2374_v33 = vpop.xlane.xlu0 %2373  ;;  %v2809_v57 = vperm.slane %v2404_v23, %v4903_v31  ;;  %v1910_v31 = vadd.f32 %v5193_v61, %v4938_v7 }
 0x468   : >> { %v2667_v43 = vsel %vm2594_vm9, %v2666_v45, %v2665_v21  ;;  %v2780_v35 = vperm.slane %v2374_v33, %v4906_v32  ;;  %v3581_v21 = vpop.eup %3580 }
 0x469   : >> { %v2810_v54 = vsel %vm2570_vm3, %v2809_v57, %v2808_v53  ;;  %v3583_v17 = vpop.eup %3582  ;;  %v2168_v13 = vmul.f32 %v3581_v21, %v4694_v51  ;;  %3586 = vtanh.f32 %v1910_v31  ;;  %vm2841_vm3 = vcmask 1045509  }
 0x46a   : >> { %2361 = vadd.xlane.f32.xlu2 %v2138_v16  ;;  %v2781_v15 = vsel %vm2574_vm4, %v2780_v35, %v2779_v6  ;;  %v2153_v61 = vmul.f32 %v3583_v17, %v4694_v51  ;;  %v3585_v40 = vpop.eup %3584 }
 0x46b   : >> { %2419 = vadd.xlane.f32.xlu1 %v2167_v8  ;;  %v2170_v52 = vmul.f32 %v3585_v40, %v4694_v51 }
 0x46c   : >> { %2389 = vadd.xlane.f32.xlu0 %v2152_v59 }
 0x46d   : >> { %v2346_v42 = vpop.xlane.xlu2 %2345 }
 0x46e   : >> { %v2753_v36 = vperm.slane %v2346_v42, %v4920_v58  ;;  %v2316_v20 = vpop.xlane.xlu1 %2315 }
 0x46f   : >> { %v2286_v53 = vpop.xlane.xlu0 %2285  ;;  %v2724_v6 = vperm.slane %v2316_v20, %v4931_v63  ;;  %v3587_v1 = vpop.eup %3586 }
 0x470   : >> { %v2754_v46 = vsel %vm2582_vm6, %v2753_v36, %v2752_v27  ;;  %v2695_v7 = vperm.slane %v2286_v53, %v4962_v48  ;;  %v2169_v30 = vmul.f32 %v3587_v1, %v4694_v51 }
 0x471   : >> { %v2725_v11 = vsel %vm2586_vm7, %v2724_v6, %v2723_v39 }
 0x472   : >> { %2393 = vadd.xlane.f32.xlu2 %v2154_v22  ;;  %v2696_v25 = vsel %vm2590_vm8, %v2695_v7, %v2694_v4 }
 0x473   : >> { %2421 = vadd.xlane.f32.xlu1 %v2168_v13 }
 0x474   : >> { %2391 = vadd.xlane.f32.xlu0 %v2153_v61 }
 0x475   : >> { %v2258_v28 = vpop.xlane.xlu2 %2257 }
 0x476   : >> { %v2668_v26 = vperm.slane %v2258_v28, %v4958_v24  ;;  %v2406_v47 = vpop.xlane.xlu1 %2405 }
 0x477   : >> { %v2376_v44 = vpop.xlane.xlu0 %2375  ;;  %v2811_v27 = vperm.slane %v2406_v47, %v4906_v32 }
 0x478   : >> { %v2669_v49 = vsel %vm2598_vm10, %v2668_v26, %v2667_v43  ;;  %v2782_v50 = vperm.slane %v2376_v44, %v4934_v2 }
 0x479   : >> { %v2812_v12 = vsel %vm2574_vm4, %v2811_v27, %v2810_v54  ;;  %vm2843_vm4 = vcmask 1046534  }
 0x47a   : >> { %v2783_v41 = vsel %vm2578_vm5, %v2782_v50, %v2781_v15 }
 0x47b   : >> { %2425 = vadd.xlane.f32.xlu1 %v2170_v52 }
 0x47c   : >> { %2423 = vadd.xlane.f32.xlu0 %v2169_v30 }
 0x47d   : >> { %v2348_v39 = vpop.xlane.xlu2 %2347 }
 0x47e   : >> { %v2755_v62 = vperm.slane %v2348_v39, %v4931_v63  ;;  %v2318_v4 = vpop.xlane.xlu1 %2317 }
 0x47f   : >> { %v2288_v18 = vpop.xlane.xlu0 %2287  ;;  %v2726_v32 = vperm.slane %v2318_v4, %v4962_v48 }
 0x480   : >> { %v2756_v34 = vsel %vm2586_vm7, %v2755_v62, %v2754_v46  ;;  %v2697_v5 = vperm.slane %v2288_v18, %v4953_v37 }
 0x481   : >> { %v2727_v38 = vsel %vm2590_vm8, %v2726_v32, %v2725_v11 }
 0x482   : >> { %v2698_v51 = vsel %vm2594_vm9, %v2697_v5, %v2696_v25 }
 0x485   : >> { %v2260_v60 = vpop.xlane.xlu2 %2259 }
 0x486   : >> { %v2670_v45 = vperm.slane %v2260_v60, %v4986_v14  ;;  %v2408_v16 = vpop.xlane.xlu1 %2407 }
 0x487   : >> { %v2378_v23 = vpop.xlane.xlu0 %2377  ;;  %v2813_v43 = vperm.slane %v2408_v16, %v4934_v2 }
 0x488   : >> { %v2671_v33 = vsel %vm2602_vm11, %v2670_v45, %v2669_v49  ;;  %v2784_v57 = vperm.slane %v2378_v23, %v4920_v58 }
 0x489   : >> { %v2814_v8 = vsel %vm2578_vm5, %v2813_v43, %v2812_v12  ;;  %vm2845_vm5 = vcmask 1047559  }
 0x48a   : >> { %v2785_v35 = vsel %vm2582_vm6, %v2784_v57, %v2783_v41 }
 0x48d   : >> { %v2350_v59 = vpop.xlane.xlu2 %2349 }
 0x48e   : >> { %v2757_v54 = vperm.slane %v2350_v59, %v4962_v48  ;;  %v2320_v19 = vpop.xlane.xlu1 %2319 }
 0x48f   : >> { %v2290_v15 = vpop.xlane.xlu0 %2289  ;;  %v2728_v31 = vperm.slane %v2320_v19, %v4953_v37 }
 0x490   : >> { %v2758_v56 = vsel %vm2590_vm8, %v2757_v54, %v2756_v34  ;;  %v2699_v21 = vperm.slane %v2290_v15, %v4958_v24 }
 0x491   : >> { %v2729_v42 = vsel %vm2594_vm9, %v2728_v31, %v2727_v38 }
 0x492   : >> { %v2700_v2 = vsel %vm2598_vm10, %v2699_v21, %v2698_v51 }
 0x495   : >> { %v2262_v17 = vpop.xlane.xlu2 %2261 }
 0x496   : >> { %v2672_v36 = vperm.slane %v2262_v17, %v4977_v3  ;;  %v2410_v22 = vpop.xlane.xlu1 %2409 }
 0x497   : >> { %v2380_v20 = vpop.xlane.xlu0 %2379  ;;  %v2815_v46 = vperm.slane %v2410_v22, %v4920_v58 }
 0x498   : >> { %v2673_v53 = vsel %vm2606_vm12, %v2672_v36, %v2671_v33  ;;  %v2786_v6 = vperm.slane %v2380_v20, %v4931_v63 }
 0x499   : >> { %v2816_v13 = vsel %vm2582_vm6, %v2815_v46, %v2814_v8 }
 0x49a   : >> { %v2787_v7 = vsel %vm2586_vm7, %v2786_v6, %v2785_v35 }
 0x49d   : >> { %v2352_v61 = vpop.xlane.xlu2 %2351 }
 0x49e   : >> { %v2759_v11 = vperm.slane %v2352_v61, %v4953_v37  ;;  %v2322_v25 = vpop.xlane.xlu1 %2321 }
 0x49f   : >> { %v2292_v40 = vpop.xlane.xlu0 %2291  ;;  %v2730_v1 = vperm.slane %v2322_v25, %v4958_v24 }
 0x4a0   : >> { %v2760_v28 = vsel %vm2594_vm9, %v2759_v11, %v2758_v56  ;;  %v2701_v26 = vperm.slane %v2292_v40, %v4986_v14 }
 0x4a1   : >> { %v2731_v47 = vsel %vm2598_vm10, %v2730_v1, %v2729_v42 }
 0x4a2   : >> { %v2702_v58 = vsel %vm2602_vm11, %v2701_v26, %v2700_v2 }
 0x4a5   : >> { %v2264_v44 = vpop.xlane.xlu2 %2263 }
 0x4a6   : >> { %v2412_v49 = vpop.xlane.xlu1 %2411  ;;  %v2674_v4 = vperm.slane %v2264_v44, %v4982_v9 }
 0x4a7   : >> { %v2382_v27 = vpop.xlane.xlu0 %2381  ;;  %v2817_v52 = vperm.slane %v2412_v49, %v4931_v63 }
 0x4a8   : >> { %v2788_v50 = vperm.slane %v2382_v27, %v4962_v48  ;;  %v2675_v32 = vsel %vm2610_vm13, %v2674_v4, %v2673_v53 }
 0x4a9   : >> { %v5395_v30 = vsel %vm2586_vm7, %v2817_v52, %v2816_v13 }
 0x4aa   : >> { %v5398_v12 = vsel %vm2590_vm8, %v2788_v50, %v2787_v7 }
 0x4ad   : >> { %v2354_v41 = vpop.xlane.xlu2 %2353 }
 0x4ae   : >> { %v2324_v39 = vpop.xlane.xlu1 %2323  ;;  %v2761_v20 = vperm.slane %v2354_v41, %v4958_v24 }
 0x4af   : >> { %v2294_v62 = vpop.xlane.xlu0 %2293  ;;  %v2732_v21 = vperm.slane %v2324_v39, %v4986_v14 }
 0x4b0   : >> { %v2703_v23 = vperm.slane %v2294_v62, %v4977_v3  ;;  %v2762_v1 = vsel %vm2598_vm10, %v2761_v20, %v2760_v28  ;;  %v2893_v20 = vld [vmem:[%s5474_s6 + $0xc0] sm:$0xff] }
 0x4b1   : >> { %v2733_v36 = vsel %vm2602_vm11, %v2732_v21, %v2731_v47 }
 0x4b2   : >> { %v2704_v57 = vsel %vm2606_vm12, %v2703_v23, %v2702_v58 }
 0x4b5   : >> { %v2266_v18 = vpop.xlane.xlu2 %2265 }
 0x4b6   : >> { %v2676_v34 = vperm.slane %v2266_v18, %v5004_v55  ;;  %v5403_v63 = vpop.xlane.xlu1 %2413 }
 0x4b7   : >> { %v2384_v5 = vpop.xlane.xlu0 %2383 }
 0x4b8   : >> { %v2677_v38 = vsel %vm2614_vm14, %v2676_v34, %v2675_v32  ;;  %v2790_v39 = vperm.slane %v2384_v5, %v4953_v37 }
 0x4b9   : >> { %v2836_v51 = vsel %vm2835_vm0, %v2677_v38, %v5096_v29 }
 0x4ba   : >> { %v2791_v34 = vsel %vm2594_vm9, %v2790_v39, %v5398_v12 }
 0x4bd   : >> { %v2356_v60 = vpop.xlane.xlu2 %2355 }
 0x4be   : >> { %v2326_v45 = vpop.xlane.xlu1 %2325  ;;  %v2763_v13 = vperm.slane %v2356_v60, %v4986_v14 }
 0x4bf   : >> { %v2296_v16 = vpop.xlane.xlu0 %2295  ;;  %v2734_v42 = vperm.slane %v2326_v45, %v4977_v3 }
 0x4c0   : >> { %v2705_v33 = vperm.slane %v2296_v16, %v4982_v9  ;;  %v2764_v26 = vsel %vm2602_vm11, %v2763_v13, %v2762_v1  ;;  %v2819_v16 = vperm.slane %v5403_v63, %v4962_v48  ;;  %v2889_v13 = vld [vmem:[%s5474_s6 + $0xa0] sm:$0xff]  ;;  %v2883_v1 = vld [vmem:[%s5474_s6 + $0x70] sm:$0xff] }
 0x4c1   : >> { %v2735_v53 = vsel %vm2606_vm12, %v2734_v42, %v2733_v36  ;;  %v2900_v42 = vld [vmem:[%s5474_s6 + $0xf8] sm:$0xff]  ;;  %v2895_v36 = vld [vmem:[%s5474_s6 + $0xd0] sm:$0xff] }
 0x4c2   : >> { %v2706_v35 = vsel %vm2610_vm13, %v2705_v33, %v2704_v57  ;;  %2921 = vmatpush.msra.mxu1 %v2900_v42 }
 0x4c5   : >> { %v2298_v43 = vpop.xlane.xlu2 %2297 }
 0x4c6   : >> { %v2707_v8 = vperm.slane %v2298_v43, %v5004_v55  ;;  %v5412_v59 = vpop.xlane.xlu1 %2415 }
 0x4c7   : >> { %v2386_v54 = vpop.xlane.xlu0 %2385  ;;  %v2821_v12 = vperm.slane %v5412_v59, %v4953_v37 }
 0x4c8   : >> { %v2708_v29 = vsel %vm2614_vm14, %v2707_v8, %v2706_v35  ;;  %v2792_v28 = vperm.slane %v2386_v54, %v4958_v24  ;;  %v2820_v54 = vsel %vm2590_vm8, %v2819_v16, %v5395_v30 }
 0x4c9   : >> { %v2838_v19 = vsel %vm2837_vm1, %v2708_v29, %v2836_v51  ;;  %v2822_v63 = vsel %vm2594_vm9, %v2821_v12, %v2820_v54 }
 0x4ca   : >> { %v2793_v38 = vsel %vm2598_vm10, %v2792_v28, %v2791_v34  ;;  %v2877_v28 = vld [vmem:[%s5474_s6 + $0x40] sm:$0xff] }
 0x4cb   : >> { %v2873_v34 = vld [vmem:[%s5474_s6 + $0x20] sm:$0xff] }
 0x4cd   : >> { %v2388_v15 = vpop.xlane.xlu2 %2387 }
 0x4ce   : >> { %v2358_v56 = vpop.xlane.xlu1 %2357  ;;  %v2794_v62 = vperm.slane %v2388_v15, %v4986_v14 }
 0x4cf   : >> { %v2328_v31 = vpop.xlane.xlu0 %2327  ;;  %v2765_v61 = vperm.slane %v2358_v56, %v4977_v3 }
 0x4d0   : >> { %v2736_v2 = vperm.slane %v2328_v31, %v4982_v9  ;;  %v2795_v5 = vsel %vm2602_vm11, %v2794_v62, %v2793_v38  ;;  %v2878_v62 = vld [vmem:[%s5474_s6 + $0x48] sm:$0xff]  ;;  %v2871_v38 = vld [vmem:[%s5474_s6 + $0x10] sm:$0xff] }
 0x4d1   : >> { %v2766_v58 = vsel %vm2606_vm12, %v2765_v61, %v2764_v26  ;;  %v2887_v61 = vld [vmem:[%s5474_s6 + $0x90] sm:$0xff]  ;;  %v2884_v26 = vld [vmem:[%s5474_s6 + $0x78] sm:$0xff] }
 0x4d2   : >> { %v2737_v7 = vsel %vm2610_vm13, %v2736_v2, %v2735_v53  ;;  %v2897_v2 = vld [vmem:[%s5474_s6 + $0xe0] sm:$0xff]  ;;  %v2894_v53 = vld [vmem:[%s5474_s6 + $0xc8] sm:$0xff] }
 0x4d5   : >> { %v2360_v17 = vpop.xlane.xlu2 %2359 }
 0x4d6   : >> { %v2330_v22 = vpop.xlane.xlu1 %2329  ;;  %v2767_v25 = vperm.slane %v2360_v17, %v4982_v9  ;;  %v2898_v17 = vld [vmem:[%s5474_s6 + $0xe8] sm:$0xff] }
 0x4d7   : >> { %v2418_v46 = vpop.xlane.xlu0 %2417  ;;  %v2738_v6 = vperm.slane %v2330_v22, %v5004_v55  ;;  %v2896_v22 = vld [vmem:[%s5474_s6 + $0xd8] sm:$0xff]  ;;  %2922 = vmatpush.msra.mxu1 %v2898_v17 }
 0x4d8   : >> { %v2768_v49 = vsel %vm2610_vm13, %v2767_v25, %v2766_v58  ;;  %v2823_v43 = vperm.slane %v2418_v46, %v4958_v24  ;;  %v2891_v46 = vld [vmem:[%s5474_s6 + $0xb0] sm:$0xff]  ;;  %v2885_v25 = vld [vmem:[%s5474_s6 + $0x80] sm:$0xff]  ;;  %v2882_v58 = vld [vmem:[%s5474_s6 + $0x68] sm:$0xff] }
 0x4d9   : >> { %v2739_v11 = vsel %vm2614_vm14, %v2738_v6, %v2737_v7  ;;  %2923 = vmatpush.msra.mxu1 %v2896_v22  ;;  %v2892_v6 = vld [vmem:[%s5474_s6 + $0xb8] sm:$0xff]  ;;  %v2890_v7 = vld [vmem:[%s5474_s6 + $0xa8] sm:$0xff] }
 0x4da   : >> { %v2840_v40 = vsel %vm2839_vm2, %v2739_v11, %v2838_v19  ;;  %v2824_v37 = vsel %vm2598_vm10, %v2823_v43, %v2822_v63  ;;  %v2852_v19 = vstv %s2851_s30  ;;  %v2888_v11 = vld [vmem:[%s5474_s6 + $0x98] sm:$0xff] }
 0x4db   : >> { %vm5465_vm6 = vcmp.lt.s32.totalorder %v4641_v10, %v2852_v19  ;;  %2924 = vmatpush.msra.mxu1 %v2894_v53 }
 0x4dd   : >> { %v2362_v47 = vpop.xlane.xlu2 %2361  ;;  %2925 = vmatpush.msra.mxu1 %v2892_v6 }
 0x4de   : >> { %v2769_v44 = vperm.slane %v2362_v47, %v5004_v55  ;;  %v2420_v27 = vpop.xlane.xlu1 %2419  ;;  %v2881_v47 = vld [vmem:[%s5474_s6 + $0x60] sm:$0xff] }
 0x4df   : >> { %v2390_v52 = vpop.xlane.xlu0 %2389  ;;  %v2825_v8 = vperm.slane %v2420_v27, %v4986_v14  ;;  %2926 = vmatpush.msra.mxu1 %v2890_v7 }
 0x4e0   : >> { %v2770_v50 = vsel %vm2614_vm14, %v2769_v44, %v2768_v49  ;;  %v2796_v18 = vperm.slane %v2390_v52, %v4977_v3  ;;  %v2879_v44 = vld [vmem:[%s5474_s6 + $0x50] sm:$0xff]  ;;  %v2880_v49 = vld [vmem:[%s5474_s6 + $0x58] sm:$0xff] }
 0x4e1   : >> { %v2842_v41 = vsel %vm2841_vm3, %v2770_v50, %v2840_v40  ;;  %v2826_v15 = vsel %vm2602_vm11, %v2825_v8, %v2824_v37  ;;  %v2886_v40 = vld [vmem:[%s5474_s6 + $0x88] sm:$0xff]  ;;  %2927 = vmatpush.msra.mxu1 %v2888_v11 }
 0x4e2   : >> { %v2797_v23 = vsel %vm2606_vm12, %v2796_v18, %v2795_v5  ;;  %v2876_v18 = vld [vmem:[%s5474_s6 + $0x38] sm:$0xff]  ;;  %v2870_v5 = vld [vmem:[%s5474_s6 + $0x8] sm:$0xff] }
 0x4e3   : >> { %2928 = vmatpush.msra.mxu1 %v2886_v40 }
 0x4e5   : >> { %v2394_v4 = vpop.xlane.xlu2 %2393  ;;  %2929 = vmatpush.msra.mxu1 %v2884_v26 }
 0x4e6   : >> { %v2422_v32 = vpop.xlane.xlu1 %2421  ;;  %v2800_v60 = vperm.slane %v2394_v4, %v5004_v55  ;;  %v2875_v4 = vld [vmem:[%s5474_s6 + $0x30] sm:$0xff] }
 0x4e7   : >> { %v2392_v51 = vpop.xlane.xlu0 %2391  ;;  %v2827_v48 = vperm.slane %v2422_v32, %v4977_v3  ;;  %2930 = vmatpush.msra.mxu1 %v2882_v58  ;;  %v2874_v32 = vld [vmem:[%s5474_s6 + $0x28] sm:$0xff] }
 0x4e8   : >> { %v2798_v45 = vperm.slane %v2392_v51, %v4982_v9  ;;  %v2872_v51 = vld [vmem:[%s5474_s6 + $0x18] sm:$0xff] }
 0x4e9   : >> { %v2828_v56 = vsel %vm2606_vm12, %v2827_v48, %v2826_v15  ;;  %2931 = vmatpush.msra.mxu1 %v2880_v49 }
 0x4ea   : >> { %v2799_v33 = vsel %vm2610_vm13, %v2798_v45, %v2797_v23 }
 0x4eb   : >> { %v2801_v57 = vsel %vm2614_vm14, %v2800_v60, %v2799_v33  ;;  %2932 = vmatpush.msra.mxu1 %v2878_v62  ;;  %v2869_v60 = vld [vmem:[%s5474_s6] sm:$0xff] }
 0x4ec   : >> { %v2844_v35 = vsel %vm2843_vm4, %v2801_v57, %v2842_v41 }
 0x4ed   : >> { %2933 = vmatpush.msra.mxu1 %v2876_v18 }
 0x4ee   : >> { %v2426_v29 = vpop.xlane.xlu1 %2425 }
 0x4ef   : >> { %v2424_v59 = vpop.xlane.xlu0 %2423  ;;  %v2831_v24 = vperm.slane %v2426_v29, %v5004_v55  ;;  %2934 = vmatpush.msra.mxu1 %v2874_v32 }
 0x4f0   : >> { %v2829_v14 = vperm.slane %v2424_v59, %v4982_v9  ;;  %v2899_v9 = vld [vmem:[%s5474_s6 + $0xf0] sm:$0xff] }
 0x4f1   : >> { %2901 = vmatpush.msra.mxu0 %v2899_v9  ;;  %2935 = vmatpush.msra.mxu1 %v2872_v51 }
 0x4f2   : >> { %v2830_v3 = vsel %vm2610_vm13, %v2829_v14, %v2828_v56 }
 0x4f3   : >> { %v2832_v31 = vsel %vm2614_vm14, %v2831_v24, %v2830_v3  ;;  %2902 = vmatpush.msra.mxu0 %v2897_v2  ;;  %2936 = vmatpush.msra.mxu1 %v2870_v5 }
 0x4f4   : >> { %v2846_v21 = vsel %vm2845_vm5, %v2832_v31, %v2844_v35 }
 0x4f5   : >> { %v2855_v55 = vsel %vm5465_vm6, %v2846_v21, -1e+30  ;;  %2903 = vmatpush.msra.mxu0 %v2895_v36 }
 0x4f6   : >> { %2856 = vmax.xlane.f32.xlu2 %v2855_v55 }
 0x4f7   : >> { %2904 = vmatpush.msra.mxu0 %v2893_v20 }
 0x4f9   : >> { %2905 = vmatpush.msra.mxu0 %v2891_v46 }
 0x4fb   : >> { %2906 = vmatpush.msra.mxu0 %v2889_v13 }
 0x4fd   : >> { %2907 = vmatpush.msra.mxu0 %v2887_v61 }
 0x4ff   : >> { %2908 = vmatpush.msra.mxu0 %v2885_v25 }
 0x501   : >> { %2909 = vmatpush.msra.mxu0 %v2883_v1 }
 0x503   : >> { %2910 = vmatpush.msra.mxu0 %v2881_v47 }
 0x505   : >> { %2911 = vmatpush.msra.mxu0 %v2879_v44 }
 0x507   : >> { %2912 = vmatpush.msra.mxu0 %v2877_v28 }
 0x509   : >> { %2913 = vmatpush.msra.mxu0 %v2875_v4 }
 0x50b   : >> { %2914 = vmatpush.msra.mxu0 %v2873_v34 }
 0x50d   : >> { %2915 = vmatpush.msra.mxu0 %v2871_v38 }
 0x50f   : >> { %2916 = vmatpush.msra.mxu0 %v2869_v60 }
 0x569   : >> { %v2857_v27 = vpop.xlane.xlu2 %2856 }
 0x56a   : >> { %v2858_v52 = vsub.f32 %v2855_v55, %v2857_v27 }
 0x56c   : >> { %v2859_v50 = vmul.f32 1.442695, %v2858_v52 }
 0x56e   : >> { %3588 = vpow2.f32 %v2859_v50 }
 0x574   : >> { %v3589_v41 = vpop.eup %3588 }
 0x575   : >> { %v2861_v39 = vsel %vm5465_vm6, %v3589_v41, 0.0 }
 0x576   : >> { %2862 = vadd.xlane.f32.xlu0 %v2861_v39 }
 0x5e9   : >> { %v2863_v45 = vpop.xlane.xlu0 %2862 }
 0x5ea   : >> { %3590 = vrcp.f32 %v2863_v45 }
 0x5f0   : >> { %v3591_v16 = vpop.eup %3590 }
 0x5f1   : >> { %v2865_v23 = vmul.f32 %v3591_v16, %v2861_v39 }
 0x5f3   : >> { %2917 = vmatmul.f32.vlgmr.msra.gmra.mxu0 %v2865_v23  ;;  %2937 = vmatmul.f32.vlgmr.msra.gmra.mxu1 %v2865_v23 }
 0x66e   : > { %1736 = sbr.rel (!%p1734_p1) target bundleno = 790 (0x316), region = 137 }
 0x670   : >> { %v2918_v12 = vpop.f32.mrf.mxu0  ;;  %v2938_v33 = vpop.f32.mrf.mxu1 }
 0x671   : >> { %2944 = vst [vmem:[%s2943_s25] sm:$0xff] %v2918_v12 }
 0x672   : >> { %2945 = vst [vmem:[%s2943_s25 + $0x8] sm:$0xff] %v2938_v33 }
 0x673   : > { %3852 = shalt.err (!%p3849_p10)
}
 0x674   : > { %s3929_s13 = smov 256   ;;  %s3930_s23 = smov 16  }
 0x675   : > { %3235 = dma.vmem_to_hbm [thread:$0]  (%p4075_p0), %s2961_s17, 2048, %s2963_s22, %s2947_s5, %s3929_s13, %s3929_s13, %s3930_s23  }
 0x676 PF: > { %s2977_s14 = sand.u32 1, %s3901_s9   ;;  %p5584_p11 = scmp.ge.s32.totalorder %s3913_s0, 2 }
 0x677   : > { %s2978_s30 = scalar_lea.sflag [#allocation9], %s2977_s14 }
 0x678   : > { %p3261_p12 = pnand %p5584_p11, %p4083_p6 }
 0x67a   : > { %p3262_p2 = pneg %p3261_p12 }
 0x67c   : > { %3896 = dma.done.wait (%p3262_p2), %s2978_s30, 2048  }
 0x67d   : > { %3898 = vsyncadd (%p3262_p2), %s2978_s30, 4294965248  ;;  %s5585_s7 = sld [smem:[#allocation27_spill]]  ;;  %p34_p4 = scmp.ge.s32.totalorder %s4051_s27, 4  }
 0x67e   : > { %s5586_s9 = smov %s3905_s10  ;;  %s5587_s10 = smov %s3909_s11 }
 0x67f   : > { %s5589_s0 = smov %s4051_s27  ;;  %36 = sbr.rel (!%p34_p4) target bundleno = 20 (0x14), region = 148 }
 0x683   : > { %s5588_s11 = smov %s5585_s7 }
 0x684   :  { %2984 = vsyncpa [#allocation8], 1 }
 0x685   :  { %2986 = vsyncpa [#allocation8 + $0x1], 1 }
 0x686   :  { %2987 = vsyncpa [#allocation11], 1 }
 0x687   :  { %2989 = vsyncpa [#allocation11 + $0x1], 1 }
 0x688   :  { %2990 = vsyncpa [#allocation14], 1 }
 0x689   :  { %2991 = vsyncpa [#allocation17], 1 }
 0x68a   :  { %2992 = vsyncpa [#allocation9], 1 }
 0x68b   :  { %2994 = vsyncpa [#allocation9 + $0x1], 1 }

</bundles_post_ra>
